<compile_context>
chip_gen: v7x
topology: tpu7x:2x2x1
jax: 0.10.0
libtpu: 0.0.40
codegen_flags: <defaults>
</compile_context>

<pallas_src>
import functools
import math

import jax
import jax.numpy as jnp
from jax.experimental import pallas as pl
from jax.experimental.pallas import tpu as pltpu


def _round_up(x, m):
    return (x + m - 1) // m * m


def _device_kind():
    try:
        return jax.devices()[0].device_kind.lower()
    except Exception:
        return ""


def _min_grid_tiles():
    """>=2 grid tiles on chips where one Pallas kernel spans 2 TensorCores."""
    kind = _device_kind()
    if any(t in kind for t in ("v7", "v4", "v5p")):
        return 2
    return 1


def _has_bf16_vpu():
    """v5e and older have no bf16 VPU path; keep elementwise ops in f32 there."""
    kind = _device_kind()
    if any(t in kind for t in ("v2", "v3", "v4", "v5")):
        return False
    return True


def _choose_batch_tile(batch, max_tile=512):
    padded = _round_up(batch, 128)
    n_tiles = max(_min_grid_tiles(), pl.cdiv(padded, max_tile))
    tile = _round_up(pl.cdiv(padded, n_tiles), 128)
    return min(tile, padded)


# ----------------------------------------------------------------------------
# Pallas kernel: whole MLP (encoder + decoder) fused, one batch tile per step.
# ----------------------------------------------------------------------------
def _make_mlp_kernel(out_dims, relu_flags, bf16_elementwise):
    """out_dims[i]: padded output width of layer i; relu_flags[i]: apply ReLU."""
    n_layers = len(out_dims)

    def kernel(x_ref, *refs):
        w_refs = refs[:n_layers]          # bf16 (in_i, out_i) weights, VMEM-resident
        b_ref = refs[n_layers]            # f32 (n_layers, max_out) packed biases
        o_ref = refs[n_layers + 1]        # f32 (TB, out_padded)

        h = x_ref[...].astype(jnp.bfloat16)                 # one input cast
        for i in range(n_layers):
            last = i == n_layers - 1
            # bf16 x bf16 MXU matmul with f32 accumulation.
            acc = jnp.dot(h, w_refs[i][...], preferred_element_type=jnp.float32)
            a = acc + b_ref[i:i + 1, :out_dims[i]]          # bias add in f32
            if (not last) and bf16_elementwise:
                a = a.astype(jnp.bfloat16)                  # ReLU + next dot in bf16
            if relu_flags[i]:
                a = jnp.maximum(a, 0)
            if (not last) and (not bf16_elementwise):
                a = a.astype(jnp.bfloat16)                  # feed next dot (MXU-native)
            h = a
        o_ref[...] = h.astype(o_ref.dtype)                  # last layer kept f32

    return kernel


# ----------------------------------------------------------------------------
# Parameter construction (mimics nn.Linear's U(-1/sqrt(in), 1/sqrt(in)) init)
# for MMD_VAE(size, num_latent, depth, batch_norm=False).
# ----------------------------------------------------------------------------
def init_mmd_vae_params(key, size, num_latent, depth):
    # Encoder: size -> 128*depth -> ... -> 128 -> num_latent
    enc_dims = [size, 128 * depth]
    for i in range(depth - 1):
        enc_dims.append(128 * (depth - i - 1))
    enc_dims.append(num_latent)
    # Decoder: num_latent -> 128 -> 256 -> ... -> 128*depth -> size
    dec_dims = [num_latent, 128]
    for i in range(depth - 1):
        dec_dims.append(128 * (i + 2))
    dec_dims.append(size)

    dims = list(zip(enc_dims[:-1], enc_dims[1:])) + list(zip(dec_dims[:-1], dec_dims[1:]))

    params = []
    for fan_in, fan_out in dims:
        key, kw, kb = jax.random.split(key, 3)
        bound = 1.0 / math.sqrt(fan_in)
        w = jax.random.uniform(kw, (fan_in, fan_out), jnp.float32, -bound, bound)
        b = jax.random.uniform(kb, (fan_out,), jnp.float32, -bound, bound)
        params.append((w, b))

    # batch_norm=False path: ReLU on every encoder layer except the latent
    # projection and every decoder layer except the final reconstruction.
    n_enc = len(enc_dims) - 1
    n_dec = len(dec_dims) - 1
    relu_flags = tuple([True] * (n_enc - 1) + [False] + [True] * (n_dec - 1) + [False])
    return params, relu_flags


def pack_params(params):
    """Prepare kernel operands.

    Every layer's in/out feature dims are zero-padded up to multiples of 128
    (exact: padding is zeros on both the weight and the matching activation
    columns).  Returns:
      weights   : tuple of bf16 (in_i, out_i) padded weights.
      bias_pack : f32 (n_layers, max_out) zero-padded bias slab (one operand).
      out_dims  : tuple of per-layer padded output widths.
      in_padded : padded input width of layer 0 (wrapper pads x columns to it).
    """
    weights, biases, out_dims = [], [], []
    for w, b in params:
        fan_in, fan_out = w.shape
        pin, pout = _round_up(fan_in, 128), _round_up(fan_out, 128)
        if (pin, pout) != (fan_in, fan_out):
            w = jnp.pad(w, ((0, pin - fan_in), (0, pout - fan_out)))
            b = jnp.pad(b, (0, pout - fan_out))
        weights.append(w.astype(jnp.bfloat16))
        biases.append(b)
        out_dims.append(pout)

    in_padded = int(weights[0].shape[0])
    max_out = max(out_dims)
    bias_pack = jnp.zeros((len(params), max_out), jnp.float32)
    for i, b in enumerate(biases):
        bias_pack = bias_pack.at[i, : b.shape[0]].set(b)
    return tuple(weights), bias_pack, tuple(out_dims), in_padded


# ----------------------------------------------------------------------------
# Wrapper calling pallas_call with a batch grid.
# ----------------------------------------------------------------------------
@functools.partial(
    jax.jit,
    static_argnames=("out_dims", "relu_flags", "batch_tile", "out_features",
                     "in_padded", "bf16_elementwise"),
)
def _mmd_vae_forward_jit(x, weights, bias_pack, *, out_dims, relu_flags,
                         batch_tile, out_features, in_padded, bf16_elementwise):
    batch, in_features = x.shape
    padded_batch = _round_up(batch, batch_tile)
    pad_rows = padded_batch - batch
    pad_cols = in_padded - in_features
    if pad_rows or pad_cols:
        x = jnp.pad(x, ((0, pad_rows), (0, pad_cols)))
    n_tiles = padded_batch // batch_tile
    out_padded = out_dims[-1]

    kernel = _make_mlp_kernel(out_dims, relu_flags, bf16_elementwise)

    x_spec = pl.BlockSpec((batch_tile, in_padded), lambda i: (i, 0))
    # Full-array blocks with constant index_maps -> weights/biases stay
    # resident in VMEM across all batch tiles (single DMA each).
    w_specs = [pl.BlockSpec(w.shape, lambda i: (0, 0)) for w in weights]
    b_spec = pl.BlockSpec(bias_pack.shape, lambda i: (0, 0))
    out_spec = pl.BlockSpec((batch_tile, out_padded), lambda i: (i, 0))

    weight_elems = sum(int(w.shape[0]) * int(w.shape[1]) for w in weights)
    cost = pl.CostEstimate(
        flops=2 * padded_batch * weight_elems,
        transcendentals=0,
        bytes_accessed=(padded_batch * in_padded * 4
                        + weight_elems * 2
                        + int(bias_pack.shape[0]) * int(bias_pack.shape[1]) * 4
                        + padded_batch * out_padded * 4),
    )

    out = pl.pallas_call(
        kernel,
        out_shape=jax.ShapeDtypeStruct((padded_batch, out_padded), jnp.float32),
        grid=(n_tiles,),
        in_specs=[x_spec] + w_specs + [b_spec],
        out_specs=out_spec,
        compiler_params=pltpu.CompilerParams(
            dimension_semantics=("parallel",),     # shard batch tiles across TCs
            vmem_limit_bytes=32 * 1024 * 1024,     # actual use is a few MiB max
        ),
        cost_estimate=cost,
    )(x, *weights, bias_pack)

    return out[:batch, :out_features]


def mmd_vae_forward(x, weights, bias_pack, *, out_dims, relu_flags, out_features,
                    in_padded, batch_tile=None, bf16_elementwise=None):
    if batch_tile is None:
        batch_tile = _choose_batch_tile(int(x.shape[0]))
    if bf16_elementwise is None:
        bf16_elementwise = _has_bf16_vpu()
    return _mmd_vae_forward_jit(
        x, weights, bias_pack,
        out_dims=out_dims, relu_flags=relu_flags, batch_tile=batch_tile,
        out_features=out_features, in_padded=in_padded,
        bf16_elementwise=bool(bf16_elementwise))


# ----------------------------------------------------------------------------
# References: (a) matching the kernel's cast points, (b) pure f32 (PyTorch-faithful).
# ----------------------------------------------------------------------------
def mmd_vae_reference_matched(x, params, relu_flags, bf16_elementwise):
    n = len(params)
    h = x.astype(jnp.bfloat16)
    for i, ((w, b), r) in enumerate(zip(params, relu_flags)):
        last = i == n - 1
        acc = jnp.dot(h, w.astype(jnp.bfloat16), preferred_element_type=jnp.float32)
        a = acc + b
        if (not last) and bf16_elementwise:
            a = a.astype(jnp.bfloat16)
        if r:
            a = jnp.maximum(a, 0)
        if (not last) and (not bf16_elementwise):
            a = a.astype(jnp.bfloat16)
        h = a
    return h.astype(jnp.float32)


def mmd_vae_reference_f32(x, params, relu_flags):
    h = x
    for (w, b), r in zip(params, relu_flags):
        h = h @ w + b
        if r:
            h = jnp.maximum(h, 0.0)
    return h


if __name__ == "__main__":
    # MMD_VAE(size=64, num_latent=4, depth=2), batch_norm=False.
    size = 64
    num_latent = 4
    depth = 2
    batch = 500          # not a multiple of 128 -> exercises the padding path

    key = jax.random.PRNGKey(0)
    key_x, key_p = jax.random.split(key)

    x = jax.random.normal(key_x, (batch, size), jnp.float32)
    params, relu_flags = init_mmd_vae_params(key_p, size, num_latent, depth)
    weights, bias_pack, out_dims, in_padded = pack_params(params)

    bf16_elementwise = _has_bf16_vpu()

    out = mmd_vae_forward(
        x, weights, bias_pack,
        out_dims=out_dims, relu_flags=relu_flags,
        out_features=size, in_padded=in_padded,
        bf16_elementwise=bf16_elementwise,
    )
    out = jax.block_until_ready(out)
    assert out.shape == (batch, size), out.shape

    # Tight check vs. a reference with identical cast points (same bf16 math).
    ref_m = mmd_vae_reference_matched(x, params, relu_flags, bf16_elementwise)
    assert jnp.allclose(out, ref_m, atol=1e-2, rtol=1e-2), float(
        jnp.max(jnp.abs(out - ref_m)))

    # Looser check vs. the pure-f32 PyTorch-faithful forward (bf16 MXU drift).
    ref_f32 = mmd_vae_reference_f32(x, params, relu_flags)
    assert jnp.allclose(out, ref_f32, atol=5e-2, rtol=5e-2), float(
        jnp.max(jnp.abs(out - ref_f32)))

    print("KERNEL_OK")
</pallas_src>

<mosaic_0001>
module attributes {stable_mosaic.version = 11 : i64} {
  func.func @kernel(%arg0: i32, %arg1: memref<512x128xf32, #tpu.memory_space<vmem>>, %arg2: memref<128x256xbf16, #tpu.memory_space<vmem>>, %arg3: memref<256x128xbf16, #tpu.memory_space<vmem>>, %arg4: memref<128x128xbf16, #tpu.memory_space<vmem>>, %arg5: memref<128x128xbf16, #tpu.memory_space<vmem>>, %arg6: memref<128x256xbf16, #tpu.memory_space<vmem>>, %arg7: memref<256x128xbf16, #tpu.memory_space<vmem>>, %arg8: memref<6x256xf32, #tpu.memory_space<vmem>>, %arg9: memref<512x128xf32, #tpu.memory_space<vmem>>) attributes {dimension_semantics = [#tpu.dimension_semantics<parallel>], iteration_bounds = array<i64: 1>, scalar_prefetch = 0 : i64, scratch_operands = 0 : i64, tpu.core_type = #tpu.core_type<tc>, window_params = [{transform_indices = @transform_0, window_bounds = array<i64: 512, 128>}, {pipeline_mode = #tpu.pipeline_mode<synchronous>, transform_indices = @transform_1, window_bounds = array<i64: 128, 256>}, {pipeline_mode = #tpu.pipeline_mode<synchronous>, transform_indices = @transform_2, window_bounds = array<i64: 256, 128>}, {pipeline_mode = #tpu.pipeline_mode<synchronous>, transform_indices = @transform_3, window_bounds = array<i64: 128, 128>}, {pipeline_mode = #tpu.pipeline_mode<synchronous>, transform_indices = @transform_4, window_bounds = array<i64: 128, 128>}, {pipeline_mode = #tpu.pipeline_mode<synchronous>, transform_indices = @transform_5, window_bounds = array<i64: 128, 256>}, {pipeline_mode = #tpu.pipeline_mode<synchronous>, transform_indices = @transform_6, window_bounds = array<i64: 256, 128>}, {pipeline_mode = #tpu.pipeline_mode<synchronous>, transform_indices = @transform_7, window_bounds = array<i64: 6, 256>}, {transform_indices = @transform_8, window_bounds = array<i64: 512, 128>}]} {
    %c0 = arith.constant 0 : index
    %c0_0 = arith.constant 0 : index
    %0 = vector.load %arg1[%c0, %c0_0] : memref<512x128xf32, #tpu.memory_space<vmem>>, vector<512x128xf32>
    %1 = arith.truncf %0 : vector<512x128xf32> to vector<512x128xbf16>
    %c0_1 = arith.constant 0 : index
    %c0_2 = arith.constant 0 : index
    %2 = vector.load %arg2[%c0_1, %c0_2] : memref<128x256xbf16, #tpu.memory_space<vmem>>, vector<128x256xbf16>
    %cst = arith.constant dense<0.000000e+00> : vector<512x256xf32>
    %3 = tpu.matmul %1, %2, %cst {dimension_numbers = #tpu.dot_dimension_numbers<[1], [0], [0], [1], [0, 0, 1, 1], [], []>} : vector<512x128xbf16>, vector<128x256xbf16>, vector<512x256xf32> -> vector<512x256xf32>
    %c0_3 = arith.constant 0 : index
    %c0_4 = arith.constant 0 : index
    %4 = vector.load %arg8[%c0_3, %c0_4] : memref<6x256xf32, #tpu.memory_space<vmem>>, vector<1x256xf32>
    %5 = vector.broadcast %4 : vector<1x256xf32> to vector<512x256xf32>
    %6 = arith.addf %3, %5 : vector<512x256xf32>
    %7 = arith.truncf %6 : vector<512x256xf32> to vector<512x256xbf16>
    %cst_5 = arith.constant 0.000000e+00 : bf16
    %8 = vector.broadcast %cst_5 : bf16 to vector<512x256xbf16>
    %9 = arith.maximumf %7, %8 : vector<512x256xbf16>
    %c0_6 = arith.constant 0 : index
    %c0_7 = arith.constant 0 : index
    %10 = vector.load %arg3[%c0_6, %c0_7] : memref<256x128xbf16, #tpu.memory_space<vmem>>, vector<256x128xbf16>
    %cst_8 = arith.constant dense<0.000000e+00> : vector<512x128xf32>
    %11 = tpu.matmul %9, %10, %cst_8 {dimension_numbers = #tpu.dot_dimension_numbers<[1], [0], [0], [1], [0, 0, 1, 1], [], []>} : vector<512x256xbf16>, vector<256x128xbf16>, vector<512x128xf32> -> vector<512x128xf32>
    %c1 = arith.constant 1 : index
    %c0_9 = arith.constant 0 : index
    %12 = vector.load %arg8[%c1, %c0_9] : memref<6x256xf32, #tpu.memory_space<vmem>>, vector<1x128xf32>
    %13 = vector.broadcast %12 : vector<1x128xf32> to vector<512x128xf32>
    %14 = arith.addf %11, %13 : vector<512x128xf32>
    %15 = arith.truncf %14 : vector<512x128xf32> to vector<512x128xbf16>
    %cst_10 = arith.constant 0.000000e+00 : bf16
    %16 = vector.broadcast %cst_10 : bf16 to vector<512x128xbf16>
    %17 = arith.maximumf %15, %16 : vector<512x128xbf16>
    %c0_11 = arith.constant 0 : index
    %c0_12 = arith.constant 0 : index
    %18 = vector.load %arg4[%c0_11, %c0_12] : memref<128x128xbf16, #tpu.memory_space<vmem>>, vector<128x128xbf16>
    %cst_13 = arith.constant dense<0.000000e+00> : vector<512x128xf32>
    %19 = tpu.matmul %17, %18, %cst_13 {dimension_numbers = #tpu.dot_dimension_numbers<[1], [0], [0], [1], [0, 0, 1, 1], [], []>} : vector<512x128xbf16>, vector<128x128xbf16>, vector<512x128xf32> -> vector<512x128xf32>
    %c2 = arith.constant 2 : index
    %c0_14 = arith.constant 0 : index
    %20 = vector.load %arg8[%c2, %c0_14] : memref<6x256xf32, #tpu.memory_space<vmem>>, vector<1x128xf32>
    %21 = vector.broadcast %20 : vector<1x128xf32> to vector<512x128xf32>
    %22 = arith.addf %19, %21 : vector<512x128xf32>
    %23 = arith.truncf %22 : vector<512x128xf32> to vector<512x128xbf16>
    %c0_15 = arith.constant 0 : index
    %c0_16 = arith.constant 0 : index
    %24 = vector.load %arg5[%c0_15, %c0_16] : memref<128x128xbf16, #tpu.memory_space<vmem>>, vector<128x128xbf16>
    %cst_17 = arith.constant dense<0.000000e+00> : vector<512x128xf32>
    %25 = tpu.matmul %23, %24, %cst_17 {dimension_numbers = #tpu.dot_dimension_numbers<[1], [0], [0], [1], [0, 0, 1, 1], [], []>} : vector<512x128xbf16>, vector<128x128xbf16>, vector<512x128xf32> -> vector<512x128xf32>
    %c3 = arith.constant 3 : index
    %c0_18 = arith.constant 0 : index
    %26 = vector.load %arg8[%c3, %c0_18] : memref<6x256xf32, #tpu.memory_space<vmem>>, vector<1x128xf32>
    %27 = vector.broadcast %26 : vector<1x128xf32> to vector<512x128xf32>
    %28 = arith.addf %25, %27 : vector<512x128xf32>
    %29 = arith.truncf %28 : vector<512x128xf32> to vector<512x128xbf16>
    %cst_19 = arith.constant 0.000000e+00 : bf16
    %30 = vector.broadcast %cst_19 : bf16 to vector<512x128xbf16>
    %31 = arith.maximumf %29, %30 : vector<512x128xbf16>
    %c0_20 = arith.constant 0 : index
    %c0_21 = arith.constant 0 : index
    %32 = vector.load %arg6[%c0_20, %c0_21] : memref<128x256xbf16, #tpu.memory_space<vmem>>, vector<128x256xbf16>
    %cst_22 = arith.constant dense<0.000000e+00> : vector<512x256xf32>
    %33 = tpu.matmul %31, %32, %cst_22 {dimension_numbers = #tpu.dot_dimension_numbers<[1], [0], [0], [1], [0, 0, 1, 1], [], []>} : vector<512x128xbf16>, vector<128x256xbf16>, vector<512x256xf32> -> vector<512x256xf32>
    %c4 = arith.constant 4 : index
    %c0_23 = arith.constant 0 : index
    %34 = vector.load %arg8[%c4, %c0_23] : memref<6x256xf32, #tpu.memory_space<vmem>>, vector<1x256xf32>
    %35 = vector.broadcast %34 : vector<1x256xf32> to vector<512x256xf32>
    %36 = arith.addf %33, %35 : vector<512x256xf32>
    %37 = arith.truncf %36 : vector<512x256xf32> to vector<512x256xbf16>
    %cst_24 = arith.constant 0.000000e+00 : bf16
    %38 = vector.broadcast %cst_24 : bf16 to vector<512x256xbf16>
    %39 = arith.maximumf %37, %38 : vector<512x256xbf16>
    %c0_25 = arith.constant 0 : index
    %c0_26 = arith.constant 0 : index
    %40 = vector.load %arg7[%c0_25, %c0_26] : memref<256x128xbf16, #tpu.memory_space<vmem>>, vector<256x128xbf16>
    %cst_27 = arith.constant dense<0.000000e+00> : vector<512x128xf32>
    %41 = tpu.matmul %39, %40, %cst_27 {dimension_numbers = #tpu.dot_dimension_numbers<[1], [0], [0], [1], [0, 0, 1, 1], [], []>} : vector<512x256xbf16>, vector<256x128xbf16>, vector<512x128xf32> -> vector<512x128xf32>
    %c5 = arith.constant 5 : index
    %c0_28 = arith.constant 0 : index
    %42 = vector.load %arg8[%c5, %c0_28] : memref<6x256xf32, #tpu.memory_space<vmem>>, vector<1x128xf32>
    %43 = vector.broadcast %42 : vector<1x128xf32> to vector<512x128xf32>
    %44 = arith.addf %41, %43 : vector<512x128xf32>
    %c0_29 = arith.constant 0 : index
    %c0_30 = arith.constant 0 : index
    %45 = vector.load %arg9[%c0_29, %c0_30] : memref<512x128xf32, #tpu.memory_space<vmem>>, vector<512x128xf32>
    tpu.vector_store %arg9[%c0_29, %c0_30], %44 {strides = array<i32>} : memref<512x128xf32, #tpu.memory_space<vmem>>, vector<512x128xf32>,
    return
  }
  func.func @transform_0(%arg0: i32) -> (i32, i32) {
    %c0_i32 = arith.constant 0 : i32
    %c0_i32_0 = arith.constant 0 : i32
    return %arg0, %c0_i32 : i32, i32
  }
  func.func @transform_1(%arg0: i32) -> (i32, i32) {
    %c0_i32 = arith.constant 0 : i32
    %c0_i32_0 = arith.constant 0 : i32
    %c0_i32_1 = arith.constant 0 : i32
    return %c0_i32, %c0_i32_0 : i32, i32
  }
  func.func @transform_2(%arg0: i32) -> (i32, i32) {
    %c0_i32 = arith.constant 0 : i32
    %c0_i32_0 = arith.constant 0 : i32
    %c0_i32_1 = arith.constant 0 : i32
    return %c0_i32, %c0_i32_0 : i32, i32
  }
  func.func @transform_3(%arg0: i32) -> (i32, i32) {
    %c0_i32 = arith.constant 0 : i32
    %c0_i32_0 = arith.constant 0 : i32
    %c0_i32_1 = arith.constant 0 : i32
    return %c0_i32, %c0_i32_0 : i32, i32
  }
  func.func @transform_4(%arg0: i32) -> (i32, i32) {
    %c0_i32 = arith.constant 0 : i32
    %c0_i32_0 = arith.constant 0 : i32
    %c0_i32_1 = arith.constant 0 : i32
    return %c0_i32, %c0_i32_0 : i32, i32
  }
  func.func @transform_5(%arg0: i32) -> (i32, i32) {
    %c0_i32 = arith.constant 0 : i32
    %c0_i32_0 = arith.constant 0 : i32
    %c0_i32_1 = arith.constant 0 : i32
    return %c0_i32, %c0_i32_0 : i32, i32
  }
  func.func @transform_6(%arg0: i32) -> (i32, i32) {
    %c0_i32 = arith.constant 0 : i32
    %c0_i32_0 = arith.constant 0 : i32
    %c0_i32_1 = arith.constant 0 : i32
    return %c0_i32, %c0_i32_0 : i32, i32
  }
  func.func @transform_7(%arg0: i32) -> (i32, i32) {
    %c0_i32 = arith.constant 0 : i32
    %c0_i32_0 = arith.constant 0 : i32
    %c0_i32_1 = arith.constant 0 : i32
    return %c0_i32, %c0_i32_0 : i32, i32
  }
  func.func @transform_8(%arg0: i32) -> (i32, i32) {
    %c0_i32 = arith.constant 0 : i32
    %c0_i32_0 = arith.constant 0 : i32
    return %arg0, %c0_i32 : i32, i32
  }
}

</mosaic_0001>

<bundles_post_ra>
// kernel: _mmd_vae_forward_jit.1
= control target key start
LH: loop header
LB: loop body
LE: loop exit
PB: predicated region body
PF: predicated region fallthrough
CT: control target
= control target key end

     0   :  { %v3527_v1 = vmov 0   ;;  %s5095_s1 = inlined_call_operand.vmem [shape: bf16[128,256], index: 1, kind: input, shape index: {}]   ;;  %s5096_s0 = inlined_call_operand.vmem [shape: f32[512,128], index: 0, kind: input, shape index: {}]   ;;  %s5097_s2 = inlined_call_operand.vmem [shape: bf16[256,128], index: 2, kind: input, shape index: {}]   ;;  %s5098_s3 = inlined_call_operand.vmem [shape: bf16[128,128], index: 3, kind: input, shape index: {}]   ;;  %s5099_s7 = inlined_call_operand.vmem [shape: f32[6,256], index: 7, kind: input, shape index: {}]   ;;  %s5100_s4 = inlined_call_operand.vmem [shape: bf16[128,128], index: 4, kind: input, shape index: {}]   ;;  %s5101_s5 = inlined_call_operand.vmem [shape: bf16[128,256], index: 5, kind: input, shape index: {}]   ;;  %s5102_s6 = inlined_call_operand.vmem [shape: bf16[256,128], index: 6, kind: input, shape index: {}]   ;;  %s5103_s8 = inlined_call_operand.vmem [shape: f32[512,128], index: 8, kind: output, shape index: {}]  }
   0x1   :  { %v3431_v0 = vld [vmem:[%s5095_s1 + $0x4] ss:$8 sps:$4 sm:$0xff]   ;;  %266 = vmatprep.mubr.bf16.mxu0 %v3527_v1  ;;  %844 = vmatprep.subr.bf16.mxu1 %v3527_v1  ;;  %v3433_v2 = vld [vmem:[%s5095_s1] ss:$8 sps:$4 sm:$0xff]   ;;  %v3434_v3 = vld [vmem:[%s5095_s1 + $0x14] ss:$8 sps:$4 sm:$0xff]  }
   0x2   :  { %234 = vmatprep.subr.bf16.mxu0 %v3431_v0  ;;  %v3436_v4 = vld [vmem:[%s5095_s1 + $0x10] ss:$8 sps:$4 sm:$0xff]   ;;  %v3437_v5 = vld [vmem:[%s5095_s1 + $0x24] ss:$8 sps:$4 sm:$0xff]   ;;  %v3439_v6 = vld [vmem:[%s5095_s1 + $0x20] ss:$8 sps:$4 sm:$0xff]  }
   0x3   :  { %235 = vmatpush1.bf16.msra.mxu0 %v3433_v2  ;;  %v3440_v7 = vld [vmem:[%s5095_s1 + $0x34] ss:$8 sps:$4 sm:$0xff]   ;;  %v3442_v8 = vld [vmem:[%s5095_s1 + $0x30] ss:$8 sps:$4 sm:$0xff]   ;;  %v3443_v9 = vld [vmem:[%s5095_s1 + $0x44] ss:$8 sps:$4 sm:$0xff]  }
   0x4   :  { %236 = vmatprep.subr.bf16.mxu0 %v3434_v3  ;;  %v3445_v10 = vld [vmem:[%s5095_s1 + $0x40] ss:$8 sps:$4 sm:$0xff]   ;;  %v3446_v11 = vld [vmem:[%s5095_s1 + $0x54] ss:$8 sps:$4 sm:$0xff]   ;;  %v3448_v12 = vld [vmem:[%s5095_s1 + $0x50] ss:$8 sps:$4 sm:$0xff]  }
   0x5   :  { %v3449_v13 = vld [vmem:[%s5095_s1 + $0x64] ss:$8 sps:$4 sm:$0xff]   ;;  %v3451_v14 = vld [vmem:[%s5095_s1 + $0x60] ss:$8 sps:$4 sm:$0xff]   ;;  %v3452_v15 = vld [vmem:[%s5095_s1 + $0x74] ss:$8 sps:$4 sm:$0xff]  }
   0x6   :  { %v3454_v16 = vld [vmem:[%s5095_s1 + $0x70] ss:$8 sps:$4 sm:$0xff]   ;;  %v30_v17 = vld [vmem:[%s5096_s0] sm:$0xff]  ;;  %v31_v18 = vld [vmem:[%s5096_s0 + $0x8] sm:$0xff] }
   0x7   :  { %237 = vmatpush1.bf16.msra.mxu0 %v3436_v4  ;;  %v94_v19 = vpack.c.bf16 %v31_v18, %v30_v17  ;;  %v32_v20 = vld [vmem:[%s5096_s0 + $0x10] sm:$0xff]  ;;  %v33_v21 = vld [vmem:[%s5096_s0 + $0x18] sm:$0xff]  ;;  %v34_v23 = vld [vmem:[%s5096_s0 + $0x20] sm:$0xff] }
   0x8   :  { %238 = vmatprep.subr.bf16.mxu0 %v3437_v5  ;;  %v95_v22 = vpack.c.bf16 %v33_v21, %v32_v20  ;;  %v35_v24 = vld [vmem:[%s5096_s0 + $0x28] sm:$0xff]  ;;  %v36_v26 = vld [vmem:[%s5096_s0 + $0x30] sm:$0xff]  ;;  %v37_v27 = vld [vmem:[%s5096_s0 + $0x38] sm:$0xff] }
   0x9   :  { %v96_v25 = vpack.c.bf16 %v35_v24, %v34_v23  ;;  %v97_v28 = vpack.c.bf16 %v37_v27, %v36_v26  ;;  %v38_v29 = vld [vmem:[%s5096_s0 + $0x40] sm:$0xff]  ;;  %v39_v30 = vld [vmem:[%s5096_s0 + $0x48] sm:$0xff]  ;;  %v40_v34 = vld [vmem:[%s5096_s0 + $0x50] sm:$0xff] }
   0xa   :  { %v3455_v31 = vld [vmem:[%s5097_s2] sm:$0xff]   ;;  %v98_v32 = vpack.c.bf16 %v39_v30, %v38_v29  ;;  %v3456_v33 = vld [vmem:[%s5097_s2 + $0x8] sm:$0xff]   ;;  %v41_v35 = vld [vmem:[%s5096_s0 + $0x58] sm:$0xff] }
   0xb   :  { %239 = vmatpush1.bf16.msra.mxu0 %v3439_v6  ;;  %845 = vmatpush1.bf16.msra.mxu1 %v3455_v31  ;;  %v3457_v36 = vld [vmem:[%s5097_s2 + $0x10] sm:$0xff]   ;;  %v99_v37 = vpack.c.bf16 %v41_v35, %v40_v34  ;;  %v3458_v38 = vld [vmem:[%s5097_s2 + $0x18] sm:$0xff]   ;;  %v42_v39 = vld [vmem:[%s5096_s0 + $0x60] sm:$0xff] }
   0xc   :  { %240 = vmatprep.subr.bf16.mxu0 %v3440_v7  ;;  %846 = vmatprep.subr.bf16.mxu1 %v3527_v1  ;;  %v43_v40 = vld [vmem:[%s5096_s0 + $0x68] sm:$0xff]  ;;  %v3459_v41 = vld [vmem:[%s5097_s2 + $0x20] sm:$0xff]   ;;  %v44_v44 = vld [vmem:[%s5096_s0 + $0x70] sm:$0xff] }
   0xd   :  { %v100_v42 = vpack.c.bf16 %v43_v40, %v42_v39  ;;  %v3460_v43 = vld [vmem:[%s5097_s2 + $0x28] sm:$0xff]   ;;  %v45_v45 = vld [vmem:[%s5096_s0 + $0x78] sm:$0xff]  ;;  %v3461_v46 = vld [vmem:[%s5097_s2 + $0x30] sm:$0xff]  }
   0xe   :  { %v101_v47 = vpack.c.bf16 %v45_v45, %v44_v44  ;;  %v3462_v48 = vld [vmem:[%s5097_s2 + $0x38] sm:$0xff]   ;;  %v46_v49 = vld [vmem:[%s5096_s0 + $0x80] sm:$0xff]  ;;  %v47_v50 = vld [vmem:[%s5096_s0 + $0x88] sm:$0xff] }
   0xf   :  { %241 = vmatpush1.bf16.msra.mxu0 %v3442_v8  ;;  %847 = vmatpush1.bf16.msra.mxu1 %v3456_v33  ;;  %v3463_v51 = vld [vmem:[%s5097_s2 + $0x40] sm:$0xff]   ;;  %v102_v52 = vpack.c.bf16 %v47_v50, %v46_v49  ;;  %v48_v53 = vld [vmem:[%s5096_s0 + $0x90] sm:$0xff]  ;;  %v49_v54 = vld [vmem:[%s5096_s0 + $0x98] sm:$0xff] }
  0x10   :  { %242 = vmatprep.subr.bf16.mxu0 %v3443_v9  ;;  %848 = vmatprep.subr.bf16.mxu1 %v3527_v1  ;;  %v3465_v55 = vld [vmem:[%s5097_s2 + $0x48] sm:$0xff]   ;;  %v3464_v56 = vld [vmem:[%s5098_s3] sm:$0xff]   ;;  %v3466_v57 = vld [vmem:[%s5097_s2 + $0x50] sm:$0xff]   ;;  %v103_v58 = vpack.c.bf16 %v49_v54, %v48_v53  ;;  %v144_v53 = vlaneseq }
  0x11   :  { %v3467_v59 = vld [vmem:[%s5097_s2 + $0x58] sm:$0xff]   ;;  %v50_v60 = vld [vmem:[%s5096_s0 + $0xa0] sm:$0xff]  ;;  %v51_v61 = vld [vmem:[%s5096_s0 + $0xa8] sm:$0xff] }
  0x12   :  { %v3468_v62 = vld [vmem:[%s5097_s2 + $0x60] sm:$0xff]   ;;  %v104_v63 = vpack.c.bf16 %v51_v61, %v50_v60  ;;  %v52_v0 = vld [vmem:[%s5096_s0 + $0xb0] sm:$0xff]  ;;  %v53_v2 = vld [vmem:[%s5096_s0 + $0xb8] sm:$0xff] }
  0x13   :  { %243 = vmatpush1.bf16.msra.mxu0 %v3445_v10  ;;  %849 = vmatpush1.bf16.msra.mxu1 %v3457_v36  ;;  %v3469_v3 = vld [vmem:[%s5097_s2 + $0x68] sm:$0xff]   ;;  %v105_v4 = vpack.c.bf16 %v53_v2, %v52_v0  ;;  %v3470_v5 = vld [vmem:[%s5097_s2 + $0x70] sm:$0xff]   ;;  %v54_v6 = vld [vmem:[%s5096_s0 + $0xc0] sm:$0xff] }
  0x14   :  { %244 = vmatprep.subr.bf16.mxu0 %v3446_v11  ;;  %850 = vmatprep.subr.bf16.mxu1 %v3527_v1  ;;  %v55_v7 = vld [vmem:[%s5096_s0 + $0xc8] sm:$0xff]  ;;  %v3471_v8 = vld [vmem:[%s5097_s2 + $0x78] sm:$0xff]   ;;  %v56_v10 = vld [vmem:[%s5096_s0 + $0xd0] sm:$0xff] }
  0x15   :  { %v106_v9 = vpack.c.bf16 %v55_v7, %v54_v6  ;;  %v57_v11 = vld [vmem:[%s5096_s0 + $0xd8] sm:$0xff]  ;;  %v60_v17 = vld [vmem:[%s5096_s0 + $0xf0] sm:$0xff]  ;;  %v62_v20 = vld [vmem:[%s5096_s0 + $0x100] sm:$0xff] }
  0x16   :  { %v61_v18 = vld [vmem:[%s5096_s0 + $0xf8] sm:$0xff]  ;;  %v63_v21 = vld [vmem:[%s5096_s0 + $0x108] sm:$0xff]  ;;  %v64_v23 = vld [vmem:[%s5096_s0 + $0x110] sm:$0xff] }
  0x17   :  { %245 = vmatpush1.bf16.msra.mxu0 %v3448_v12  ;;  %851 = vmatpush1.bf16.msra.mxu1 %v3458_v38  ;;  %v3472_v12 = vld [vmem:[%s5098_s3 + $0x8] sm:$0xff]   ;;  %v65_v24 = vld [vmem:[%s5096_s0 + $0x118] sm:$0xff]  ;;  %v66_v27 = vld [vmem:[%s5096_s0 + $0x120] sm:$0xff] }
  0x18   :  { %246 = vmatprep.subr.bf16.mxu0 %v3449_v13  ;;  %852 = vmatprep.subr.bf16.mxu1 %v3527_v1  ;;  %v107_v13 = vpack.c.bf16 %v57_v11, %v56_v10  ;;  %v111_v26 = vpack.c.bf16 %v65_v24, %v64_v23  ;;  %v68_v30 = vld [vmem:[%s5096_s0 + $0x130] sm:$0xff]  ;;  %v69_v31 = vld [vmem:[%s5096_s0 + $0x138] sm:$0xff]  ;;  %v70_v33 = vld [vmem:[%s5096_s0 + $0x140] sm:$0xff] }
  0x19   :  { %v71_v34 = vld [vmem:[%s5096_s0 + $0x148] sm:$0xff]  ;;  %v72_v36 = vld [vmem:[%s5096_s0 + $0x150] sm:$0xff]  ;;  %v3474_v38 = vld [vmem:[%s5098_s3 + $0x18] sm:$0xff]  }
  0x1a   :  { %v114_v35 = vpack.c.bf16 %v71_v34, %v70_v33  ;;  %v74_v40 = vld [vmem:[%s5096_s0 + $0x160] sm:$0xff]  ;;  %v77_v44 = vld [vmem:[%s5096_s0 + $0x178] sm:$0xff]  ;;  %v80_v49 = vld [vmem:[%s5096_s0 + $0x190] sm:$0xff] }
  0x1b   :  { %247 = vmatpush1.bf16.msra.mxu0 %v3451_v14  ;;  %853 = vmatpush1.bf16.msra.mxu1 %v3459_v41  ;;  %v58_v14 = vld [vmem:[%s5096_s0 + $0xe0] sm:$0xff]  ;;  %v75_v41 = vld [vmem:[%s5096_s0 + $0x168] sm:$0xff]  ;;  %v81_v50 = vld [vmem:[%s5096_s0 + $0x198] sm:$0xff] }
  0x1c   :  { %248 = vmatprep.subr.bf16.mxu0 %v3452_v15  ;;  %854 = vmatprep.subr.bf16.mxu1 %v3527_v1  ;;  %v59_v15 = vld [vmem:[%s5096_s0 + $0xe8] sm:$0xff]  ;;  %v82_v54 = vld [vmem:[%s5096_s0 + $0x1a0] sm:$0xff]  ;;  %v84_v61 = vld [vmem:[%s5096_s0 + $0x1b0] sm:$0xff] }
  0x1f   :  { %249 = vmatpush1.bf16.msra.mxu0 %v3454_v16  ;;  %855 = vmatpush1.bf16.msra.mxu1 %v3460_v43  ;;  %v108_v16 = vpack.c.bf16 %v59_v15, %v58_v14  ;;  %v76_v43 = vld [vmem:[%s5096_s0 + $0x170] sm:$0xff]  ;;  %v87_v14 = vld [vmem:[%s5096_s0 + $0x1c8] sm:$0xff] }
  0x20   :  { %856 = vmatprep.subr.bf16.mxu1 %v3527_v1  ;;  %3238 = vmatprep.subr.bf16.mxu0 %v3464_v56  ;;  %v117_v45 = vpack.c.bf16 %v77_v44, %v76_v43  ;;  %v90_v44 = vld [vmem:[%s5096_s0 + $0x1e0] sm:$0xff] }
  0x22   :  { %267 = vmatmul.mubr.bf16.vlgmr.msra.gmra.mrb[0].mxu0 %v94_v19  ;;  %v109_v19 = vpack.c.bf16 %v61_v18, %v60_v17 }
  0x23   :  { %276 = vmatprep.mubr.bf16.mxu0 %v3527_v1  ;;  %857 = vmatpush1.bf16.msra.mxu1 %v3461_v46  ;;  %v78_v46 = vld [vmem:[%s5096_s0 + $0x180] sm:$0xff] }
  0x24   :  { %858 = vmatprep.subr.bf16.mxu1 %v3527_v1  ;;  %3239 = vmatpush3.bf16.msra.mxu0 %v3464_v56  ;;  %v3889_v56 = vshrl.u32 %v144_v53, 7 }
  0x25   :  { %3240 = vmatprep.subr.bf16.mxu0 %v3472_v12 }
  0x26   :  { %v150_v60 = vsub.s32 1, %v3889_v56 }
  0x27   :  { %859 = vmatpush1.bf16.msra.mxu1 %v3462_v48 }
  0x28   :  { %860 = vmatprep.subr.bf16.mxu1 %v3527_v1  ;;  %3241 = vmatpush3.bf16.msra.mxu0 %v3472_v12 }
  0x2a   :  { %277 = vmatmul.mubr.bf16.gmra.mrb[4].mxu0 %v95_v22  ;;  %v110_v22 = vpack.c.bf16 %v63_v21, %v62_v20 }
  0x2b   :  { %286 = vmatprep.mubr.bf16.mxu0 %v3527_v1  ;;  %861 = vmatpush1.bf16.msra.mxu1 %v3463_v51  ;;  %v3475_v51 = vld [vmem:[%s5098_s3 + $0x20] sm:$0xff]  }
  0x2c   :  { %862 = vmatprep.subr.bf16.mxu1 %v3527_v1 }
  0x2f   :  { %863 = vmatpush1.bf16.msra.mxu1 %v3465_v55  ;;  %v83_v55 = vld [vmem:[%s5096_s0 + $0x1a8] sm:$0xff] }
  0x30   :  { %864 = vmatprep.subr.bf16.mxu1 %v3527_v1 }
  0x32   :  { %287 = vmatmul.mubr.bf16.gmra.mrb[8].mxu0 %v96_v25  ;;  %v3473_v25 = vld [vmem:[%s5098_s3 + $0x10] sm:$0xff]  }
  0x33   :  { %296 = vmatprep.mubr.bf16.mxu0 %v3527_v1  ;;  %865 = vmatpush1.bf16.msra.mxu1 %v3466_v57  ;;  %v120_v57 = vpack.c.bf16 %v83_v55, %v82_v54 }
  0x34   :  { %866 = vmatprep.subr.bf16.mxu1 %v3527_v1  ;;  %3242 = vmatprep.subr.bf16.mxu0 %v3473_v25 }
  0x35   :  { %3243 = vmatpush3.bf16.msra.mxu0 %v3473_v25 }
  0x36   :  { %3244 = vmatprep.subr.bf16.mxu0 %v3474_v38 }
  0x37   :  { %867 = vmatpush1.bf16.msra.mxu1 %v3467_v59  ;;  %v142_v59 = vld [vmem:[%s5099_s7] ss:$8 sm:$0x3] }
  0x38   :  { %868 = vmatprep.subr.bf16.mxu1 %v3527_v1  ;;  %v3909_v2 = vrot.slane %v142_v59, %v150_v60 }
  0x39   :  { %3245 = vmatpush3.bf16.msra.mxu0 %v3474_v38 }
  0x3a   :  { %297 = vmatmul.mubr.bf16.gmra.mrb[12].mxu0 %v97_v28  ;;  %v67_v28 = vld [vmem:[%s5096_s0 + $0x128] sm:$0xff]  ;;  %3246 = vmatprep.subr.bf16.mxu0 %v3475_v51 }
  0x3b   :  { %306 = vmatprep.mubr.bf16.mxu0 %v3527_v1  ;;  %869 = vmatpush1.bf16.msra.mxu1 %v3468_v62  ;;  %v112_v29 = vpack.c.bf16 %v67_v28, %v66_v27  ;;  %v85_v62 = vld [vmem:[%s5096_s0 + $0x1b8] sm:$0xff]  ;;  %v88_v28 = vld [vmem:[%s5096_s0 + $0x1d0] sm:$0xff] }
  0x3c   :  { %870 = vmatprep.subr.bf16.mxu1 %v3527_v1 }
  0x3d   :  { %3247 = vmatpush3.bf16.msra.mxu0 %v3475_v51 }
  0x3f   :  { %871 = vmatpush1.bf16.msra.mxu1 %v3469_v3 }
  0x40   :  { %872 = vmatprep.subr.bf16.mxu1 %v3527_v1 }
  0x42   :  { %307 = vmatmul.mubr.bf16.gmra.mrb[16].mxu0 %v98_v32  ;;  %v113_v32 = vpack.c.bf16 %v69_v31, %v68_v30  ;;  %v3476_v30 = vld [vmem:[%s5098_s3 + $0x28] sm:$0xff]  }
  0x43   :  { %316 = vmatprep.mubr.bf16.mxu0 %v3527_v1  ;;  %873 = vmatpush1.bf16.msra.mxu1 %v3470_v5 }
  0x44   :  { %874 = vmatprep.subr.bf16.mxu1 %v3527_v1  ;;  %3248 = vmatprep.subr.bf16.mxu0 %v3476_v30 }
  0x45   :  { %3249 = vmatpush3.bf16.msra.mxu0 %v3476_v30 }
  0x47   :  { %875 = vmatpush1.bf16.msra.mxu1 %v3471_v8 }
  0x4a   :  { %317 = vmatmul.mubr.bf16.gmra.mrb[20].mxu0 %v99_v37  ;;  %v73_v37 = vld [vmem:[%s5096_s0 + $0x158] sm:$0xff] }
  0x4b   :  { %326 = vmatprep.mubr.bf16.mxu0 %v3527_v1  ;;  %v115_v39 = vpack.c.bf16 %v73_v37, %v72_v36 }
  0x52   :  { %327 = vmatmul.mubr.bf16.gmra.mrb[24].mxu0 %v100_v42  ;;  %v116_v42 = vpack.c.bf16 %v75_v41, %v74_v40 }
  0x53   :  { %336 = vmatprep.mubr.bf16.mxu0 %v3527_v1 }
  0x5a   :  { %337 = vmatmul.mubr.bf16.gmra.mrb[28].mxu0 %v101_v47  ;;  %v79_v47 = vld [vmem:[%s5096_s0 + $0x188] sm:$0xff] }
  0x5b   :  { %346 = vmatprep.mubr.bf16.mxu0 %v3527_v1  ;;  %v118_v48 = vpack.c.bf16 %v79_v47, %v78_v46 }
  0x62   :  { %347 = vmatmul.mubr.bf16.gmra.mrb[32].mxu0 %v102_v52  ;;  %v119_v52 = vpack.c.bf16 %v81_v50, %v80_v49 }
  0x63   :  { %356 = vmatprep.mubr.bf16.mxu0 %v3527_v1 }
  0x6a   :  { %357 = vmatmul.mubr.bf16.gmra.mrb[36].mxu0 %v103_v58  ;;  %v146_v58 = vsub.s32 0, %v3889_v56 }
  0x6b   :  { %366 = vmatprep.mubr.bf16.mxu0 %v3527_v1 }
  0x72   :  { %367 = vmatmul.mubr.bf16.gmra.mrb[40].mxu0 %v104_v63  ;;  %v3905_v63 = vrot.slane %v142_v59, %v146_v58 }
  0x73   :  { %376 = vmatprep.mubr.bf16.mxu0 %v3527_v1 }
  0x7a   :  { %377 = vmatmul.mubr.bf16.gmra.mrb[44].mxu0 %v105_v4  ;;  %v121_v4 = vpack.c.bf16 %v85_v62, %v84_v61  ;;  %v92_v62 = vld [vmem:[%s5096_s0 + $0x1f0] sm:$0xff] }
  0x7b   :  { %386 = vmatprep.mubr.bf16.mxu0 %v3527_v1 }
  0x82   :  { %387 = vmatmul.mubr.bf16.gmra.mrb[48].mxu0 %v106_v9 }
  0x83   :  { %396 = vmatprep.mubr.bf16.mxu0 %v3527_v1 }
  0x8a   :  { %397 = vmatmul.mubr.bf16.gmra.mrb[52].mxu0 %v107_v13  ;;  %v86_v13 = vld [vmem:[%s5096_s0 + $0x1c0] sm:$0xff] }
  0x8b   :  { %406 = vmatprep.mubr.bf16.mxu0 %v3527_v1 }
  0x92   :  { %407 = vmatmul.mubr.bf16.gmra.mrb[56].mxu0 %v108_v16 }
  0x93   :  { %416 = vmatprep.mubr.bf16.mxu0 %v3527_v1 }
  0x9a   :  { %417 = vmatmul.mubr.bf16.gmra.mrb[60].mxu0 %v109_v19  ;;  %v122_v19 = vpack.c.bf16 %v87_v14, %v86_v13 }
  0x9b   :  { %426 = vmatprep.mubr.bf16.mxu0 %v3527_v1 }
  0xa2   :  { %427 = vmatmul.mubr.bf16.gmra.mrb[64].mxu0 %v110_v22 }
  0xa3   :  { %436 = vmatprep.mubr.bf16.mxu0 %v3527_v1 }
  0xaa   :  { %437 = vmatmul.mubr.bf16.gmra.mrb[68].mxu0 %v111_v26 }
  0xab   :  { %446 = vmatprep.mubr.bf16.mxu0 %v3527_v1 }
  0xb2   :  { %447 = vmatmul.mubr.bf16.gmra.mrb[72].mxu0 %v112_v29  ;;  %v89_v29 = vld [vmem:[%s5096_s0 + $0x1d8] sm:$0xff] }
  0xb3   :  { %456 = vmatprep.mubr.bf16.mxu0 %v3527_v1 }
  0xba   :  { %457 = vmatmul.mubr.bf16.gmra.mrb[76].mxu0 %v113_v32 }
  0xbb   :  { %466 = vmatprep.mubr.bf16.mxu0 %v3527_v1 }
  0xc2   :  { %467 = vmatmul.mubr.bf16.gmra.mrb[80].mxu0 %v114_v35  ;;  %v123_v35 = vpack.c.bf16 %v89_v29, %v88_v28  ;;  %v3477_v28 = vld [vmem:[%s5098_s3 + $0x30] sm:$0xff]  }
  0xc3   :  { %476 = vmatprep.mubr.bf16.mxu0 %v3527_v1  ;;  %3250 = vmatprep.subr.bf16.mxu0 %v3477_v28 }
  0xc4   :  { %3251 = vmatpush3.bf16.msra.mxu0 %v3477_v28 }
  0xca   :  { %477 = vmatmul.mubr.bf16.gmra.mrb[84].mxu0 %v115_v39 }
  0xcb   :  { %486 = vmatprep.mubr.bf16.mxu0 %v3527_v1 }
  0xd2   :  { %487 = vmatmul.mubr.bf16.gmra.mrb[88].mxu0 %v116_v42 }
  0xd3   :  { %496 = vmatprep.mubr.bf16.mxu0 %v3527_v1 }
  0xda   :  { %497 = vmatmul.mubr.bf16.gmra.mrb[92].mxu0 %v117_v45  ;;  %v91_v45 = vld [vmem:[%s5096_s0 + $0x1e8] sm:$0xff] }
  0xdb   :  { %506 = vmatprep.mubr.bf16.mxu0 %v3527_v1  ;;  %v124_v50 = vpack.c.bf16 %v91_v45, %v90_v44 }
  0xe2   :  { %507 = vmatmul.mubr.bf16.gmra.mrb[96].mxu0 %v118_v48 }
  0xe3   :  { %516 = vmatprep.mubr.bf16.mxu0 %v3527_v1 }
  0xea   :  { %517 = vmatmul.mubr.bf16.gmra.mrb[100].mxu0 %v119_v52 }
  0xeb   :  { %526 = vmatprep.mubr.bf16.mxu0 %v3527_v1 }
  0xf2   :  { %527 = vmatmul.mubr.bf16.gmra.mrb[104].mxu0 %v120_v57 }
  0xf3   :  { %536 = vmatprep.mubr.bf16.mxu0 %v3527_v1 }
  0xf5   :  { %v268_v0 = vpop.f32.mrb[0].mxu0 }
  0xf6   :  { %v270_v3 = vpop.f32.mrb[1].mxu0  ;;  %v269_v6 = vadd.f32 %v268_v0, %v3905_v63  ;;  %v93_v0 = vld [vmem:[%s5096_s0 + $0x1f8] sm:$0xff] }
  0xf7   :  { %v272_v5 = vpop.f32.mrb[2].mxu0  ;;  %v271_v9 = vadd.f32 %v270_v3, %v3909_v2 }
  0xf8   :  { %v273_v7 = vadd.f32 %v272_v5, %v3905_v63  ;;  %v274_v8 = vpop.f32.mrb[3].mxu0 }
  0xf9   :  { %v275_v10 = vadd.f32 %v274_v8, %v3909_v2 }
  0xfa   :  { %v587_v11 = vpack.c.bf16 %v273_v7, %v269_v6  ;;  %537 = vmatmul.mubr.bf16.gmra.mrb[108].mxu0 %v121_v4  ;;  %v125_v7 = vpack.c.bf16 %v93_v0, %v92_v62 }
  0xfb   :  { %v588_v12 = vpack.c.bf16 %v275_v10, %v271_v9  ;;  %546 = vmatprep.mubr.bf16.mxu0 %v3527_v1 }
  0xfc   :  { %v651_v18 = vmax.bf16 %v3527_v1, %v587_v11 }
  0xfd   :  { %v278_v15 = vpop.f32.mrb[4].mxu0  ;;  %v652_v16 = vmax.bf16 %v3527_v1, %v588_v12 }
  0xfe   :  { %v280_v17 = vpop.f32.mrb[5].mxu0  ;;  %v279_v21 = vadd.f32 %v278_v15, %v3905_v63 }
  0xff   :  { %v282_v20 = vpop.f32.mrb[6].mxu0  ;;  %876 = vmatprep.mubr.bf16.mxu1 %v652_v16  ;;  %v281_v24 = vadd.f32 %v280_v17, %v3909_v2 }
 0x100   :  { %v283_v22 = vadd.f32 %v282_v20, %v3905_v63  ;;  %v284_v23 = vpop.f32.mrb[7].mxu0  ;;  %877 = vmatmul.mubr.bf16.vlgmr.msra.gmra.mrb[0].mxu1 %v651_v18 }
 0x101   :  { %v285_v25 = vadd.f32 %v284_v23, %v3909_v2 }
 0x102   :  { %v589_v26 = vpack.c.bf16 %v283_v22, %v279_v21  ;;  %547 = vmatmul.mubr.bf16.gmra.mrb[112].mxu0 %v122_v19 }
 0x103   :  { %v590_v27 = vpack.c.bf16 %v285_v25, %v281_v24  ;;  %556 = vmatprep.mubr.bf16.mxu0 %v3527_v1 }
 0x104   :  { %v653_v34 = vmax.bf16 %v3527_v1, %v589_v26 }
 0x105   :  { %v288_v31 = vpop.f32.mrb[8].mxu0  ;;  %v654_v32 = vmax.bf16 %v3527_v1, %v590_v27 }
 0x106   :  { %v290_v33 = vpop.f32.mrb[9].mxu0  ;;  %v289_v37 = vadd.f32 %v288_v31, %v3905_v63 }
 0x107   :  { %v292_v36 = vpop.f32.mrb[10].mxu0  ;;  %884 = vmatprep.mubr.bf16.mxu1 %v654_v32  ;;  %v291_v40 = vadd.f32 %v290_v33, %v3909_v2 }
 0x108   :  { %v293_v38 = vadd.f32 %v292_v36, %v3905_v63  ;;  %v294_v39 = vpop.f32.mrb[11].mxu0  ;;  %885 = vmatmul.mubr.bf16.gmra.mrb[4].mxu1 %v653_v34 }
 0x109   :  { %v295_v41 = vadd.f32 %v294_v39, %v3909_v2 }
 0x10a   :  { %v591_v42 = vpack.c.bf16 %v293_v38, %v289_v37  ;;  %557 = vmatmul.mubr.bf16.gmra.mrb[116].mxu0 %v123_v35 }
 0x10b   :  { %v592_v43 = vpack.c.bf16 %v295_v41, %v291_v40  ;;  %566 = vmatprep.mubr.bf16.mxu0 %v3527_v1 }
 0x10c   :  { %v655_v49 = vmax.bf16 %v3527_v1, %v591_v42 }
 0x10d   :  { %v298_v46 = vpop.f32.mrb[12].mxu0  ;;  %v656_v47 = vmax.bf16 %v3527_v1, %v592_v43 }
 0x10e   :  { %v300_v48 = vpop.f32.mrb[13].mxu0  ;;  %v299_v52 = vadd.f32 %v298_v46, %v3905_v63 }
 0x10f   :  { %v302_v51 = vpop.f32.mrb[14].mxu0  ;;  %892 = vmatprep.mubr.bf16.mxu1 %v656_v47  ;;  %v301_v55 = vadd.f32 %v300_v48, %v3909_v2 }
 0x110   :  { %v303_v53 = vadd.f32 %v302_v51, %v3905_v63  ;;  %v304_v54 = vpop.f32.mrb[15].mxu0  ;;  %893 = vmatmul.mubr.bf16.gmra.mrb[8].mxu1 %v655_v49 }
 0x111   :  { %v305_v57 = vadd.f32 %v304_v54, %v3909_v2 }
 0x112   :  { %v593_v59 = vpack.c.bf16 %v303_v53, %v299_v52  ;;  %567 = vmatmul.mubr.bf16.gmra.mrb[120].mxu0 %v124_v50 }
 0x113   :  { %v594_v61 = vpack.c.bf16 %v305_v57, %v301_v55  ;;  %576 = vmatprep.mubr.bf16.mxu0 %v3527_v1 }
 0x114   :  { %v657_v6 = vmax.bf16 %v3527_v1, %v593_v59 }
 0x115   :  { %v308_v3 = vpop.f32.mrb[16].mxu0  ;;  %v658_v4 = vmax.bf16 %v3527_v1, %v594_v61 }
 0x116   :  { %v310_v5 = vpop.f32.mrb[17].mxu0  ;;  %v309_v9 = vadd.f32 %v308_v3, %v3905_v63 }
 0x117   :  { %v312_v8 = vpop.f32.mrb[18].mxu0  ;;  %900 = vmatprep.mubr.bf16.mxu1 %v658_v4  ;;  %v311_v12 = vadd.f32 %v310_v5, %v3909_v2 }
 0x118   :  { %v313_v10 = vadd.f32 %v312_v8, %v3905_v63  ;;  %v314_v11 = vpop.f32.mrb[19].mxu0  ;;  %901 = vmatmul.mubr.bf16.gmra.mrb[12].mxu1 %v657_v6 }
 0x119   :  { %v315_v13 = vadd.f32 %v314_v11, %v3909_v2 }
 0x11a   :  { %v595_v14 = vpack.c.bf16 %v313_v10, %v309_v9  ;;  %577 = vmatmul.mubr.bf16.gmra.mrb[124].mxu0 %v125_v7 }
 0x11b   :  { %v596_v15 = vpack.c.bf16 %v315_v13, %v311_v12 }
 0x11c   :  { %v659_v19 = vmax.bf16 %v3527_v1, %v595_v14 }
 0x11d   :  { %v318_v16 = vpop.f32.mrb[20].mxu0  ;;  %v660_v17 = vmax.bf16 %v3527_v1, %v596_v15 }
 0x11e   :  { %v320_v18 = vpop.f32.mrb[21].mxu0  ;;  %v319_v21 = vadd.f32 %v318_v16, %v3905_v63 }
 0x11f   :  { %v322_v20 = vpop.f32.mrb[22].mxu0  ;;  %908 = vmatprep.mubr.bf16.mxu1 %v660_v17  ;;  %v321_v24 = vadd.f32 %v320_v18, %v3909_v2 }
 0x120   :  { %v323_v22 = vadd.f32 %v322_v20, %v3905_v63  ;;  %v324_v23 = vpop.f32.mrb[23].mxu0  ;;  %909 = vmatmul.mubr.bf16.gmra.mrb[16].mxu1 %v659_v19  ;;  %v3478_v19 = vld [vmem:[%s5100_s4] sm:$0xff]   ;;  %v3479_v20 = vld [vmem:[%s5098_s3 + $0x38] sm:$0xff]  }
 0x121   :  { %v325_v25 = vadd.f32 %v324_v23, %v3909_v2  ;;  %3318 = vmatprep.subr.bf16.mxu1 %v3478_v19  ;;  %3252 = vmatprep.subr.bf16.mxu0 %v3479_v20 }
 0x122   :  { %v597_v26 = vpack.c.bf16 %v323_v22, %v319_v21  ;;  %3319 = vmatpush3.bf16.msra.mxu1 %v3478_v19  ;;  %3253 = vmatpush3.bf16.msra.mxu0 %v3479_v20 }
 0x123   :  { %v598_v27 = vpack.c.bf16 %v325_v25, %v321_v24 }
 0x124   :  { %v661_v32 = vmax.bf16 %v3527_v1, %v597_v26 }
 0x125   :  { %v328_v29 = vpop.f32.mrb[24].mxu0  ;;  %v662_v30 = vmax.bf16 %v3527_v1, %v598_v27 }
 0x126   :  { %v330_v31 = vpop.f32.mrb[25].mxu0  ;;  %v329_v34 = vadd.f32 %v328_v29, %v3905_v63 }
 0x127   :  { %v332_v33 = vpop.f32.mrb[26].mxu0  ;;  %916 = vmatprep.mubr.bf16.mxu1 %v662_v30  ;;  %v331_v37 = vadd.f32 %v330_v31, %v3909_v2 }
 0x128   :  { %v333_v35 = vadd.f32 %v332_v33, %v3905_v63  ;;  %v334_v36 = vpop.f32.mrb[27].mxu0  ;;  %917 = vmatmul.mubr.bf16.gmra.mrb[20].mxu1 %v661_v32 }
 0x129   :  { %v335_v38 = vadd.f32 %v334_v36, %v3909_v2 }
 0x12a   :  { %v599_v39 = vpack.c.bf16 %v333_v35, %v329_v34 }
 0x12b   :  { %v600_v40 = vpack.c.bf16 %v335_v38, %v331_v37 }
 0x12c   :  { %v663_v44 = vmax.bf16 %v3527_v1, %v599_v39 }
 0x12d   :  { %v338_v41 = vpop.f32.mrb[28].mxu0  ;;  %v664_v42 = vmax.bf16 %v3527_v1, %v600_v40 }
 0x12e   :  { %v340_v43 = vpop.f32.mrb[29].mxu0  ;;  %v339_v46 = vadd.f32 %v338_v41, %v3905_v63 }
 0x12f   :  { %v342_v45 = vpop.f32.mrb[30].mxu0  ;;  %924 = vmatprep.mubr.bf16.mxu1 %v664_v42  ;;  %v341_v49 = vadd.f32 %v340_v43, %v3909_v2 }
 0x130   :  { %v343_v47 = vadd.f32 %v342_v45, %v3905_v63  ;;  %v344_v48 = vpop.f32.mrb[31].mxu0  ;;  %925 = vmatmul.mubr.bf16.gmra.mrb[24].mxu1 %v663_v44 }
 0x131   :  { %v345_v50 = vadd.f32 %v344_v48, %v3909_v2 }
 0x132   :  { %v601_v51 = vpack.c.bf16 %v343_v47, %v339_v46 }
 0x133   :  { %v602_v52 = vpack.c.bf16 %v345_v50, %v341_v49 }
 0x134   :  { %v665_v57 = vmax.bf16 %v3527_v1, %v601_v51 }
 0x135   :  { %v348_v53 = vpop.f32.mrb[32].mxu0  ;;  %v666_v54 = vmax.bf16 %v3527_v1, %v602_v52 }
 0x136   :  { %v350_v55 = vpop.f32.mrb[33].mxu0  ;;  %v349_v61 = vadd.f32 %v348_v53, %v3905_v63 }
 0x137   :  { %v352_v59 = vpop.f32.mrb[34].mxu0  ;;  %932 = vmatprep.mubr.bf16.mxu1 %v666_v54  ;;  %v351_v3 = vadd.f32 %v350_v55, %v3909_v2 }
 0x138   :  { %v353_v62 = vadd.f32 %v352_v59, %v3905_v63  ;;  %v354_v0 = vpop.f32.mrb[35].mxu0  ;;  %933 = vmatmul.mubr.bf16.gmra.mrb[28].mxu1 %v665_v57 }
 0x139   :  { %v355_v4 = vadd.f32 %v354_v0, %v3909_v2 }
 0x13a   :  { %v603_v5 = vpack.c.bf16 %v353_v62, %v349_v61 }
 0x13b   :  { %v604_v6 = vpack.c.bf16 %v355_v4, %v351_v3 }
 0x13c   :  { %v667_v10 = vmax.bf16 %v3527_v1, %v603_v5 }
 0x13d   :  { %v358_v7 = vpop.f32.mrb[36].mxu0  ;;  %v668_v8 = vmax.bf16 %v3527_v1, %v604_v6 }
 0x13e   :  { %v360_v9 = vpop.f32.mrb[37].mxu0  ;;  %v359_v12 = vadd.f32 %v358_v7, %v3905_v63 }
 0x13f   :  { %v362_v11 = vpop.f32.mrb[38].mxu0  ;;  %940 = vmatprep.mubr.bf16.mxu1 %v668_v8  ;;  %v361_v15 = vadd.f32 %v360_v9, %v3909_v2 }
 0x140   :  { %v363_v13 = vadd.f32 %v362_v11, %v3905_v63  ;;  %v364_v14 = vpop.f32.mrb[39].mxu0  ;;  %941 = vmatmul.mubr.bf16.gmra.mrb[32].mxu1 %v667_v10  ;;  %v3480_v10 = vld [vmem:[%s5100_s4 + $0x8] sm:$0xff]  }
 0x141   :  { %v365_v16 = vadd.f32 %v364_v14, %v3909_v2  ;;  %3320 = vmatprep.subr.bf16.mxu1 %v3480_v10 }
 0x142   :  { %v605_v17 = vpack.c.bf16 %v363_v13, %v359_v12  ;;  %3321 = vmatpush3.bf16.msra.mxu1 %v3480_v10 }
 0x143   :  { %v606_v18 = vpack.c.bf16 %v365_v16, %v361_v15 }
 0x144   :  { %v669_v24 = vmax.bf16 %v3527_v1, %v605_v17 }
 0x145   :  { %v368_v21 = vpop.f32.mrb[40].mxu0  ;;  %v670_v22 = vmax.bf16 %v3527_v1, %v606_v18 }
 0x146   :  { %v370_v23 = vpop.f32.mrb[41].mxu0  ;;  %v369_v26 = vadd.f32 %v368_v21, %v3905_v63 }
 0x147   :  { %v372_v25 = vpop.f32.mrb[42].mxu0  ;;  %948 = vmatprep.mubr.bf16.mxu1 %v670_v22  ;;  %v371_v29 = vadd.f32 %v370_v23, %v3909_v2 }
 0x148   :  { %v373_v27 = vadd.f32 %v372_v25, %v3905_v63  ;;  %v374_v28 = vpop.f32.mrb[43].mxu0  ;;  %949 = vmatmul.mubr.bf16.gmra.mrb[36].mxu1 %v669_v24 }
 0x149   :  { %v375_v30 = vadd.f32 %v374_v28, %v3909_v2 }
 0x14a   :  { %v607_v31 = vpack.c.bf16 %v373_v27, %v369_v26 }
 0x14b   :  { %v608_v32 = vpack.c.bf16 %v375_v30, %v371_v29 }
 0x14c   :  { %v671_v36 = vmax.bf16 %v3527_v1, %v607_v31 }
 0x14d   :  { %v378_v33 = vpop.f32.mrb[44].mxu0  ;;  %v672_v34 = vmax.bf16 %v3527_v1, %v608_v32 }
 0x14e   :  { %v380_v35 = vpop.f32.mrb[45].mxu0  ;;  %v379_v38 = vadd.f32 %v378_v33, %v3905_v63 }
 0x14f   :  { %v382_v37 = vpop.f32.mrb[46].mxu0  ;;  %956 = vmatprep.mubr.bf16.mxu1 %v672_v34  ;;  %v381_v41 = vadd.f32 %v380_v35, %v3909_v2 }
 0x150   :  { %v383_v39 = vadd.f32 %v382_v37, %v3905_v63  ;;  %v384_v40 = vpop.f32.mrb[47].mxu0  ;;  %957 = vmatmul.mubr.bf16.gmra.mrb[40].mxu1 %v671_v36 }
 0x151   :  { %v385_v42 = vadd.f32 %v384_v40, %v3909_v2 }
 0x152   :  { %v609_v43 = vpack.c.bf16 %v383_v39, %v379_v38 }
 0x153   :  { %v610_v44 = vpack.c.bf16 %v385_v42, %v381_v41 }
 0x154   :  { %v673_v48 = vmax.bf16 %v3527_v1, %v609_v43 }
 0x155   :  { %v388_v45 = vpop.f32.mrb[48].mxu0  ;;  %v674_v46 = vmax.bf16 %v3527_v1, %v610_v44 }
 0x156   :  { %v390_v47 = vpop.f32.mrb[49].mxu0  ;;  %v389_v50 = vadd.f32 %v388_v45, %v3905_v63 }
 0x157   :  { %v392_v49 = vpop.f32.mrb[50].mxu0  ;;  %964 = vmatprep.mubr.bf16.mxu1 %v674_v46  ;;  %v391_v53 = vadd.f32 %v390_v47, %v3909_v2 }
 0x158   :  { %v393_v51 = vadd.f32 %v392_v49, %v3905_v63  ;;  %v394_v52 = vpop.f32.mrb[51].mxu0  ;;  %965 = vmatmul.mubr.bf16.gmra.mrb[44].mxu1 %v673_v48 }
 0x159   :  { %v395_v54 = vadd.f32 %v394_v52, %v3909_v2 }
 0x15a   :  { %v611_v55 = vpack.c.bf16 %v393_v51, %v389_v50 }
 0x15b   :  { %v612_v57 = vpack.c.bf16 %v395_v54, %v391_v53 }
 0x15c   :  { %v675_v0 = vmax.bf16 %v3527_v1, %v611_v55 }
 0x15d   :  { %v398_v59 = vpop.f32.mrb[52].mxu0  ;;  %v676_v61 = vmax.bf16 %v3527_v1, %v612_v57  ;;  %v3481_v57 = vld [vmem:[%s5100_s4 + $0x10] sm:$0xff]  }
 0x15e   :  { %v400_v62 = vpop.f32.mrb[53].mxu0  ;;  %v399_v4 = vadd.f32 %v398_v59, %v3905_v63  ;;  %3322 = vmatprep.subr.bf16.mxu1 %v3481_v57 }
 0x15f   :  { %v402_v3 = vpop.f32.mrb[54].mxu0  ;;  %972 = vmatprep.mubr.bf16.mxu1 %v676_v61  ;;  %v401_v7 = vadd.f32 %v400_v62, %v3909_v2  ;;  %3323 = vmatpush3.bf16.msra.mxu1 %v3481_v57 }
 0x160   :  { %v403_v5 = vadd.f32 %v402_v3, %v3905_v63  ;;  %v404_v6 = vpop.f32.mrb[55].mxu0  ;;  %973 = vmatmul.mubr.bf16.gmra.mrb[48].mxu1 %v675_v0 }
 0x161   :  { %v405_v8 = vadd.f32 %v404_v6, %v3909_v2 }
 0x162   :  { %v613_v9 = vpack.c.bf16 %v403_v5, %v399_v4 }
 0x163   :  { %v614_v11 = vpack.c.bf16 %v405_v8, %v401_v7 }
 0x164   :  { %v677_v15 = vmax.bf16 %v3527_v1, %v613_v9 }
 0x165   :  { %v408_v12 = vpop.f32.mrb[56].mxu0  ;;  %v678_v13 = vmax.bf16 %v3527_v1, %v614_v11 }
 0x166   :  { %v410_v14 = vpop.f32.mrb[57].mxu0  ;;  %v409_v17 = vadd.f32 %v408_v12, %v3905_v63 }
 0x167   :  { %v412_v16 = vpop.f32.mrb[58].mxu0  ;;  %980 = vmatprep.mubr.bf16.mxu1 %v678_v13  ;;  %v411_v20 = vadd.f32 %v410_v14, %v3909_v2 }
 0x168   :  { %v413_v18 = vadd.f32 %v412_v16, %v3905_v63  ;;  %v414_v19 = vpop.f32.mrb[59].mxu0  ;;  %981 = vmatmul.mubr.bf16.gmra.mrb[52].mxu1 %v677_v15 }
 0x169   :  { %v415_v21 = vadd.f32 %v414_v19, %v3909_v2 }
 0x16a   :  { %v615_v22 = vpack.c.bf16 %v413_v18, %v409_v17 }
 0x16b   :  { %v616_v23 = vpack.c.bf16 %v415_v21, %v411_v20 }
 0x16c   :  { %v679_v27 = vmax.bf16 %v3527_v1, %v615_v22 }
 0x16d   :  { %v418_v24 = vpop.f32.mrb[60].mxu0  ;;  %v680_v25 = vmax.bf16 %v3527_v1, %v616_v23 }
 0x16e   :  { %v420_v26 = vpop.f32.mrb[61].mxu0  ;;  %v419_v29 = vadd.f32 %v418_v24, %v3905_v63 }
 0x16f   :  { %v422_v28 = vpop.f32.mrb[62].mxu0  ;;  %988 = vmatprep.mubr.bf16.mxu1 %v680_v25  ;;  %v421_v32 = vadd.f32 %v420_v26, %v3909_v2 }
 0x170   :  { %v423_v30 = vadd.f32 %v422_v28, %v3905_v63  ;;  %v424_v31 = vpop.f32.mrb[63].mxu0  ;;  %989 = vmatmul.mubr.bf16.gmra.mrb[56].mxu1 %v679_v27 }
 0x171   :  { %v425_v33 = vadd.f32 %v424_v31, %v3909_v2 }
 0x172   :  { %v617_v34 = vpack.c.bf16 %v423_v30, %v419_v29 }
 0x173   :  { %v618_v35 = vpack.c.bf16 %v425_v33, %v421_v32 }
 0x174   :  { %v681_v39 = vmax.bf16 %v3527_v1, %v617_v34 }
 0x175   :  { %v428_v36 = vpop.f32.mrb[64].mxu0  ;;  %v682_v37 = vmax.bf16 %v3527_v1, %v618_v35 }
 0x176   :  { %v430_v38 = vpop.f32.mrb[65].mxu0  ;;  %v429_v41 = vadd.f32 %v428_v36, %v3905_v63 }
 0x177   :  { %v432_v40 = vpop.f32.mrb[66].mxu0  ;;  %996 = vmatprep.mubr.bf16.mxu1 %v682_v37  ;;  %v431_v44 = vadd.f32 %v430_v38, %v3909_v2 }
 0x178   :  { %v433_v42 = vadd.f32 %v432_v40, %v3905_v63  ;;  %v434_v43 = vpop.f32.mrb[67].mxu0  ;;  %997 = vmatmul.mubr.bf16.gmra.mrb[60].mxu1 %v681_v39 }
 0x179   :  { %v435_v45 = vadd.f32 %v434_v43, %v3909_v2 }
 0x17a   :  { %v619_v46 = vpack.c.bf16 %v433_v42, %v429_v41 }
 0x17b   :  { %v620_v47 = vpack.c.bf16 %v435_v45, %v431_v44 }
 0x17c   :  { %v683_v51 = vmax.bf16 %v3527_v1, %v619_v46 }
 0x17d   :  { %v438_v48 = vpop.f32.mrb[68].mxu0  ;;  %v684_v49 = vmax.bf16 %v3527_v1, %v620_v47  ;;  %v3482_v47 = vld [vmem:[%s5100_s4 + $0x18] sm:$0xff]  }
 0x17e   :  { %v440_v50 = vpop.f32.mrb[69].mxu0  ;;  %v439_v53 = vadd.f32 %v438_v48, %v3905_v63  ;;  %3324 = vmatprep.subr.bf16.mxu1 %v3482_v47 }
 0x17f   :  { %v442_v52 = vpop.f32.mrb[70].mxu0  ;;  %1004 = vmatprep.mubr.bf16.mxu1 %v684_v49  ;;  %v441_v59 = vadd.f32 %v440_v50, %v3909_v2  ;;  %3325 = vmatpush3.bf16.msra.mxu1 %v3482_v47 }
 0x180   :  { %v443_v54 = vadd.f32 %v442_v52, %v3905_v63  ;;  %v444_v55 = vpop.f32.mrb[71].mxu0  ;;  %1005 = vmatmul.mubr.bf16.gmra.mrb[64].mxu1 %v683_v51 }
 0x181   :  { %v445_v61 = vadd.f32 %v444_v55, %v3909_v2 }
 0x182   :  { %v621_v62 = vpack.c.bf16 %v443_v54, %v439_v53 }
 0x183   :  { %v622_v0 = vpack.c.bf16 %v445_v61, %v441_v59 }
 0x184   :  { %v685_v6 = vmax.bf16 %v3527_v1, %v621_v62 }
 0x185   :  { %v448_v3 = vpop.f32.mrb[72].mxu0  ;;  %v686_v4 = vmax.bf16 %v3527_v1, %v622_v0 }
 0x186   :  { %v450_v5 = vpop.f32.mrb[73].mxu0  ;;  %v449_v8 = vadd.f32 %v448_v3, %v3905_v63 }
 0x187   :  { %v452_v7 = vpop.f32.mrb[74].mxu0  ;;  %1012 = vmatprep.mubr.bf16.mxu1 %v686_v4  ;;  %v451_v11 = vadd.f32 %v450_v5, %v3909_v2 }
 0x188   :  { %v453_v9 = vadd.f32 %v452_v7, %v3905_v63  ;;  %v454_v10 = vpop.f32.mrb[75].mxu0  ;;  %1013 = vmatmul.mubr.bf16.gmra.mrb[68].mxu1 %v685_v6 }
 0x189   :  { %v455_v12 = vadd.f32 %v454_v10, %v3909_v2 }
 0x18a   :  { %v623_v13 = vpack.c.bf16 %v453_v9, %v449_v8 }
 0x18b   :  { %v624_v14 = vpack.c.bf16 %v455_v12, %v451_v11 }
 0x18c   :  { %v687_v18 = vmax.bf16 %v3527_v1, %v623_v13 }
 0x18d   :  { %v458_v15 = vpop.f32.mrb[76].mxu0  ;;  %v688_v16 = vmax.bf16 %v3527_v1, %v624_v14 }
 0x18e   :  { %v460_v17 = vpop.f32.mrb[77].mxu0  ;;  %v459_v20 = vadd.f32 %v458_v15, %v3905_v63 }
 0x18f   :  { %v462_v19 = vpop.f32.mrb[78].mxu0  ;;  %1020 = vmatprep.mubr.bf16.mxu1 %v688_v16  ;;  %v461_v23 = vadd.f32 %v460_v17, %v3909_v2 }
 0x190   :  { %v463_v21 = vadd.f32 %v462_v19, %v3905_v63  ;;  %v464_v22 = vpop.f32.mrb[79].mxu0  ;;  %1021 = vmatmul.mubr.bf16.gmra.mrb[72].mxu1 %v687_v18 }
 0x191   :  { %v465_v24 = vadd.f32 %v464_v22, %v3909_v2 }
 0x192   :  { %v625_v25 = vpack.c.bf16 %v463_v21, %v459_v20 }
 0x193   :  { %v626_v26 = vpack.c.bf16 %v465_v24, %v461_v23 }
 0x194   :  { %v689_v30 = vmax.bf16 %v3527_v1, %v625_v25 }
 0x195   :  { %v468_v27 = vpop.f32.mrb[80].mxu0  ;;  %v690_v28 = vmax.bf16 %v3527_v1, %v626_v26 }
 0x196   :  { %v470_v29 = vpop.f32.mrb[81].mxu0  ;;  %v469_v32 = vadd.f32 %v468_v27, %v3905_v63 }
 0x197   :  { %v472_v31 = vpop.f32.mrb[82].mxu0  ;;  %1028 = vmatprep.mubr.bf16.mxu1 %v690_v28  ;;  %v471_v35 = vadd.f32 %v470_v29, %v3909_v2 }
 0x198   :  { %v473_v33 = vadd.f32 %v472_v31, %v3905_v63  ;;  %v474_v34 = vpop.f32.mrb[83].mxu0  ;;  %1029 = vmatmul.mubr.bf16.gmra.mrb[76].mxu1 %v689_v30 }
 0x199   :  { %v475_v36 = vadd.f32 %v474_v34, %v3909_v2 }
 0x19a   :  { %v627_v37 = vpack.c.bf16 %v473_v33, %v469_v32 }
 0x19b   :  { %v628_v38 = vpack.c.bf16 %v475_v36, %v471_v35 }
 0x19c   :  { %v691_v42 = vmax.bf16 %v3527_v1, %v627_v37 }
 0x19d   :  { %v478_v39 = vpop.f32.mrb[84].mxu0  ;;  %v692_v40 = vmax.bf16 %v3527_v1, %v628_v38  ;;  %v3483_v38 = vld [vmem:[%s5100_s4 + $0x20] sm:$0xff]  }
 0x19e   :  { %v480_v41 = vpop.f32.mrb[85].mxu0  ;;  %v479_v44 = vadd.f32 %v478_v39, %v3905_v63  ;;  %3326 = vmatprep.subr.bf16.mxu1 %v3483_v38 }
 0x19f   :  { %v482_v43 = vpop.f32.mrb[86].mxu0  ;;  %1036 = vmatprep.mubr.bf16.mxu1 %v692_v40  ;;  %v481_v48 = vadd.f32 %v480_v41, %v3909_v2  ;;  %3327 = vmatpush3.bf16.msra.mxu1 %v3483_v38 }
 0x1a0   :  { %v483_v45 = vadd.f32 %v482_v43, %v3905_v63  ;;  %v484_v46 = vpop.f32.mrb[87].mxu0  ;;  %1037 = vmatmul.mubr.bf16.gmra.mrb[80].mxu1 %v691_v42 }
 0x1a1   :  { %v485_v49 = vadd.f32 %v484_v46, %v3909_v2 }
 0x1a2   :  { %v629_v50 = vpack.c.bf16 %v483_v45, %v479_v44 }
 0x1a3   :  { %v630_v51 = vpack.c.bf16 %v485_v49, %v481_v48 }
 0x1a4   :  { %v693_v55 = vmax.bf16 %v3527_v1, %v629_v50 }
 0x1a5   :  { %v488_v52 = vpop.f32.mrb[88].mxu0  ;;  %v694_v53 = vmax.bf16 %v3527_v1, %v630_v51 }
 0x1a6   :  { %v490_v54 = vpop.f32.mrb[89].mxu0  ;;  %v489_v59 = vadd.f32 %v488_v52, %v3905_v63 }
 0x1a7   :  { %v492_v57 = vpop.f32.mrb[90].mxu0  ;;  %1044 = vmatprep.mubr.bf16.mxu1 %v694_v53  ;;  %v491_v0 = vadd.f32 %v490_v54, %v3909_v2 }
 0x1a8   :  { %v493_v61 = vadd.f32 %v492_v57, %v3905_v63  ;;  %v494_v62 = vpop.f32.mrb[91].mxu0  ;;  %1045 = vmatmul.mubr.bf16.gmra.mrb[84].mxu1 %v693_v55 }
 0x1a9   :  { %v495_v3 = vadd.f32 %v494_v62, %v3909_v2 }
 0x1aa   :  { %v631_v4 = vpack.c.bf16 %v493_v61, %v489_v59 }
 0x1ab   :  { %v632_v5 = vpack.c.bf16 %v495_v3, %v491_v0 }
 0x1ac   :  { %v695_v9 = vmax.bf16 %v3527_v1, %v631_v4 }
 0x1ad   :  { %v498_v6 = vpop.f32.mrb[92].mxu0  ;;  %v696_v7 = vmax.bf16 %v3527_v1, %v632_v5 }
 0x1ae   :  { %v500_v8 = vpop.f32.mrb[93].mxu0  ;;  %v499_v11 = vadd.f32 %v498_v6, %v3905_v63 }
 0x1af   :  { %v502_v10 = vpop.f32.mrb[94].mxu0  ;;  %1052 = vmatprep.mubr.bf16.mxu1 %v696_v7  ;;  %v501_v14 = vadd.f32 %v500_v8, %v3909_v2 }
 0x1b0   :  { %v503_v12 = vadd.f32 %v502_v10, %v3905_v63  ;;  %v504_v13 = vpop.f32.mrb[95].mxu0  ;;  %1053 = vmatmul.mubr.bf16.gmra.mrb[88].mxu1 %v695_v9  ;;  %v4132_v9 = vld [vmem:[%s5099_s7 + $0x1] ss:$0 sm:$0xff] }
 0x1b1   :  { %v505_v15 = vadd.f32 %v504_v13, %v3909_v2 }
 0x1b2   :  { %v633_v16 = vpack.c.bf16 %v503_v12, %v499_v11 }
 0x1b3   :  { %v634_v17 = vpack.c.bf16 %v505_v15, %v501_v14 }
 0x1b4   :  { %v697_v21 = vmax.bf16 %v3527_v1, %v633_v16 }
 0x1b5   :  { %v508_v18 = vpop.f32.mrb[96].mxu0  ;;  %v698_v19 = vmax.bf16 %v3527_v1, %v634_v17 }
 0x1b6   :  { %v510_v20 = vpop.f32.mrb[97].mxu0  ;;  %v509_v23 = vadd.f32 %v508_v18, %v3905_v63 }
 0x1b7   :  { %v512_v22 = vpop.f32.mrb[98].mxu0  ;;  %1060 = vmatprep.mubr.bf16.mxu1 %v698_v19  ;;  %v511_v26 = vadd.f32 %v510_v20, %v3909_v2 }
 0x1b8   :  { %v513_v24 = vadd.f32 %v512_v22, %v3905_v63  ;;  %v514_v25 = vpop.f32.mrb[99].mxu0  ;;  %1061 = vmatmul.mubr.bf16.gmra.mrb[92].mxu1 %v697_v21 }
 0x1b9   :  { %v515_v27 = vadd.f32 %v514_v25, %v3909_v2 }
 0x1ba   :  { %v635_v28 = vpack.c.bf16 %v513_v24, %v509_v23 }
 0x1bb   :  { %v636_v29 = vpack.c.bf16 %v515_v27, %v511_v26 }
 0x1bc   :  { %v699_v33 = vmax.bf16 %v3527_v1, %v635_v28 }
 0x1bd   :  { %v518_v30 = vpop.f32.mrb[100].mxu0  ;;  %v700_v31 = vmax.bf16 %v3527_v1, %v636_v29 }
 0x1be   :  { %v520_v32 = vpop.f32.mrb[101].mxu0  ;;  %v519_v35 = vadd.f32 %v518_v30, %v3905_v63 }
 0x1bf   :  { %v522_v34 = vpop.f32.mrb[102].mxu0  ;;  %1068 = vmatprep.mubr.bf16.mxu1 %v700_v31  ;;  %v521_v39 = vadd.f32 %v520_v32, %v3909_v2 }
 0x1c0   :  { %v523_v36 = vadd.f32 %v522_v34, %v3905_v63  ;;  %v524_v37 = vpop.f32.mrb[103].mxu0  ;;  %1069 = vmatmul.mubr.bf16.gmra.mrb[96].mxu1 %v699_v33 }
 0x1c1   :  { %v525_v40 = vadd.f32 %v524_v37, %v3909_v2 }
 0x1c2   :  { %v637_v41 = vpack.c.bf16 %v523_v36, %v519_v35 }
 0x1c3   :  { %v638_v42 = vpack.c.bf16 %v525_v40, %v521_v39 }
 0x1c4   :  { %v701_v46 = vmax.bf16 %v3527_v1, %v637_v41 }
 0x1c5   :  { %v528_v43 = vpop.f32.mrb[104].mxu0  ;;  %v702_v44 = vmax.bf16 %v3527_v1, %v638_v42 }
 0x1c6   :  { %v530_v45 = vpop.f32.mrb[105].mxu0  ;;  %v529_v48 = vadd.f32 %v528_v43, %v3905_v63 }
 0x1c7   :  { %v532_v47 = vpop.f32.mrb[106].mxu0  ;;  %1076 = vmatprep.mubr.bf16.mxu1 %v702_v44  ;;  %v531_v51 = vadd.f32 %v530_v45, %v3909_v2  ;;  %v3484_v45 = vld [vmem:[%s5100_s4 + $0x28] sm:$0xff]  }
 0x1c8   :  { %v533_v49 = vadd.f32 %v532_v47, %v3905_v63  ;;  %v534_v50 = vpop.f32.mrb[107].mxu0  ;;  %1077 = vmatmul.mubr.bf16.gmra.mrb[100].mxu1 %v701_v46  ;;  %3328 = vmatprep.subr.bf16.mxu1 %v3484_v45 }
 0x1c9   :  { %v535_v52 = vadd.f32 %v534_v50, %v3909_v2  ;;  %3329 = vmatpush3.bf16.msra.mxu1 %v3484_v45 }
 0x1ca   :  { %v639_v53 = vpack.c.bf16 %v533_v49, %v529_v48 }
 0x1cb   :  { %v640_v54 = vpack.c.bf16 %v535_v52, %v531_v51 }
 0x1cc   :  { %v703_v61 = vmax.bf16 %v3527_v1, %v639_v53 }
 0x1cd   :  { %v538_v55 = vpop.f32.mrb[108].mxu0  ;;  %v704_v57 = vmax.bf16 %v3527_v1, %v640_v54 }
 0x1ce   :  { %v540_v59 = vpop.f32.mrb[109].mxu0  ;;  %v539_v0 = vadd.f32 %v538_v55, %v3905_v63 }
 0x1cf   :  { %v542_v62 = vpop.f32.mrb[110].mxu0  ;;  %1084 = vmatprep.mubr.bf16.mxu1 %v704_v57  ;;  %v541_v5 = vadd.f32 %v540_v59, %v3909_v2 }
 0x1d0   :  { %v543_v3 = vadd.f32 %v542_v62, %v3905_v63  ;;  %v544_v4 = vpop.f32.mrb[111].mxu0  ;;  %1085 = vmatmul.mubr.bf16.gmra.mrb[104].mxu1 %v703_v61 }
 0x1d1   :  { %v545_v6 = vadd.f32 %v544_v4, %v3909_v2 }
 0x1d2   :  { %v641_v7 = vpack.c.bf16 %v543_v3, %v539_v0 }
 0x1d3   :  { %v642_v8 = vpack.c.bf16 %v545_v6, %v541_v5  ;;  %v878_v10 = vpop.f32.mrb[0].mxu1 }
 0x1d4   :  { %v880_v11 = vpop.f32.mrb[1].mxu1  ;;  %v879_v15 = vadd.f32 %v878_v10, %v4132_v9  ;;  %v705_v19 = vmax.bf16 %v3527_v1, %v641_v7 }
 0x1d5   :  { %v548_v12 = vpop.f32.mrb[112].mxu0  ;;  %v881_v13 = vpop.f32.mrb[2].mxu1  ;;  %v706_v14 = vmax.bf16 %v3527_v1, %v642_v8 }
 0x1d6   :  { %v882_v16 = vadd.f32 %v881_v13, %v4132_v9  ;;  %v550_v17 = vpop.f32.mrb[113].mxu0  ;;  %v883_v18 = vpop.f32.mrb[3].mxu1  ;;  %v549_v21 = vadd.f32 %v548_v12, %v3905_v63 }
 0x1d7   :  { %v552_v20 = vpop.f32.mrb[114].mxu0  ;;  %1092 = vmatprep.mubr.bf16.mxu1 %v706_v14  ;;  %v551_v25 = vadd.f32 %v550_v17, %v3909_v2 }
 0x1d8   :  { %v1133_v22 = vpack.c.bf16 %v882_v16, %v879_v15  ;;  %v553_v23 = vadd.f32 %v552_v20, %v3905_v63  ;;  %v554_v24 = vpop.f32.mrb[115].mxu0  ;;  %1093 = vmatmul.mubr.bf16.gmra.mrb[108].mxu1 %v705_v19 }
 0x1d9   :  { %v555_v26 = vadd.f32 %v554_v24, %v3909_v2 }
 0x1da   :  { %v643_v27 = vpack.c.bf16 %v553_v23, %v549_v21  ;;  %v1165_v28 = vmax.bf16 %v3527_v1, %v1133_v22 }
 0x1db   :  { %v644_v29 = vpack.c.bf16 %v555_v26, %v551_v25  ;;  %v886_v30 = vpop.f32.mrb[4].mxu1 }
 0x1dc   :  { %v888_v31 = vpop.f32.mrb[5].mxu1  ;;  %3254 = vmatprep.mubr.bf16.mxu0 %v1165_v28  ;;  %v887_v35 = vadd.f32 %v886_v30, %v4132_v9  ;;  %v707_v39 = vmax.bf16 %v3527_v1, %v643_v27 }
 0x1dd   :  { %v558_v32 = vpop.f32.mrb[116].mxu0  ;;  %v889_v33 = vpop.f32.mrb[6].mxu1  ;;  %v708_v34 = vmax.bf16 %v3527_v1, %v644_v29 }
 0x1de   :  { %v890_v36 = vadd.f32 %v889_v33, %v4132_v9  ;;  %v560_v37 = vpop.f32.mrb[117].mxu0  ;;  %v891_v38 = vpop.f32.mrb[7].mxu1  ;;  %v559_v41 = vadd.f32 %v558_v32, %v3905_v63 }
 0x1df   :  { %v562_v40 = vpop.f32.mrb[118].mxu0  ;;  %1100 = vmatprep.mubr.bf16.mxu1 %v708_v34  ;;  %v561_v46 = vadd.f32 %v560_v37, %v3909_v2 }
 0x1e0   :  { %v1134_v42 = vpack.c.bf16 %v890_v36, %v887_v35  ;;  %v563_v43 = vadd.f32 %v562_v40, %v3905_v63  ;;  %v564_v44 = vpop.f32.mrb[119].mxu0  ;;  %1101 = vmatmul.mubr.bf16.gmra.mrb[112].mxu1 %v707_v39 }
 0x1e1   :  { %v565_v47 = vadd.f32 %v564_v44, %v3909_v2 }
 0x1e2   :  { %v1166_v48 = vmax.bf16 %v3527_v1, %v1134_v42  ;;  %v645_v49 = vpack.c.bf16 %v563_v43, %v559_v41 }
 0x1e3   :  { %v646_v50 = vpack.c.bf16 %v565_v47, %v561_v46  ;;  %v894_v51 = vpop.f32.mrb[8].mxu1 }
 0x1e4   :  { %v896_v52 = vpop.f32.mrb[9].mxu1  ;;  %3255 = vmatmul.mubr.bf16.vlgmr.msra.gmra.mrb[128].mxu0 %v1166_v48  ;;  %v895_v57 = vadd.f32 %v894_v51, %v4132_v9  ;;  %v709_v0 = vmax.bf16 %v3527_v1, %v645_v49  ;;  %v3485_v49 = vld [vmem:[%s5100_s4 + $0x30] sm:$0xff]  }
 0x1e5   :  { %v568_v53 = vpop.f32.mrb[120].mxu0  ;;  %v897_v54 = vpop.f32.mrb[10].mxu1  ;;  %v710_v55 = vmax.bf16 %v3527_v1, %v646_v50  ;;  %3330 = vmatprep.subr.bf16.mxu1 %v3485_v49 }
 0x1e6   :  { %v898_v59 = vadd.f32 %v897_v54, %v4132_v9  ;;  %v570_v61 = vpop.f32.mrb[121].mxu0  ;;  %v899_v62 = vpop.f32.mrb[11].mxu1  ;;  %v569_v4 = vadd.f32 %v568_v53, %v3905_v63  ;;  %3331 = vmatpush3.bf16.msra.mxu1 %v3485_v49 }
 0x1e7   :  { %v572_v3 = vpop.f32.mrb[122].mxu0  ;;  %1108 = vmatprep.mubr.bf16.mxu1 %v710_v55  ;;  %v571_v8 = vadd.f32 %v570_v61, %v3909_v2 }
 0x1e8   :  { %v1135_v5 = vpack.c.bf16 %v898_v59, %v895_v57  ;;  %v573_v6 = vadd.f32 %v572_v3, %v3905_v63  ;;  %v574_v7 = vpop.f32.mrb[123].mxu0  ;;  %1109 = vmatmul.mubr.bf16.gmra.mrb[116].mxu1 %v709_v0 }
 0x1e9   :  { %v575_v10 = vadd.f32 %v574_v7, %v3909_v2 }
 0x1ea   :  { %v647_v11 = vpack.c.bf16 %v573_v6, %v569_v4  ;;  %v1167_v12 = vmax.bf16 %v3527_v1, %v1135_v5 }
 0x1eb   :  { %v648_v13 = vpack.c.bf16 %v575_v10, %v571_v8  ;;  %v902_v14 = vpop.f32.mrb[12].mxu1 }
 0x1ec   :  { %v904_v15 = vpop.f32.mrb[13].mxu1  ;;  %3258 = vmatprep.mubr.bf16.mxu0 %v1167_v12  ;;  %v903_v19 = vadd.f32 %v902_v14, %v4132_v9  ;;  %v711_v23 = vmax.bf16 %v3527_v1, %v647_v11 }
 0x1ed   :  { %v578_v16 = vpop.f32.mrb[124].mxu0  ;;  %v905_v17 = vpop.f32.mrb[14].mxu1  ;;  %v712_v18 = vmax.bf16 %v3527_v1, %v648_v13 }
 0x1ee   :  { %v906_v20 = vadd.f32 %v905_v17, %v4132_v9  ;;  %v580_v21 = vpop.f32.mrb[125].mxu0  ;;  %v907_v22 = vpop.f32.mrb[15].mxu1  ;;  %v579_v25 = vadd.f32 %v578_v16, %v3905_v63 }
 0x1ef   :  { %v582_v24 = vpop.f32.mrb[126].mxu0  ;;  %1116 = vmatprep.mubr.bf16.mxu1 %v712_v18  ;;  %v581_v29 = vadd.f32 %v580_v21, %v3909_v2 }
 0x1f0   :  { %v1136_v26 = vpack.c.bf16 %v906_v20, %v903_v19  ;;  %v583_v27 = vadd.f32 %v582_v24, %v3905_v63  ;;  %v584_v28 = vpop.f32.mrb[127].mxu0  ;;  %1117 = vmatmul.mubr.bf16.gmra.mrb[120].mxu1 %v711_v23 }
 0x1f1   :  { %v585_v30 = vadd.f32 %v584_v28, %v3909_v2 }
 0x1f2   :  { %v649_v31 = vpack.c.bf16 %v583_v27, %v579_v25  ;;  %v1168_v32 = vmax.bf16 %v3527_v1, %v1136_v26  ;;  %v3486_v25 = vld [vmem:[%s5100_s4 + $0x38] sm:$0xff]  }
 0x1f3   :  { %v650_v33 = vpack.c.bf16 %v585_v30, %v581_v29  ;;  %v910_v34 = vpop.f32.mrb[16].mxu1  ;;  %3332 = vmatprep.subr.bf16.mxu1 %v3486_v25 }
 0x1f4   :  { %v912_v35 = vpop.f32.mrb[17].mxu1  ;;  %3259 = vmatmul.mubr.bf16.gmra.mrb[132].mxu0 %v1168_v32  ;;  %v911_v38 = vadd.f32 %v910_v34, %v4132_v9  ;;  %v713_v40 = vmax.bf16 %v3527_v1, %v649_v31  ;;  %3333 = vmatpush3.bf16.msra.mxu1 %v3486_v25 }
 0x1f5   :  { %v913_v36 = vpop.f32.mrb[18].mxu1  ;;  %v714_v37 = vmax.bf16 %v3527_v1, %v650_v33  ;;  %3398 = vmatprep.subr.bf16.mxu1 %v3527_v1 }
 0x1f6   :  { %v914_v63 = vadd.f32 %v913_v36, %v4132_v9  ;;  %v915_v39 = vpop.f32.mrb[19].mxu1 }
 0x1f7   :  { %1124 = vmatprep.mubr.bf16.mxu1 %v714_v37 }
 0x1f8   :  { %v1137_v41 = vpack.c.bf16 %v914_v63, %v911_v38  ;;  %1125 = vmatmul.mubr.bf16.gmra.mrb[124].mxu1 %v713_v40 }
 0x1fa   :  { %v1169_v2 = vmax.bf16 %v3527_v1, %v1137_v41 }
 0x1fb   :  { %v918_v42 = vpop.f32.mrb[20].mxu1 }
 0x1fc   :  { %v920_v43 = vpop.f32.mrb[21].mxu1  ;;  %3262 = vmatprep.mubr.bf16.mxu0 %v1169_v2  ;;  %v919_v45 = vadd.f32 %v918_v42, %v4132_v9 }
 0x1fd   :  { %v921_v44 = vpop.f32.mrb[22].mxu1 }
 0x1fe   :  { %v922_v46 = vadd.f32 %v921_v44, %v4132_v9  ;;  %v923_v47 = vpop.f32.mrb[23].mxu1 }
 0x200   :  { %v1138_v48 = vpack.c.bf16 %v922_v46, %v919_v45 }
 0x202   :  { %v1170_v50 = vmax.bf16 %v3527_v1, %v1138_v48 }
 0x203   :  { %v926_v51 = vpop.f32.mrb[24].mxu1 }
 0x204   :  { %v928_v52 = vpop.f32.mrb[25].mxu1  ;;  %3263 = vmatmul.mubr.bf16.gmra.mrb[136].mxu0 %v1170_v50  ;;  %v927_v54 = vadd.f32 %v926_v51, %v4132_v9 }
 0x205   :  { %v929_v53 = vpop.f32.mrb[26].mxu1 }
 0x206   :  { %v930_v55 = vadd.f32 %v929_v53, %v4132_v9  ;;  %v931_v57 = vpop.f32.mrb[27].mxu1 }
 0x208   :  { %v1139_v59 = vpack.c.bf16 %v930_v55, %v927_v54 }
 0x20a   :  { %v1171_v61 = vmax.bf16 %v3527_v1, %v1139_v59 }
 0x20b   :  { %v934_v62 = vpop.f32.mrb[28].mxu1 }
 0x20c   :  { %v936_v0 = vpop.f32.mrb[29].mxu1  ;;  %3266 = vmatprep.mubr.bf16.mxu0 %v1171_v61  ;;  %v935_v4 = vadd.f32 %v934_v62, %v4132_v9 }
 0x20d   :  { %v937_v3 = vpop.f32.mrb[30].mxu1 }
 0x20e   :  { %v938_v5 = vadd.f32 %v937_v3, %v4132_v9  ;;  %v939_v6 = vpop.f32.mrb[31].mxu1 }
 0x210   :  { %v1140_v7 = vpack.c.bf16 %v938_v5, %v935_v4 }
 0x212   :  { %v1172_v8 = vmax.bf16 %v3527_v1, %v1140_v7 }
 0x213   :  { %v942_v10 = vpop.f32.mrb[32].mxu1 }
 0x214   :  { %v944_v11 = vpop.f32.mrb[33].mxu1  ;;  %3267 = vmatmul.mubr.bf16.gmra.mrb[140].mxu0 %v1172_v8  ;;  %v943_v13 = vadd.f32 %v942_v10, %v4132_v9 }
 0x215   :  { %v945_v12 = vpop.f32.mrb[34].mxu1 }
 0x216   :  { %v946_v14 = vadd.f32 %v945_v12, %v4132_v9  ;;  %v947_v15 = vpop.f32.mrb[35].mxu1 }
 0x218   :  { %v1141_v16 = vpack.c.bf16 %v946_v14, %v943_v13 }
 0x21a   :  { %v1173_v17 = vmax.bf16 %v3527_v1, %v1141_v16 }
 0x21b   :  { %v950_v18 = vpop.f32.mrb[36].mxu1 }
 0x21c   :  { %v952_v19 = vpop.f32.mrb[37].mxu1  ;;  %3270 = vmatprep.mubr.bf16.mxu0 %v1173_v17  ;;  %v951_v21 = vadd.f32 %v950_v18, %v4132_v9 }
 0x21d   :  { %v953_v20 = vpop.f32.mrb[38].mxu1 }
 0x21e   :  { %v954_v22 = vadd.f32 %v953_v20, %v4132_v9  ;;  %v955_v23 = vpop.f32.mrb[39].mxu1 }
 0x220   :  { %v1142_v24 = vpack.c.bf16 %v954_v22, %v951_v21 }
 0x222   :  { %v1174_v26 = vmax.bf16 %v3527_v1, %v1142_v24 }
 0x223   :  { %v958_v27 = vpop.f32.mrb[40].mxu1 }
 0x224   :  { %v960_v28 = vpop.f32.mrb[41].mxu1  ;;  %3271 = vmatmul.mubr.bf16.gmra.mrb[144].mxu0 %v1174_v26  ;;  %v959_v30 = vadd.f32 %v958_v27, %v4132_v9 }
 0x225   :  { %v961_v29 = vpop.f32.mrb[42].mxu1 }
 0x226   :  { %v962_v31 = vadd.f32 %v961_v29, %v4132_v9  ;;  %v963_v32 = vpop.f32.mrb[43].mxu1 }
 0x228   :  { %v1143_v33 = vpack.c.bf16 %v962_v31, %v959_v30 }
 0x22a   :  { %v1175_v34 = vmax.bf16 %v3527_v1, %v1143_v33 }
 0x22b   :  { %v966_v35 = vpop.f32.mrb[44].mxu1 }
 0x22c   :  { %v968_v36 = vpop.f32.mrb[45].mxu1  ;;  %3274 = vmatprep.mubr.bf16.mxu0 %v1175_v34  ;;  %v967_v38 = vadd.f32 %v966_v35, %v4132_v9 }
 0x22d   :  { %v969_v37 = vpop.f32.mrb[46].mxu1 }
 0x22e   :  { %v970_v63 = vadd.f32 %v969_v37, %v4132_v9  ;;  %v971_v39 = vpop.f32.mrb[47].mxu1 }
 0x230   :  { %v1144_v40 = vpack.c.bf16 %v970_v63, %v967_v38 }
 0x232   :  { %v1176_v41 = vmax.bf16 %v3527_v1, %v1144_v40 }
 0x233   :  { %v974_v2 = vpop.f32.mrb[48].mxu1 }
 0x234   :  { %v976_v42 = vpop.f32.mrb[49].mxu1  ;;  %3275 = vmatmul.mubr.bf16.gmra.mrb[148].mxu0 %v1176_v41  ;;  %v975_v44 = vadd.f32 %v974_v2, %v4132_v9 }
 0x235   :  { %v977_v43 = vpop.f32.mrb[50].mxu1 }
 0x236   :  { %v978_v45 = vadd.f32 %v977_v43, %v4132_v9  ;;  %v979_v46 = vpop.f32.mrb[51].mxu1 }
 0x238   :  { %v1145_v47 = vpack.c.bf16 %v978_v45, %v975_v44 }
 0x23a   :  { %v1177_v48 = vmax.bf16 %v3527_v1, %v1145_v47 }
 0x23b   :  { %v982_v49 = vpop.f32.mrb[52].mxu1 }
 0x23c   :  { %v984_v50 = vpop.f32.mrb[53].mxu1  ;;  %3278 = vmatprep.mubr.bf16.mxu0 %v1177_v48  ;;  %v983_v52 = vadd.f32 %v982_v49, %v4132_v9 }
 0x23d   :  { %v985_v51 = vpop.f32.mrb[54].mxu1 }
 0x23e   :  { %v986_v53 = vadd.f32 %v985_v51, %v4132_v9  ;;  %v987_v54 = vpop.f32.mrb[55].mxu1 }
 0x240   :  { %v1146_v55 = vpack.c.bf16 %v986_v53, %v983_v52 }
 0x242   :  { %v1178_v57 = vmax.bf16 %v3527_v1, %v1146_v55 }
 0x243   :  { %v990_v59 = vpop.f32.mrb[56].mxu1 }
 0x244   :  { %v992_v61 = vpop.f32.mrb[57].mxu1  ;;  %3279 = vmatmul.mubr.bf16.gmra.mrb[152].mxu0 %v1178_v57  ;;  %v991_v0 = vadd.f32 %v990_v59, %v4132_v9 }
 0x245   :  { %v993_v62 = vpop.f32.mrb[58].mxu1 }
 0x246   :  { %v994_v3 = vadd.f32 %v993_v62, %v4132_v9  ;;  %v995_v4 = vpop.f32.mrb[59].mxu1 }
 0x248   :  { %v1147_v5 = vpack.c.bf16 %v994_v3, %v991_v0 }
 0x24a   :  { %v1179_v6 = vmax.bf16 %v3527_v1, %v1147_v5 }
 0x24b   :  { %v998_v7 = vpop.f32.mrb[60].mxu1 }
 0x24c   :  { %v1000_v8 = vpop.f32.mrb[61].mxu1  ;;  %3282 = vmatprep.mubr.bf16.mxu0 %v1179_v6  ;;  %v999_v11 = vadd.f32 %v998_v7, %v4132_v9 }
 0x24d   :  { %v1001_v10 = vpop.f32.mrb[62].mxu1 }
 0x24e   :  { %v1002_v12 = vadd.f32 %v1001_v10, %v4132_v9  ;;  %v1003_v13 = vpop.f32.mrb[63].mxu1 }
 0x250   :  { %v1148_v14 = vpack.c.bf16 %v1002_v12, %v999_v11 }
 0x252   :  { %v1180_v15 = vmax.bf16 %v3527_v1, %v1148_v14 }
 0x253   :  { %v1006_v16 = vpop.f32.mrb[64].mxu1 }
 0x254   :  { %v1008_v17 = vpop.f32.mrb[65].mxu1  ;;  %3283 = vmatmul.mubr.bf16.gmra.mrb[156].mxu0 %v1180_v15  ;;  %v1007_v19 = vadd.f32 %v1006_v16, %v4132_v9 }
 0x255   :  { %v1009_v18 = vpop.f32.mrb[66].mxu1 }
 0x256   :  { %v1010_v20 = vadd.f32 %v1009_v18, %v4132_v9  ;;  %v1011_v21 = vpop.f32.mrb[67].mxu1 }
 0x258   :  { %v1149_v22 = vpack.c.bf16 %v1010_v20, %v1007_v19 }
 0x25a   :  { %v1181_v23 = vmax.bf16 %v3527_v1, %v1149_v22 }
 0x25b   :  { %v1014_v24 = vpop.f32.mrb[68].mxu1 }
 0x25c   :  { %v1016_v25 = vpop.f32.mrb[69].mxu1  ;;  %3286 = vmatprep.mubr.bf16.mxu0 %v1181_v23  ;;  %v1015_v27 = vadd.f32 %v1014_v24, %v4132_v9 }
 0x25d   :  { %v1017_v26 = vpop.f32.mrb[70].mxu1 }
 0x25e   :  { %v1018_v28 = vadd.f32 %v1017_v26, %v4132_v9  ;;  %v1019_v29 = vpop.f32.mrb[71].mxu1 }
 0x260   :  { %v1150_v30 = vpack.c.bf16 %v1018_v28, %v1015_v27 }
 0x262   :  { %v1182_v31 = vmax.bf16 %v3527_v1, %v1150_v30 }
 0x263   :  { %v1022_v32 = vpop.f32.mrb[72].mxu1 }
 0x264   :  { %v1024_v33 = vpop.f32.mrb[73].mxu1  ;;  %3287 = vmatmul.mubr.bf16.gmra.mrb[160].mxu0 %v1182_v31  ;;  %v1023_v35 = vadd.f32 %v1022_v32, %v4132_v9 }
 0x265   :  { %v1025_v34 = vpop.f32.mrb[74].mxu1 }
 0x266   :  { %v1026_v36 = vadd.f32 %v1025_v34, %v4132_v9  ;;  %v1027_v37 = vpop.f32.mrb[75].mxu1 }
 0x268   :  { %v1151_v38 = vpack.c.bf16 %v1026_v36, %v1023_v35  ;;  %v3487_v35 = vld [vmem:[%s5101_s5] ss:$8 sps:$4 sm:$0xff]   ;;  %v3489_v36 = vld [vmem:[%s5101_s5 + $0x4] ss:$8 sps:$4 sm:$0xff]  }
 0x269   :  { %2110 = vmatprep.subr.bf16.mxu0 %v3489_v36 }
 0x26a   :  { %v1183_v63 = vmax.bf16 %v3527_v1, %v1151_v38  ;;  %2111 = vmatpush1.bf16.msra.mxu0 %v3487_v35 }
 0x26b   :  { %v1030_v39 = vpop.f32.mrb[76].mxu1 }
 0x26c   :  { %v1032_v40 = vpop.f32.mrb[77].mxu1  ;;  %3290 = vmatprep.mubr.bf16.mxu0 %v1183_v63  ;;  %v1031_v2 = vadd.f32 %v1030_v39, %v4132_v9 }
 0x26d   :  { %v1033_v41 = vpop.f32.mrb[78].mxu1 }
 0x26e   :  { %v1034_v42 = vadd.f32 %v1033_v41, %v4132_v9  ;;  %v1035_v43 = vpop.f32.mrb[79].mxu1 }
 0x270   :  { %v1152_v44 = vpack.c.bf16 %v1034_v42, %v1031_v2 }
 0x272   :  { %v1184_v45 = vmax.bf16 %v3527_v1, %v1152_v44 }
 0x273   :  { %v1038_v46 = vpop.f32.mrb[80].mxu1 }
 0x274   :  { %v1040_v47 = vpop.f32.mrb[81].mxu1  ;;  %3291 = vmatmul.mubr.bf16.gmra.mrb[164].mxu0 %v1184_v45  ;;  %v1039_v49 = vadd.f32 %v1038_v46, %v4132_v9 }
 0x275   :  { %v1041_v48 = vpop.f32.mrb[82].mxu1 }
 0x276   :  { %v1042_v50 = vadd.f32 %v1041_v48, %v4132_v9  ;;  %v1043_v51 = vpop.f32.mrb[83].mxu1  ;;  %v3490_v48 = vld [vmem:[%s5101_s5 + $0x10] ss:$8 sps:$4 sm:$0xff]  }
 0x278   :  { %v1153_v52 = vpack.c.bf16 %v1042_v50, %v1039_v49  ;;  %v3492_v49 = vld [vmem:[%s5101_s5 + $0x14] ss:$8 sps:$4 sm:$0xff]  }
 0x279   :  { %2112 = vmatprep.subr.bf16.mxu0 %v3492_v49 }
 0x27a   :  { %v1185_v53 = vmax.bf16 %v3527_v1, %v1153_v52  ;;  %2113 = vmatpush1.bf16.msra.mxu0 %v3490_v48 }
 0x27b   :  { %v1046_v54 = vpop.f32.mrb[84].mxu1 }
 0x27c   :  { %v1048_v55 = vpop.f32.mrb[85].mxu1  ;;  %3294 = vmatprep.mubr.bf16.mxu0 %v1185_v53  ;;  %v1047_v59 = vadd.f32 %v1046_v54, %v4132_v9 }
 0x27d   :  { %v1049_v57 = vpop.f32.mrb[86].mxu1 }
 0x27e   :  { %v1050_v61 = vadd.f32 %v1049_v57, %v4132_v9  ;;  %v1051_v62 = vpop.f32.mrb[87].mxu1 }
 0x280   :  { %v1154_v0 = vpack.c.bf16 %v1050_v61, %v1047_v59 }
 0x282   :  { %v1186_v3 = vmax.bf16 %v3527_v1, %v1154_v0 }
 0x283   :  { %v1054_v4 = vpop.f32.mrb[88].mxu1 }
 0x284   :  { %v1056_v5 = vpop.f32.mrb[89].mxu1  ;;  %3295 = vmatmul.mubr.bf16.gmra.mrb[168].mxu0 %v1186_v3  ;;  %v1055_v7 = vadd.f32 %v1054_v4, %v4132_v9  ;;  %v4271_v4 = vld [vmem:[%s5099_s7 + $0x2] ss:$0 sm:$0xff] }
 0x285   :  { %v1057_v6 = vpop.f32.mrb[90].mxu1 }
 0x286   :  { %v1058_v8 = vadd.f32 %v1057_v6, %v4132_v9  ;;  %v1059_v10 = vpop.f32.mrb[91].mxu1 }
 0x288   :  { %v1155_v11 = vpack.c.bf16 %v1058_v8, %v1055_v7 }
 0x28a   :  { %v1187_v12 = vmax.bf16 %v3527_v1, %v1155_v11 }
 0x28b   :  { %v1062_v13 = vpop.f32.mrb[92].mxu1 }
 0x28c   :  { %v1064_v14 = vpop.f32.mrb[93].mxu1  ;;  %3298 = vmatprep.mubr.bf16.mxu0 %v1187_v12  ;;  %v1063_v16 = vadd.f32 %v1062_v13, %v4132_v9 }
 0x28d   :  { %v1065_v15 = vpop.f32.mrb[94].mxu1 }
 0x28e   :  { %v1066_v17 = vadd.f32 %v1065_v15, %v4132_v9  ;;  %v1067_v18 = vpop.f32.mrb[95].mxu1 }
 0x290   :  { %v1156_v19 = vpack.c.bf16 %v1066_v17, %v1063_v16 }
 0x292   :  { %v1188_v20 = vmax.bf16 %v3527_v1, %v1156_v19 }
 0x293   :  { %v1070_v21 = vpop.f32.mrb[96].mxu1 }
 0x294   :  { %v1072_v22 = vpop.f32.mrb[97].mxu1  ;;  %3299 = vmatmul.mubr.bf16.gmra.mrb[172].mxu0 %v1188_v20  ;;  %v1071_v24 = vadd.f32 %v1070_v21, %v4132_v9  ;;  %v3493_v20 = vld [vmem:[%s5101_s5 + $0x20] ss:$8 sps:$4 sm:$0xff]   ;;  %v3495_v21 = vld [vmem:[%s5101_s5 + $0x24] ss:$8 sps:$4 sm:$0xff]  }
 0x295   :  { %v1073_v23 = vpop.f32.mrb[98].mxu1  ;;  %2114 = vmatprep.subr.bf16.mxu0 %v3495_v21 }
 0x296   :  { %v1074_v25 = vadd.f32 %v1073_v23, %v4132_v9  ;;  %v1075_v26 = vpop.f32.mrb[99].mxu1  ;;  %2115 = vmatpush1.bf16.msra.mxu0 %v3493_v20 }
 0x298   :  { %v1157_v27 = vpack.c.bf16 %v1074_v25, %v1071_v24 }
 0x29a   :  { %v1189_v28 = vmax.bf16 %v3527_v1, %v1157_v27 }
 0x29b   :  { %v1078_v29 = vpop.f32.mrb[100].mxu1 }
 0x29c   :  { %v1080_v30 = vpop.f32.mrb[101].mxu1  ;;  %3302 = vmatprep.mubr.bf16.mxu0 %v1189_v28  ;;  %v1079_v32 = vadd.f32 %v1078_v29, %v4132_v9 }
 0x29d   :  { %v1081_v31 = vpop.f32.mrb[102].mxu1 }
 0x29e   :  { %v1082_v33 = vadd.f32 %v1081_v31, %v4132_v9  ;;  %v1083_v34 = vpop.f32.mrb[103].mxu1 }
 0x2a0   :  { %v1158_v37 = vpack.c.bf16 %v1082_v33, %v1079_v32 }
 0x2a2   :  { %v1190_v38 = vmax.bf16 %v3527_v1, %v1158_v37 }
 0x2a3   :  { %v1086_v63 = vpop.f32.mrb[104].mxu1 }
 0x2a4   :  { %v1088_v39 = vpop.f32.mrb[105].mxu1  ;;  %3303 = vmatmul.mubr.bf16.gmra.mrb[176].mxu0 %v1190_v38  ;;  %v1087_v41 = vadd.f32 %v1086_v63, %v4132_v9 }
 0x2a5   :  { %v1089_v40 = vpop.f32.mrb[106].mxu1 }
 0x2a6   :  { %v1090_v2 = vadd.f32 %v1089_v40, %v4132_v9  ;;  %v1091_v42 = vpop.f32.mrb[107].mxu1 }
 0x2a8   :  { %v1159_v43 = vpack.c.bf16 %v1090_v2, %v1087_v41 }
 0x2aa   :  { %v1191_v44 = vmax.bf16 %v3527_v1, %v1159_v43 }
 0x2ab   :  { %v1094_v45 = vpop.f32.mrb[108].mxu1 }
 0x2ac   :  { %v1096_v46 = vpop.f32.mrb[109].mxu1  ;;  %3306 = vmatprep.mubr.bf16.mxu0 %v1191_v44  ;;  %v1095_v50 = vadd.f32 %v1094_v45, %v4132_v9 }
 0x2ad   :  { %v1097_v47 = vpop.f32.mrb[110].mxu1  ;;  %v3496_v46 = vld [vmem:[%s5101_s5 + $0x30] ss:$8 sps:$4 sm:$0xff]  }
 0x2ae   :  { %v1098_v51 = vadd.f32 %v1097_v47, %v4132_v9  ;;  %v1099_v52 = vpop.f32.mrb[111].mxu1  ;;  %v3498_v47 = vld [vmem:[%s5101_s5 + $0x34] ss:$8 sps:$4 sm:$0xff]  }
 0x2af   :  { %2116 = vmatprep.subr.bf16.mxu0 %v3498_v47 }
 0x2b0   :  { %v1160_v53 = vpack.c.bf16 %v1098_v51, %v1095_v50  ;;  %2117 = vmatpush1.bf16.msra.mxu0 %v3496_v46 }
 0x2b2   :  { %v1192_v54 = vmax.bf16 %v3527_v1, %v1160_v53 }
 0x2b3   :  { %v1102_v55 = vpop.f32.mrb[112].mxu1 }
 0x2b4   :  { %v1104_v57 = vpop.f32.mrb[113].mxu1  ;;  %3307 = vmatmul.mubr.bf16.gmra.mrb[180].mxu0 %v1192_v54  ;;  %v1103_v61 = vadd.f32 %v1102_v55, %v4132_v9 }
 0x2b5   :  { %v1105_v59 = vpop.f32.mrb[114].mxu1 }
 0x2b6   :  { %v1106_v62 = vadd.f32 %v1105_v59, %v4132_v9  ;;  %v1107_v0 = vpop.f32.mrb[115].mxu1 }
 0x2b7   :  { %v3256_v3 = vpop.f32.mrb[128].mxu0 }
 0x2b8   :  { %v1161_v5 = vpack.c.bf16 %v1106_v62, %v1103_v61  ;;  %v1296_v6 = vpop.f32.mrb[129].mxu0  ;;  %v1305_v8 = vadd.f32 %v3256_v3, %v4271_v4 }
 0x2b9   :  { %v3257_v7 = vpop.f32.mrb[130].mxu0  ;;  %v1297_v13 = vadd.f32 %v1296_v6, %v4271_v4  ;;  %v3501_v6 = vld [vmem:[%s5101_s5 + $0x44] ss:$8 sps:$4 sm:$0xff]  }
 0x2ba   :  { %v1308_v10 = vadd.f32 %v3257_v7, %v4271_v4  ;;  %v1299_v11 = vpop.f32.mrb[131].mxu0  ;;  %v1193_v12 = vmax.bf16 %v3527_v1, %v1161_v5  ;;  %v3499_v5 = vld [vmem:[%s5101_s5 + $0x40] ss:$8 sps:$4 sm:$0xff]   ;;  %2118 = vmatprep.subr.bf16.mxu0 %v3501_v6 }
 0x2bb   :  { %v1300_v14 = vadd.f32 %v1299_v11, %v4271_v4  ;;  %v1110_v15 = vpop.f32.mrb[116].mxu1  ;;  %2119 = vmatpush1.bf16.msra.mxu0 %v3499_v5 }
 0x2bc   :  { %v1552_v16 = vpack.c.bf16 %v1308_v10, %v1305_v8  ;;  %v1112_v17 = vpop.f32.mrb[117].mxu1  ;;  %3310 = vmatprep.mubr.bf16.mxu0 %v1193_v12  ;;  %v1111_v22 = vadd.f32 %v1110_v15, %v4132_v9 }
 0x2bd   :  { %v1551_v18 = vpack.c.bf16 %v1300_v14, %v1297_v13  ;;  %v1113_v19 = vpop.f32.mrb[118].mxu1 }
 0x2be   :  { %v1114_v23 = vadd.f32 %v1113_v19, %v4132_v9  ;;  %v1115_v24 = vpop.f32.mrb[119].mxu1  ;;  %v3504_v19 = vld [vmem:[%s5101_s5 + $0x54] ss:$8 sps:$4 sm:$0xff]  }
 0x2bf   :  { %3334 = vmatprep.mubr.bf16.mxu1 %v1551_v18  ;;  %v3502_v18 = vld [vmem:[%s5101_s5 + $0x50] ss:$8 sps:$4 sm:$0xff]   ;;  %2120 = vmatprep.subr.bf16.mxu0 %v3504_v19 }
 0x2c0   :  { %v1162_v25 = vpack.c.bf16 %v1114_v23, %v1111_v22  ;;  %3335 = vmatmul.mubr.bf16.vlgmr.msra.gmra.mrb[128].mxu1 %v1552_v16  ;;  %2121 = vmatpush1.bf16.msra.mxu0 %v3502_v18 }
 0x2c2   :  { %v1194_v26 = vmax.bf16 %v3527_v1, %v1162_v25 }
 0x2c3   :  { %v1118_v27 = vpop.f32.mrb[120].mxu1 }
 0x2c4   :  { %v1120_v28 = vpop.f32.mrb[121].mxu1  ;;  %3311 = vmatmul.mubr.bf16.gmra.mrb[184].mxu0 %v1194_v26  ;;  %v1119_v30 = vadd.f32 %v1118_v27, %v4132_v9 }
 0x2c5   :  { %v1121_v29 = vpop.f32.mrb[122].mxu1 }
 0x2c6   :  { %v1122_v31 = vadd.f32 %v1121_v29, %v4132_v9  ;;  %v1123_v32 = vpop.f32.mrb[123].mxu1 }
 0x2c7   :  { %v3260_v33 = vpop.f32.mrb[132].mxu0 }
 0x2c8   :  { %v1163_v34 = vpack.c.bf16 %v1122_v31, %v1119_v30  ;;  %v1312_v35 = vpop.f32.mrb[133].mxu0  ;;  %v1321_v37 = vadd.f32 %v3260_v33, %v4271_v4  ;;  %v3505_v30 = vld [vmem:[%s5101_s5 + $0x60] ss:$8 sps:$4 sm:$0xff]   ;;  %v3507_v31 = vld [vmem:[%s5101_s5 + $0x64] ss:$8 sps:$4 sm:$0xff]  }
 0x2c9   :  { %v3261_v36 = vpop.f32.mrb[134].mxu0  ;;  %v1313_v40 = vadd.f32 %v1312_v35, %v4271_v4  ;;  %2122 = vmatprep.subr.bf16.mxu0 %v3507_v31 }
 0x2ca   :  { %v1324_v38 = vadd.f32 %v3261_v36, %v4271_v4  ;;  %v1315_v63 = vpop.f32.mrb[135].mxu0  ;;  %v1195_v39 = vmax.bf16 %v3527_v1, %v1163_v34  ;;  %2123 = vmatpush1.bf16.msra.mxu0 %v3505_v30 }
 0x2cb   :  { %v1316_v41 = vadd.f32 %v1315_v63, %v4271_v4  ;;  %v1126_v2 = vpop.f32.mrb[124].mxu1 }
 0x2cc   :  { %v1554_v42 = vpack.c.bf16 %v1324_v38, %v1321_v37  ;;  %v1128_v43 = vpop.f32.mrb[125].mxu1  ;;  %3314 = vmatprep.mubr.bf16.mxu0 %v1195_v39  ;;  %v1127_v48 = vadd.f32 %v1126_v2, %v4132_v9  ;;  %v3510_v2 = vld [vmem:[%s5101_s5 + $0x74] ss:$8 sps:$4 sm:$0xff]  }
 0x2cd   :  { %v1553_v44 = vpack.c.bf16 %v1316_v41, %v1313_v40  ;;  %v1129_v45 = vpop.f32.mrb[126].mxu1  ;;  %v3508_v41 = vld [vmem:[%s5101_s5 + $0x70] ss:$8 sps:$4 sm:$0xff]   ;;  %2124 = vmatprep.subr.bf16.mxu0 %v3510_v2 }
 0x2ce   :  { %v1130_v49 = vadd.f32 %v1129_v45, %v4132_v9  ;;  %v1131_v50 = vpop.f32.mrb[127].mxu1  ;;  %2125 = vmatpush1.bf16.msra.mxu0 %v3508_v41 }
 0x2cf   :  { %3338 = vmatprep.mubr.bf16.mxu1 %v1553_v44  ;;  %2720 = vmatprep.subr.bf16.mxu0 %v3527_v1 }
 0x2d0   :  { %v1164_v51 = vpack.c.bf16 %v1130_v49, %v1127_v48  ;;  %3339 = vmatmul.mubr.bf16.gmra.mrb[132].mxu1 %v1554_v42 }
 0x2d2   :  { %v1196_v52 = vmax.bf16 %v3527_v1, %v1164_v51 }
 0x2d4   :  { %3315 = vmatmul.mubr.bf16.gmra.mrb[188].mxu0 %v1196_v52 }
 0x2d5   :  { %2142 = vmatprep.mubr.bf16.mxu0 %v3527_v1 }
 0x2d7   :  { %v3264_v53 = vpop.f32.mrb[136].mxu0 }
 0x2d8   :  { %v1328_v54 = vpop.f32.mrb[137].mxu0  ;;  %v1337_v57 = vadd.f32 %v3264_v53, %v4271_v4 }
 0x2d9   :  { %v3265_v55 = vpop.f32.mrb[138].mxu0  ;;  %v1329_v9 = vadd.f32 %v1328_v54, %v4271_v4 }
 0x2da   :  { %v1340_v59 = vadd.f32 %v3265_v55, %v4271_v4  ;;  %v1331_v61 = vpop.f32.mrb[139].mxu0 }
 0x2db   :  { %v1332_v62 = vadd.f32 %v1331_v61, %v4271_v4 }
 0x2dc   :  { %v1556_v0 = vpack.c.bf16 %v1340_v59, %v1337_v57 }
 0x2dd   :  { %v1555_v3 = vpack.c.bf16 %v1332_v62, %v1329_v9 }
 0x2df   :  { %3342 = vmatprep.mubr.bf16.mxu1 %v1555_v3 }
 0x2e0   :  { %3343 = vmatmul.mubr.bf16.gmra.mrb[136].mxu1 %v1556_v0 }
 0x2e7   :  { %v3268_v7 = vpop.f32.mrb[140].mxu0 }
 0x2e8   :  { %v1344_v8 = vpop.f32.mrb[141].mxu0  ;;  %v1353_v11 = vadd.f32 %v3268_v7, %v4271_v4 }
 0x2e9   :  { %v3269_v10 = vpop.f32.mrb[142].mxu0  ;;  %v1345_v14 = vadd.f32 %v1344_v8, %v4271_v4 }
 0x2ea   :  { %v1356_v12 = vadd.f32 %v3269_v10, %v4271_v4  ;;  %v1347_v13 = vpop.f32.mrb[143].mxu0 }
 0x2eb   :  { %v1348_v15 = vadd.f32 %v1347_v13, %v4271_v4 }
 0x2ec   :  { %v1558_v16 = vpack.c.bf16 %v1356_v12, %v1353_v11 }
 0x2ed   :  { %v1557_v17 = vpack.c.bf16 %v1348_v15, %v1345_v14 }
 0x2ef   :  { %3346 = vmatprep.mubr.bf16.mxu1 %v1557_v17 }
 0x2f0   :  { %3347 = vmatmul.mubr.bf16.gmra.mrb[140].mxu1 %v1558_v16 }
 0x2f7   :  { %v3272_v20 = vpop.f32.mrb[144].mxu0 }
 0x2f8   :  { %v1360_v21 = vpop.f32.mrb[145].mxu0  ;;  %v1369_v23 = vadd.f32 %v3272_v20, %v4271_v4 }
 0x2f9   :  { %v3273_v22 = vpop.f32.mrb[146].mxu0  ;;  %v1361_v26 = vadd.f32 %v1360_v21, %v4271_v4 }
 0x2fa   :  { %v1372_v24 = vadd.f32 %v3273_v22, %v4271_v4  ;;  %v1363_v25 = vpop.f32.mrb[147].mxu0 }
 0x2fb   :  { %v1364_v27 = vadd.f32 %v1363_v25, %v4271_v4 }
 0x2fc   :  { %v1560_v28 = vpack.c.bf16 %v1372_v24, %v1369_v23 }
 0x2fd   :  { %v1559_v29 = vpack.c.bf16 %v1364_v27, %v1361_v26 }
 0x2ff   :  { %3350 = vmatprep.mubr.bf16.mxu1 %v1559_v29 }
 0x300   :  { %3351 = vmatmul.mubr.bf16.gmra.mrb[144].mxu1 %v1560_v28 }
 0x307   :  { %v3276_v32 = vpop.f32.mrb[148].mxu0 }
 0x308   :  { %v1376_v33 = vpop.f32.mrb[149].mxu0  ;;  %v1385_v35 = vadd.f32 %v3276_v32, %v4271_v4 }
 0x309   :  { %v3277_v34 = vpop.f32.mrb[150].mxu0  ;;  %v1377_v38 = vadd.f32 %v1376_v33, %v4271_v4 }
 0x30a   :  { %v1388_v36 = vadd.f32 %v3277_v34, %v4271_v4  ;;  %v1379_v37 = vpop.f32.mrb[151].mxu0 }
 0x30b   :  { %v1380_v63 = vadd.f32 %v1379_v37, %v4271_v4 }
 0x30c   :  { %v1562_v39 = vpack.c.bf16 %v1388_v36, %v1385_v35 }
 0x30d   :  { %v1561_v40 = vpack.c.bf16 %v1380_v63, %v1377_v38 }
 0x30f   :  { %3354 = vmatprep.mubr.bf16.mxu1 %v1561_v40 }
 0x310   :  { %3355 = vmatmul.mubr.bf16.gmra.mrb[148].mxu1 %v1562_v39 }
 0x317   :  { %v3280_v42 = vpop.f32.mrb[152].mxu0 }
 0x318   :  { %v1392_v43 = vpop.f32.mrb[153].mxu0  ;;  %v1401_v45 = vadd.f32 %v3280_v42, %v4271_v4 }
 0x319   :  { %v3281_v44 = vpop.f32.mrb[154].mxu0  ;;  %v1393_v48 = vadd.f32 %v1392_v43, %v4271_v4 }
 0x31a   :  { %v1404_v46 = vadd.f32 %v3281_v44, %v4271_v4  ;;  %v1395_v47 = vpop.f32.mrb[155].mxu0 }
 0x31b   :  { %v1396_v49 = vadd.f32 %v1395_v47, %v4271_v4 }
 0x31c   :  { %v1564_v50 = vpack.c.bf16 %v1404_v46, %v1401_v45 }
 0x31d   :  { %v1563_v51 = vpack.c.bf16 %v1396_v49, %v1393_v48 }
 0x31f   :  { %3358 = vmatprep.mubr.bf16.mxu1 %v1563_v51 }
 0x320   :  { %3359 = vmatmul.mubr.bf16.gmra.mrb[152].mxu1 %v1564_v50 }
 0x327   :  { %v3284_v52 = vpop.f32.mrb[156].mxu0 }
 0x328   :  { %v1408_v53 = vpop.f32.mrb[157].mxu0  ;;  %v1417_v55 = vadd.f32 %v3284_v52, %v4271_v4 }
 0x329   :  { %v3285_v54 = vpop.f32.mrb[158].mxu0  ;;  %v1409_v61 = vadd.f32 %v1408_v53, %v4271_v4 }
 0x32a   :  { %v1420_v57 = vadd.f32 %v3285_v54, %v4271_v4  ;;  %v1411_v59 = vpop.f32.mrb[159].mxu0 }
 0x32b   :  { %v1412_v9 = vadd.f32 %v1411_v59, %v4271_v4 }
 0x32c   :  { %v1566_v62 = vpack.c.bf16 %v1420_v57, %v1417_v55 }
 0x32d   :  { %v1565_v0 = vpack.c.bf16 %v1412_v9, %v1409_v61  ;;  %v3511_v9 = vld [vmem:[%s5102_s6] sm:$0xff]  }
 0x32e   :  { %3414 = vmatpush1.bf16.msra.mxu1 %v3511_v9 }
 0x32f   :  { %3362 = vmatprep.mubr.bf16.mxu1 %v1565_v0  ;;  %3399 = vmatprep.subr.bf16.mxu1 %v3527_v1 }
 0x330   :  { %3363 = vmatmul.mubr.bf16.gmra.mrb[156].mxu1 %v1566_v62 }
 0x337   :  { %v3288_v3 = vpop.f32.mrb[160].mxu0 }
 0x338   :  { %v1424_v5 = vpop.f32.mrb[161].mxu0  ;;  %v1433_v7 = vadd.f32 %v3288_v3, %v4271_v4 }
 0x339   :  { %v3289_v6 = vpop.f32.mrb[162].mxu0  ;;  %v1425_v11 = vadd.f32 %v1424_v5, %v4271_v4 }
 0x33a   :  { %v1436_v8 = vadd.f32 %v3289_v6, %v4271_v4  ;;  %v1427_v10 = vpop.f32.mrb[163].mxu0  ;;  %v4384_v6 = vld [vmem:[%s5099_s7 + $0x3] ss:$0 sm:$0xff] }
 0x33b   :  { %v1428_v12 = vadd.f32 %v1427_v10, %v4271_v4  ;;  %v3512_v10 = vld [vmem:[%s5102_s6 + $0x8] sm:$0xff]  }
 0x33c   :  { %v1568_v13 = vpack.c.bf16 %v1436_v8, %v1433_v7  ;;  %3415 = vmatpush1.bf16.msra.mxu1 %v3512_v10 }
 0x33d   :  { %v1567_v14 = vpack.c.bf16 %v1428_v12, %v1425_v11  ;;  %3400 = vmatprep.subr.bf16.mxu1 %v3527_v1 }
 0x33f   :  { %3366 = vmatprep.mubr.bf16.mxu1 %v1567_v14 }
 0x340   :  { %3367 = vmatmul.mubr.bf16.gmra.mrb[160].mxu1 %v1568_v13 }
 0x347   :  { %v3292_v15 = vpop.f32.mrb[164].mxu0 }
 0x348   :  { %v1440_v16 = vpop.f32.mrb[165].mxu0  ;;  %v1449_v18 = vadd.f32 %v3292_v15, %v4271_v4 }
 0x349   :  { %v3293_v17 = vpop.f32.mrb[166].mxu0  ;;  %v1441_v21 = vadd.f32 %v1440_v16, %v4271_v4 }
 0x34a   :  { %v1452_v19 = vadd.f32 %v3293_v17, %v4271_v4  ;;  %v1443_v20 = vpop.f32.mrb[167].mxu0 }
 0x34b   :  { %v1444_v22 = vadd.f32 %v1443_v20, %v4271_v4 }
 0x34c   :  { %v1570_v23 = vpack.c.bf16 %v1452_v19, %v1449_v18 }
 0x34d   :  { %v1569_v24 = vpack.c.bf16 %v1444_v22, %v1441_v21 }
 0x34f   :  { %3370 = vmatprep.mubr.bf16.mxu1 %v1569_v24 }
 0x350   :  { %3371 = vmatmul.mubr.bf16.gmra.mrb[164].mxu1 %v1570_v23 }
 0x357   :  { %v3296_v25 = vpop.f32.mrb[168].mxu0 }
 0x358   :  { %v1456_v26 = vpop.f32.mrb[169].mxu0  ;;  %v1465_v28 = vadd.f32 %v3296_v25, %v4271_v4 }
 0x359   :  { %v3297_v27 = vpop.f32.mrb[170].mxu0  ;;  %v1457_v31 = vadd.f32 %v1456_v26, %v4271_v4 }
 0x35a   :  { %v1468_v29 = vadd.f32 %v3297_v27, %v4271_v4  ;;  %v1459_v30 = vpop.f32.mrb[171].mxu0 }
 0x35b   :  { %v1460_v32 = vadd.f32 %v1459_v30, %v4271_v4 }
 0x35c   :  { %v1572_v33 = vpack.c.bf16 %v1468_v29, %v1465_v28  ;;  %v3513_v28 = vld [vmem:[%s5102_s6 + $0x10] sm:$0xff]  }
 0x35d   :  { %v1571_v34 = vpack.c.bf16 %v1460_v32, %v1457_v31  ;;  %3416 = vmatpush1.bf16.msra.mxu1 %v3513_v28 }
 0x35e   :  { %3401 = vmatprep.subr.bf16.mxu1 %v3527_v1 }
 0x35f   :  { %3374 = vmatprep.mubr.bf16.mxu1 %v1571_v34  ;;  %v3514_v34 = vld [vmem:[%s5102_s6 + $0x18] sm:$0xff]  }
 0x360   :  { %3375 = vmatmul.mubr.bf16.gmra.mrb[168].mxu1 %v1572_v33 }
 0x361   :  { %3417 = vmatpush1.bf16.msra.mxu1 %v3514_v34 }
 0x362   :  { %3402 = vmatprep.subr.bf16.mxu1 %v3527_v1 }
 0x367   :  { %v3300_v35 = vpop.f32.mrb[172].mxu0 }
 0x368   :  { %v1472_v36 = vpop.f32.mrb[173].mxu0  ;;  %v1481_v38 = vadd.f32 %v3300_v35, %v4271_v4 }
 0x369   :  { %v3301_v37 = vpop.f32.mrb[174].mxu0  ;;  %v1473_v40 = vadd.f32 %v1472_v36, %v4271_v4 }
 0x36a   :  { %v1484_v63 = vadd.f32 %v3301_v37, %v4271_v4  ;;  %v1475_v39 = vpop.f32.mrb[175].mxu0 }
 0x36b   :  { %v1476_v41 = vadd.f32 %v1475_v39, %v4271_v4 }
 0x36c   :  { %v1574_v2 = vpack.c.bf16 %v1484_v63, %v1481_v38 }
 0x36d   :  { %v1573_v42 = vpack.c.bf16 %v1476_v41, %v1473_v40 }
 0x36f   :  { %3378 = vmatprep.mubr.bf16.mxu1 %v1573_v42 }
 0x370   :  { %3379 = vmatmul.mubr.bf16.gmra.mrb[172].mxu1 %v1574_v2 }
 0x377   :  { %v3304_v43 = vpop.f32.mrb[176].mxu0 }
 0x378   :  { %v1488_v44 = vpop.f32.mrb[177].mxu0  ;;  %v1497_v46 = vadd.f32 %v3304_v43, %v4271_v4 }
 0x379   :  { %v3305_v45 = vpop.f32.mrb[178].mxu0  ;;  %v1489_v49 = vadd.f32 %v1488_v44, %v4271_v4 }
 0x37a   :  { %v1500_v47 = vadd.f32 %v3305_v45, %v4271_v4  ;;  %v1491_v48 = vpop.f32.mrb[179].mxu0 }
 0x37b   :  { %v1492_v50 = vadd.f32 %v1491_v48, %v4271_v4 }
 0x37c   :  { %v1576_v51 = vpack.c.bf16 %v1500_v47, %v1497_v46 }
 0x37d   :  { %v1575_v52 = vpack.c.bf16 %v1492_v50, %v1489_v49  ;;  %v3515_v50 = vld [vmem:[%s5102_s6 + $0x20] sm:$0xff]  }
 0x37e   :  { %3418 = vmatpush1.bf16.msra.mxu1 %v3515_v50 }
 0x37f   :  { %3382 = vmatprep.mubr.bf16.mxu1 %v1575_v52  ;;  %3403 = vmatprep.subr.bf16.mxu1 %v3527_v1 }
 0x380   :  { %3383 = vmatmul.mubr.bf16.gmra.mrb[176].mxu1 %v1576_v51 }
 0x387   :  { %v3308_v53 = vpop.f32.mrb[180].mxu0 }
 0x388   :  { %v1504_v54 = vpop.f32.mrb[181].mxu0  ;;  %v1513_v57 = vadd.f32 %v3308_v53, %v4271_v4 }
 0x389   :  { %v3309_v55 = vpop.f32.mrb[182].mxu0  ;;  %v1505_v62 = vadd.f32 %v1504_v54, %v4271_v4 }
 0x38a   :  { %v1516_v59 = vadd.f32 %v3309_v55, %v4271_v4  ;;  %v1507_v61 = vpop.f32.mrb[183].mxu0  ;;  %v3516_v55 = vld [vmem:[%s5102_s6 + $0x28] sm:$0xff]  }
 0x38b   :  { %v1508_v0 = vadd.f32 %v1507_v61, %v4271_v4  ;;  %3419 = vmatpush1.bf16.msra.mxu1 %v3516_v55 }
 0x38c   :  { %v1578_v3 = vpack.c.bf16 %v1516_v59, %v1513_v57  ;;  %3404 = vmatprep.subr.bf16.mxu1 %v3527_v1 }
 0x38d   :  { %v1577_v5 = vpack.c.bf16 %v1508_v0, %v1505_v62 }
 0x38f   :  { %3386 = vmatprep.mubr.bf16.mxu1 %v1577_v5 }
 0x390   :  { %3387 = vmatmul.mubr.bf16.gmra.mrb[180].mxu1 %v1578_v3 }
 0x393   :  { %v3336_v7 = vpop.f32.mrb[128].mxu1 }
 0x394   :  { %v1682_v8 = vpop.f32.mrb[129].mxu1  ;;  %v1691_v12 = vadd.f32 %v3336_v7, %v4384_v6 }
 0x395   :  { %v3337_v11 = vpop.f32.mrb[130].mxu1  ;;  %v1683_v15 = vadd.f32 %v1682_v8, %v4384_v6  ;;  %v3517_v8 = vld [vmem:[%s5102_s6 + $0x30] sm:$0xff]  }
 0x396   :  { %v1694_v13 = vadd.f32 %v3337_v11, %v4384_v6  ;;  %v1685_v14 = vpop.f32.mrb[131].mxu1  ;;  %3420 = vmatpush1.bf16.msra.mxu1 %v3517_v8 }
 0x397   :  { %v1686_v16 = vadd.f32 %v1685_v14, %v4384_v6  ;;  %v3312_v17 = vpop.f32.mrb[184].mxu0  ;;  %3405 = vmatprep.subr.bf16.mxu1 %v3527_v1 }
 0x398   :  { %v1938_v18 = vpack.c.bf16 %v1694_v13, %v1691_v12  ;;  %v1520_v19 = vpop.f32.mrb[185].mxu0  ;;  %v1529_v22 = vadd.f32 %v3312_v17, %v4271_v4  ;;  %v3518_v13 = vld [vmem:[%s5102_s6 + $0x38] sm:$0xff]  }
 0x399   :  { %v1937_v20 = vpack.c.bf16 %v1686_v16, %v1683_v15  ;;  %v3313_v21 = vpop.f32.mrb[186].mxu0  ;;  %v1521_v26 = vadd.f32 %v1520_v19, %v4271_v4 }
 0x39a   :  { %v1532_v23 = vadd.f32 %v3313_v21, %v4271_v4  ;;  %v1523_v24 = vpop.f32.mrb[187].mxu0  ;;  %v1970_v32 = vmax.bf16 %v3527_v1, %v1938_v18  ;;  %3421 = vmatpush1.bf16.msra.mxu1 %v3518_v13 }
 0x39b   :  { %v1969_v25 = vmax.bf16 %v3527_v1, %v1937_v20  ;;  %v1524_v27 = vadd.f32 %v1523_v24, %v4271_v4  ;;  %3406 = vmatprep.subr.bf16.mxu1 %v3527_v1 }
 0x39c   :  { %v1580_v29 = vpack.c.bf16 %v1532_v23, %v1529_v22  ;;  %v3519_v23 = vld [vmem:[%s5102_s6 + $0x40] sm:$0xff]  }
 0x39d   :  { %v1579_v30 = vpack.c.bf16 %v1524_v27, %v1521_v26  ;;  %2143 = vmatmul.mubr.bf16.vlgmr.msra.gmra.mrb[192].mxu0 %v1969_v25  ;;  %v3520_v27 = vld [vmem:[%s5102_s6 + $0x48] sm:$0xff]  }
 0x39e   :  { %2152 = vmatprep.mubr.bf16.mxu0 %v3527_v1  ;;  %2721 = vmatpush1.bf16.msra.mxu0 %v3511_v9 }
 0x39f   :  { %3390 = vmatprep.mubr.bf16.mxu1 %v1579_v30  ;;  %2722 = vmatprep.subr.bf16.mxu0 %v3527_v1 }
 0x3a0   :  { %3391 = vmatmul.mubr.bf16.gmra.mrb[184].mxu1 %v1580_v29 }
 0x3a1   :  { %3422 = vmatpush1.bf16.msra.mxu1 %v3519_v23 }
 0x3a2   :  { %2723 = vmatpush1.bf16.msra.mxu0 %v3512_v10  ;;  %3407 = vmatprep.subr.bf16.mxu1 %v3527_v1 }
 0x3a3   :  { %v3340_v31 = vpop.f32.mrb[132].mxu1  ;;  %2724 = vmatprep.subr.bf16.mxu0 %v3527_v1 }
 0x3a4   :  { %v1698_v33 = vpop.f32.mrb[133].mxu1  ;;  %v1707_v36 = vadd.f32 %v3340_v31, %v4384_v6 }
 0x3a5   :  { %v3341_v35 = vpop.f32.mrb[134].mxu1  ;;  %2153 = vmatmul.mubr.bf16.gmra.mrb[196].mxu0 %v1970_v32  ;;  %v1699_v63 = vadd.f32 %v1698_v33, %v4384_v6  ;;  %3423 = vmatpush1.bf16.msra.mxu1 %v3520_v27 }
 0x3a6   :  { %v1710_v37 = vadd.f32 %v3341_v35, %v4384_v6  ;;  %v1701_v38 = vpop.f32.mrb[135].mxu1  ;;  %2162 = vmatprep.mubr.bf16.mxu0 %v3527_v1  ;;  %2725 = vmatpush1.bf16.msra.mxu0 %v3513_v28 }
 0x3a7   :  { %v1702_v39 = vadd.f32 %v1701_v38, %v4384_v6  ;;  %v3316_v40 = vpop.f32.mrb[188].mxu0  ;;  %2726 = vmatprep.subr.bf16.mxu0 %v3527_v1  ;;  %3408 = vmatprep.subr.bf16.mxu1 %v3527_v1 }
 0x3a8   :  { %v1940_v41 = vpack.c.bf16 %v1710_v37, %v1707_v36  ;;  %v1536_v2 = vpop.f32.mrb[189].mxu0  ;;  %v1545_v44 = vadd.f32 %v3316_v40, %v4271_v4  ;;  %v3521_v37 = vld [vmem:[%s5102_s6 + $0x50] sm:$0xff]   ;;  %v3522_v40 = vld [vmem:[%s5102_s6 + $0x58] sm:$0xff]  }
 0x3a9   :  { %v1939_v42 = vpack.c.bf16 %v1702_v39, %v1699_v63  ;;  %v3317_v43 = vpop.f32.mrb[190].mxu0  ;;  %v1537_v47 = vadd.f32 %v1536_v2, %v4271_v4  ;;  %3424 = vmatpush1.bf16.msra.mxu1 %v3521_v37 }
 0x3aa   :  { %v1548_v45 = vadd.f32 %v3317_v43, %v4271_v4  ;;  %v1539_v46 = vpop.f32.mrb[191].mxu0  ;;  %2727 = vmatpush1.bf16.msra.mxu0 %v3514_v34  ;;  %v1972_v53 = vmax.bf16 %v3527_v1, %v1940_v41  ;;  %3409 = vmatprep.subr.bf16.mxu1 %v3527_v1 }
 0x3ab   :  { %v1540_v48 = vadd.f32 %v1539_v46, %v4271_v4  ;;  %v1971_v49 = vmax.bf16 %v3527_v1, %v1939_v42  ;;  %2728 = vmatprep.subr.bf16.mxu0 %v3527_v1 }
 0x3ac   :  { %v1582_v51 = vpack.c.bf16 %v1548_v45, %v1545_v44 }
 0x3ad   :  { %v1581_v52 = vpack.c.bf16 %v1540_v48, %v1537_v47  ;;  %2163 = vmatmul.mubr.bf16.gmra.mrb[200].mxu0 %v1971_v49  ;;  %3425 = vmatpush1.bf16.msra.mxu1 %v3522_v40  ;;  %v3523_v49 = vld [vmem:[%s5102_s6 + $0x60] sm:$0xff]  }
 0x3ae   :  { %2172 = vmatprep.mubr.bf16.mxu0 %v3527_v1  ;;  %2729 = vmatpush1.bf16.msra.mxu0 %v3515_v50 }
 0x3af   :  { %3394 = vmatprep.mubr.bf16.mxu1 %v1581_v52  ;;  %2730 = vmatprep.subr.bf16.mxu0 %v3527_v1 }
 0x3b0   :  { %3395 = vmatmul.mubr.bf16.gmra.mrb[188].mxu1 %v1582_v51  ;;  %3410 = vmatprep.subr.bf16.mxu1 %v3527_v1 }
 0x3b1   :  { %3426 = vmatpush1.bf16.msra.mxu1 %v3523_v49 }
 0x3b2   :  { %2731 = vmatpush1.bf16.msra.mxu0 %v3516_v55  ;;  %3411 = vmatprep.subr.bf16.mxu1 %v3527_v1 }
 0x3b3   :  { %v3344_v4 = vpop.f32.mrb[136].mxu1  ;;  %2732 = vmatprep.subr.bf16.mxu0 %v3527_v1 }
 0x3b4   :  { %v1714_v54 = vpop.f32.mrb[137].mxu1  ;;  %v1723_v59 = vadd.f32 %v3344_v4, %v4384_v6 }
 0x3b5   :  { %v3345_v57 = vpop.f32.mrb[138].mxu1  ;;  %2173 = vmatmul.mubr.bf16.gmra.mrb[204].mxu0 %v1972_v53  ;;  %v1715_v62 = vadd.f32 %v1714_v54, %v4384_v6 }
 0x3b6   :  { %v1726_v61 = vadd.f32 %v3345_v57, %v4384_v6  ;;  %v1717_v9 = vpop.f32.mrb[139].mxu1  ;;  %2182 = vmatprep.mubr.bf16.mxu0 %v3527_v1  ;;  %2733 = vmatpush1.bf16.msra.mxu0 %v3517_v8 }
 0x3b7   :  { %v1718_v0 = vadd.f32 %v1717_v9, %v4384_v6  ;;  %2734 = vmatprep.subr.bf16.mxu0 %v3527_v1 }
 0x3b8   :  { %v1942_v3 = vpack.c.bf16 %v1726_v61, %v1723_v59  ;;  %v3524_v61 = vld [vmem:[%s5102_s6 + $0x68] sm:$0xff]  }
 0x3b9   :  { %v1941_v5 = vpack.c.bf16 %v1718_v0, %v1715_v62  ;;  %3427 = vmatpush1.bf16.msra.mxu1 %v3524_v61 }
 0x3ba   :  { %v1974_v11 = vmax.bf16 %v3527_v1, %v1942_v3  ;;  %2735 = vmatpush1.bf16.msra.mxu0 %v3518_v13  ;;  %3412 = vmatprep.subr.bf16.mxu1 %v3527_v1  ;;  %v3525_v3 = vld [vmem:[%s5102_s6 + $0x70] sm:$0xff]  }
 0x3bb   :  { %v1973_v7 = vmax.bf16 %v3527_v1, %v1941_v5  ;;  %2736 = vmatprep.subr.bf16.mxu0 %v3527_v1 }
 0x3bd   :  { %2183 = vmatmul.mubr.bf16.gmra.mrb[208].mxu0 %v1973_v7  ;;  %3428 = vmatpush1.bf16.msra.mxu1 %v3525_v3 }
 0x3be   :  { %2192 = vmatprep.mubr.bf16.mxu0 %v3527_v1  ;;  %2737 = vmatpush1.bf16.msra.mxu0 %v3519_v23 }
 0x3bf   :  { %2738 = vmatprep.subr.bf16.mxu0 %v3527_v1  ;;  %3413 = vmatprep.subr.bf16.mxu1 %v3527_v1 }
 0x3c2   :  { %2739 = vmatpush1.bf16.msra.mxu0 %v3520_v27 }
 0x3c3   :  { %v3348_v10 = vpop.f32.mrb[140].mxu1  ;;  %2740 = vmatprep.subr.bf16.mxu0 %v3527_v1 }
 0x3c4   :  { %v1730_v12 = vpop.f32.mrb[141].mxu1  ;;  %v1739_v15 = vadd.f32 %v3348_v10, %v4384_v6 }
 0x3c5   :  { %v3349_v14 = vpop.f32.mrb[142].mxu1  ;;  %2193 = vmatmul.mubr.bf16.gmra.mrb[212].mxu0 %v1974_v11  ;;  %v1731_v18 = vadd.f32 %v1730_v12, %v4384_v6 }
 0x3c6   :  { %v1742_v16 = vadd.f32 %v3349_v14, %v4384_v6  ;;  %v1733_v17 = vpop.f32.mrb[143].mxu1  ;;  %2202 = vmatprep.mubr.bf16.mxu0 %v3527_v1  ;;  %2741 = vmatpush1.bf16.msra.mxu0 %v3521_v37  ;;  %v3526_v14 = vld [vmem:[%s5102_s6 + $0x78] sm:$0xff]  }
 0x3c7   :  { %v1734_v19 = vadd.f32 %v1733_v17, %v4384_v6  ;;  %2742 = vmatprep.subr.bf16.mxu0 %v3527_v1  ;;  %3429 = vmatpush1.bf16.msra.mxu1 %v3526_v14 }
 0x3c8   :  { %v1944_v20 = vpack.c.bf16 %v1742_v16, %v1739_v15 }
 0x3c9   :  { %v1943_v21 = vpack.c.bf16 %v1734_v19, %v1731_v18 }
 0x3ca   :  { %v1976_v25 = vmax.bf16 %v3527_v1, %v1944_v20  ;;  %2743 = vmatpush1.bf16.msra.mxu0 %v3522_v40 }
 0x3cb   :  { %v1975_v22 = vmax.bf16 %v3527_v1, %v1943_v21  ;;  %2744 = vmatprep.subr.bf16.mxu0 %v3527_v1 }
 0x3cd   :  { %2203 = vmatmul.mubr.bf16.gmra.mrb[216].mxu0 %v1975_v22 }
 0x3ce   :  { %2212 = vmatprep.mubr.bf16.mxu0 %v3527_v1  ;;  %2745 = vmatpush1.bf16.msra.mxu0 %v3523_v49 }
 0x3cf   :  { %2746 = vmatprep.subr.bf16.mxu0 %v3527_v1 }
 0x3d2   :  { %2747 = vmatpush1.bf16.msra.mxu0 %v3524_v61 }
 0x3d3   :  { %v3352_v24 = vpop.f32.mrb[144].mxu1  ;;  %2748 = vmatprep.subr.bf16.mxu0 %v3527_v1 }
 0x3d4   :  { %v1746_v26 = vpop.f32.mrb[145].mxu1  ;;  %v1755_v29 = vadd.f32 %v3352_v24, %v4384_v6 }
 0x3d5   :  { %v3353_v28 = vpop.f32.mrb[146].mxu1  ;;  %2213 = vmatmul.mubr.bf16.gmra.mrb[220].mxu0 %v1976_v25  ;;  %v1747_v32 = vadd.f32 %v1746_v26, %v4384_v6 }
 0x3d6   :  { %v1758_v30 = vadd.f32 %v3353_v28, %v4384_v6  ;;  %v1749_v31 = vpop.f32.mrb[147].mxu1  ;;  %2222 = vmatprep.mubr.bf16.mxu0 %v3527_v1  ;;  %2749 = vmatpush1.bf16.msra.mxu0 %v3525_v3 }
 0x3d7   :  { %v1750_v33 = vadd.f32 %v1749_v31, %v4384_v6  ;;  %2750 = vmatprep.subr.bf16.mxu0 %v3527_v1 }
 0x3d8   :  { %v1946_v34 = vpack.c.bf16 %v1758_v30, %v1755_v29 }
 0x3d9   :  { %v1945_v35 = vpack.c.bf16 %v1750_v33, %v1747_v32 }
 0x3da   :  { %v1978_v63 = vmax.bf16 %v3527_v1, %v1946_v34  ;;  %2751 = vmatpush1.bf16.msra.mxu0 %v3526_v14 }
 0x3db   :  { %v1977_v36 = vmax.bf16 %v3527_v1, %v1945_v35 }
 0x3dd   :  { %2223 = vmatmul.mubr.bf16.gmra.mrb[224].mxu0 %v1977_v36 }
 0x3de   :  { %2232 = vmatprep.mubr.bf16.mxu0 %v3527_v1 }
 0x3e3   :  { %v3356_v38 = vpop.f32.mrb[148].mxu1 }
 0x3e4   :  { %v1762_v39 = vpop.f32.mrb[149].mxu1  ;;  %v1771_v2 = vadd.f32 %v3356_v38, %v4384_v6 }
 0x3e5   :  { %v3357_v41 = vpop.f32.mrb[150].mxu1  ;;  %2233 = vmatmul.mubr.bf16.gmra.mrb[228].mxu0 %v1978_v63  ;;  %v1763_v44 = vadd.f32 %v1762_v39, %v4384_v6 }
 0x3e6   :  { %v1774_v42 = vadd.f32 %v3357_v41, %v4384_v6  ;;  %v1765_v43 = vpop.f32.mrb[151].mxu1  ;;  %2242 = vmatprep.mubr.bf16.mxu0 %v3527_v1 }
 0x3e7   :  { %v1766_v45 = vadd.f32 %v1765_v43, %v4384_v6 }
 0x3e8   :  { %v1948_v46 = vpack.c.bf16 %v1774_v42, %v1771_v2 }
 0x3e9   :  { %v1947_v47 = vpack.c.bf16 %v1766_v45, %v1763_v44 }
 0x3ea   :  { %v1980_v51 = vmax.bf16 %v3527_v1, %v1948_v46 }
 0x3eb   :  { %v1979_v48 = vmax.bf16 %v3527_v1, %v1947_v47 }
 0x3ed   :  { %2243 = vmatmul.mubr.bf16.gmra.mrb[232].mxu0 %v1979_v48 }
 0x3ee   :  { %2252 = vmatprep.mubr.bf16.mxu0 %v3527_v1 }
 0x3f3   :  { %v3360_v50 = vpop.f32.mrb[152].mxu1 }
 0x3f4   :  { %v1778_v52 = vpop.f32.mrb[153].mxu1  ;;  %v1787_v53 = vadd.f32 %v3360_v50, %v4384_v6 }
 0x3f5   :  { %v3361_v4 = vpop.f32.mrb[154].mxu1  ;;  %2253 = vmatmul.mubr.bf16.gmra.mrb[236].mxu0 %v1980_v51  ;;  %v1779_v57 = vadd.f32 %v1778_v52, %v4384_v6 }
 0x3f6   :  { %v1790_v54 = vadd.f32 %v3361_v4, %v4384_v6  ;;  %v1781_v55 = vpop.f32.mrb[155].mxu1  ;;  %2262 = vmatprep.mubr.bf16.mxu0 %v3527_v1 }
 0x3f7   :  { %v1782_v59 = vadd.f32 %v1781_v55, %v4384_v6 }
 0x3f8   :  { %v1950_v9 = vpack.c.bf16 %v1790_v54, %v1787_v53 }
 0x3f9   :  { %v1949_v62 = vpack.c.bf16 %v1782_v59, %v1779_v57 }
 0x3fa   :  { %v1982_v7 = vmax.bf16 %v3527_v1, %v1950_v9 }
 0x3fb   :  { %v1981_v0 = vmax.bf16 %v3527_v1, %v1949_v62 }
 0x3fd   :  { %2263 = vmatmul.mubr.bf16.gmra.mrb[240].mxu0 %v1981_v0 }
 0x3fe   :  { %2272 = vmatprep.mubr.bf16.mxu0 %v3527_v1 }
 0x403   :  { %v3364_v5 = vpop.f32.mrb[156].mxu1 }
 0x404   :  { %v1794_v8 = vpop.f32.mrb[157].mxu1  ;;  %v1803_v11 = vadd.f32 %v3364_v5, %v4384_v6 }
 0x405   :  { %v3365_v10 = vpop.f32.mrb[158].mxu1  ;;  %2273 = vmatmul.mubr.bf16.gmra.mrb[244].mxu0 %v1982_v7  ;;  %v1795_v15 = vadd.f32 %v1794_v8, %v4384_v6 }
 0x406   :  { %v1806_v12 = vadd.f32 %v3365_v10, %v4384_v6  ;;  %v1797_v13 = vpop.f32.mrb[159].mxu1  ;;  %2282 = vmatprep.mubr.bf16.mxu0 %v3527_v1 }
 0x407   :  { %v1798_v16 = vadd.f32 %v1797_v13, %v4384_v6 }
 0x408   :  { %v1952_v17 = vpack.c.bf16 %v1806_v12, %v1803_v11 }
 0x409   :  { %v1951_v18 = vpack.c.bf16 %v1798_v16, %v1795_v15 }
 0x40a   :  { %v1984_v21 = vmax.bf16 %v3527_v1, %v1952_v17 }
 0x40b   :  { %v1983_v19 = vmax.bf16 %v3527_v1, %v1951_v18 }
 0x40d   :  { %2283 = vmatmul.mubr.bf16.gmra.mrb[248].mxu0 %v1983_v19 }
 0x40e   :  { %2292 = vmatprep.mubr.bf16.mxu0 %v3527_v1 }
 0x413   :  { %v3368_v20 = vpop.f32.mrb[160].mxu1 }
 0x414   :  { %v1810_v22 = vpop.f32.mrb[161].mxu1  ;;  %v1819_v24 = vadd.f32 %v3368_v20, %v4384_v6 }
 0x415   :  { %v3369_v23 = vpop.f32.mrb[162].mxu1  ;;  %2293 = vmatmul.mubr.bf16.gmra.mrb[252].mxu0 %v1984_v21  ;;  %v1811_v27 = vadd.f32 %v1810_v22, %v4384_v6 }
 0x416   :  { %v1822_v25 = vadd.f32 %v3369_v23, %v4384_v6  ;;  %v1813_v26 = vpop.f32.mrb[163].mxu1  ;;  %2302 = vmatprep.mubr.bf16.mxu0 %v3527_v1 }
 0x417   :  { %v1814_v28 = vadd.f32 %v1813_v26, %v4384_v6 }
 0x418   :  { %v1954_v29 = vpack.c.bf16 %v1822_v25, %v1819_v24 }
 0x419   :  { %v1953_v30 = vpack.c.bf16 %v1814_v28, %v1811_v27 }
 0x41a   :  { %v1986_v32 = vmax.bf16 %v3527_v1, %v1954_v29 }
 0x41b   :  { %v1985_v31 = vmax.bf16 %v3527_v1, %v1953_v30 }
 0x41d   :  { %2303 = vmatmul.mubr.bf16.gmra.mrb[0].mxu0 %v1985_v31 }
 0x41e   :  { %2312 = vmatprep.mubr.bf16.mxu0 %v3527_v1 }
 0x423   :  { %v3372_v33 = vpop.f32.mrb[164].mxu1 }
 0x424   :  { %v1826_v34 = vpop.f32.mrb[165].mxu1  ;;  %v1835_v36 = vadd.f32 %v3372_v33, %v4384_v6  ;;  %v3125_v33 = vld [vmem:[%s5099_s7 + $0x4] ss:$8 sm:$0x3] }
 0x425   :  { %v3373_v35 = vpop.f32.mrb[166].mxu1  ;;  %2313 = vmatmul.mubr.bf16.gmra.mrb[4].mxu0 %v1986_v32  ;;  %v1827_v63 = vadd.f32 %v1826_v34, %v4384_v6  ;;  %v4583_v34 = vrot.slane %v3125_v33, %v146_v58 }
 0x426   :  { %v1838_v37 = vadd.f32 %v3373_v35, %v4384_v6  ;;  %v1829_v38 = vpop.f32.mrb[167].mxu1  ;;  %2322 = vmatprep.mubr.bf16.mxu0 %v3527_v1 }
 0x427   :  { %v1830_v39 = vadd.f32 %v1829_v38, %v4384_v6 }
 0x428   :  { %v1956_v40 = vpack.c.bf16 %v1838_v37, %v1835_v36  ;;  %v4587_v36 = vrot.slane %v3125_v33, %v150_v60 }
 0x429   :  { %v1955_v41 = vpack.c.bf16 %v1830_v39, %v1827_v63 }
 0x42a   :  { %v1988_v42 = vmax.bf16 %v3527_v1, %v1956_v40 }
 0x42b   :  { %v1987_v2 = vmax.bf16 %v3527_v1, %v1955_v41 }
 0x42d   :  { %2323 = vmatmul.mubr.bf16.gmra.mrb[8].mxu0 %v1987_v2 }
 0x42e   :  { %2332 = vmatprep.mubr.bf16.mxu0 %v3527_v1 }
 0x433   :  { %v3376_v43 = vpop.f32.mrb[168].mxu1 }
 0x434   :  { %v1842_v44 = vpop.f32.mrb[169].mxu1  ;;  %v1851_v46 = vadd.f32 %v3376_v43, %v4384_v6 }
 0x435   :  { %v3377_v45 = vpop.f32.mrb[170].mxu1  ;;  %2333 = vmatmul.mubr.bf16.gmra.mrb[12].mxu0 %v1988_v42  ;;  %v1843_v49 = vadd.f32 %v1842_v44, %v4384_v6 }
 0x436   :  { %v1854_v47 = vadd.f32 %v3377_v45, %v4384_v6  ;;  %v1845_v48 = vpop.f32.mrb[171].mxu1  ;;  %2342 = vmatprep.mubr.bf16.mxu0 %v3527_v1 }
 0x437   :  { %v1846_v50 = vadd.f32 %v1845_v48, %v4384_v6 }
 0x438   :  { %v1958_v51 = vpack.c.bf16 %v1854_v47, %v1851_v46 }
 0x439   :  { %v1957_v52 = vpack.c.bf16 %v1846_v50, %v1843_v49 }
 0x43a   :  { %v1990_v53 = vmax.bf16 %v3527_v1, %v1958_v51 }
 0x43b   :  { %v1989_v4 = vmax.bf16 %v3527_v1, %v1957_v52 }
 0x43d   :  { %2343 = vmatmul.mubr.bf16.gmra.mrb[16].mxu0 %v1989_v4 }
 0x43e   :  { %2352 = vmatprep.mubr.bf16.mxu0 %v3527_v1 }
 0x443   :  { %v3380_v54 = vpop.f32.mrb[172].mxu1 }
 0x444   :  { %v1858_v55 = vpop.f32.mrb[173].mxu1  ;;  %v1867_v59 = vadd.f32 %v3380_v54, %v4384_v6 }
 0x445   :  { %v3381_v57 = vpop.f32.mrb[174].mxu1  ;;  %2353 = vmatmul.mubr.bf16.gmra.mrb[20].mxu0 %v1990_v53  ;;  %v1859_v62 = vadd.f32 %v1858_v55, %v4384_v6 }
 0x446   :  { %v1870_v61 = vadd.f32 %v3381_v57, %v4384_v6  ;;  %v1861_v9 = vpop.f32.mrb[175].mxu1  ;;  %2362 = vmatprep.mubr.bf16.mxu0 %v3527_v1 }
 0x447   :  { %v1862_v0 = vadd.f32 %v1861_v9, %v4384_v6 }
 0x448   :  { %v1960_v3 = vpack.c.bf16 %v1870_v61, %v1867_v59 }
 0x449   :  { %v1959_v5 = vpack.c.bf16 %v1862_v0, %v1859_v62 }
 0x44a   :  { %v1992_v8 = vmax.bf16 %v3527_v1, %v1960_v3 }
 0x44b   :  { %v1991_v7 = vmax.bf16 %v3527_v1, %v1959_v5 }
 0x44d   :  { %2363 = vmatmul.mubr.bf16.gmra.mrb[24].mxu0 %v1991_v7 }
 0x44e   :  { %2372 = vmatprep.mubr.bf16.mxu0 %v3527_v1 }
 0x453   :  { %v3384_v10 = vpop.f32.mrb[176].mxu1 }
 0x454   :  { %v1874_v11 = vpop.f32.mrb[177].mxu1  ;;  %v1883_v13 = vadd.f32 %v3384_v10, %v4384_v6 }
 0x455   :  { %v3385_v12 = vpop.f32.mrb[178].mxu1  ;;  %2373 = vmatmul.mubr.bf16.gmra.mrb[28].mxu0 %v1992_v8  ;;  %v1875_v16 = vadd.f32 %v1874_v11, %v4384_v6 }
 0x456   :  { %v1886_v14 = vadd.f32 %v3385_v12, %v4384_v6  ;;  %v1877_v15 = vpop.f32.mrb[179].mxu1  ;;  %2382 = vmatprep.mubr.bf16.mxu0 %v3527_v1 }
 0x457   :  { %v1878_v17 = vadd.f32 %v1877_v15, %v4384_v6 }
 0x458   :  { %v1962_v18 = vpack.c.bf16 %v1886_v14, %v1883_v13 }
 0x459   :  { %v1961_v19 = vpack.c.bf16 %v1878_v17, %v1875_v16 }
 0x45a   :  { %v1994_v21 = vmax.bf16 %v3527_v1, %v1962_v18 }
 0x45b   :  { %v1993_v20 = vmax.bf16 %v3527_v1, %v1961_v19 }
 0x45d   :  { %2383 = vmatmul.mubr.bf16.gmra.mrb[32].mxu0 %v1993_v20 }
 0x45e   :  { %2392 = vmatprep.mubr.bf16.mxu0 %v3527_v1 }
 0x463   :  { %v3388_v22 = vpop.f32.mrb[180].mxu1 }
 0x464   :  { %v1890_v23 = vpop.f32.mrb[181].mxu1  ;;  %v1899_v25 = vadd.f32 %v3388_v22, %v4384_v6 }
 0x465   :  { %v3389_v24 = vpop.f32.mrb[182].mxu1  ;;  %2393 = vmatmul.mubr.bf16.gmra.mrb[36].mxu0 %v1994_v21  ;;  %v1891_v28 = vadd.f32 %v1890_v23, %v4384_v6 }
 0x466   :  { %v1902_v26 = vadd.f32 %v3389_v24, %v4384_v6  ;;  %v1893_v27 = vpop.f32.mrb[183].mxu1  ;;  %2402 = vmatprep.mubr.bf16.mxu0 %v3527_v1 }
 0x467   :  { %v1894_v29 = vadd.f32 %v1893_v27, %v4384_v6 }
 0x468   :  { %v1964_v30 = vpack.c.bf16 %v1902_v26, %v1899_v25 }
 0x469   :  { %v1963_v31 = vpack.c.bf16 %v1894_v29, %v1891_v28 }
 0x46a   :  { %v1996_v63 = vmax.bf16 %v3527_v1, %v1964_v30 }
 0x46b   :  { %v1995_v32 = vmax.bf16 %v3527_v1, %v1963_v31 }
 0x46d   :  { %2403 = vmatmul.mubr.bf16.gmra.mrb[40].mxu0 %v1995_v32 }
 0x46e   :  { %2412 = vmatprep.mubr.bf16.mxu0 %v3527_v1 }
 0x470   :  { %v2144_v35 = vpop.f32.mrb[192].mxu0 }
 0x471   :  { %v2146_v37 = vpop.f32.mrb[193].mxu0  ;;  %v4591_v39 = vadd.f32 %v2144_v35, %v4583_v34 }
 0x472   :  { %v2148_v38 = vpop.f32.mrb[194].mxu0  ;;  %v4597_v58 = vadd.f32 %v2146_v37, %v4587_v36 }
 0x473   :  { %v4594_v40 = vadd.f32 %v2148_v38, %v4583_v34  ;;  %v3392_v41 = vpop.f32.mrb[184].mxu1  ;;  %v2150_v2 = vpop.f32.mrb[195].mxu0 }
 0x474   :  { %v4600_v42 = vadd.f32 %v2150_v2, %v4587_v36  ;;  %v1906_v56 = vpop.f32.mrb[185].mxu1  ;;  %v1915_v44 = vadd.f32 %v3392_v41, %v4384_v6 }
 0x475   :  { %v2463_v60 = vpack.c.bf16 %v4594_v40, %v4591_v39  ;;  %v3393_v43 = vpop.f32.mrb[186].mxu1  ;;  %2413 = vmatmul.mubr.bf16.gmra.mrb[44].mxu0 %v1996_v63  ;;  %v1907_v48 = vadd.f32 %v1906_v56, %v4384_v6 }
 0x476   :  { %v2464_v45 = vpack.c.bf16 %v4600_v42, %v4597_v58  ;;  %v1918_v46 = vadd.f32 %v3393_v43, %v4384_v6  ;;  %v1909_v47 = vpop.f32.mrb[187].mxu1  ;;  %2422 = vmatprep.mubr.bf16.mxu0 %v3527_v1 }
 0x477   :  { %v1910_v49 = vadd.f32 %v1909_v47, %v4384_v6 }
 0x478   :  { %v1966_v50 = vpack.c.bf16 %v1918_v46, %v1915_v44  ;;  %v2154_v51 = vpop.f32.mrb[196].mxu0 }
 0x479   :  { %v1965_v52 = vpack.c.bf16 %v1910_v49, %v1907_v48  ;;  %v2156_v4 = vpop.f32.mrb[197].mxu0  ;;  %v4613_v55 = vadd.f32 %v2154_v51, %v4583_v34 }
 0x47a   :  { %v2158_v53 = vpop.f32.mrb[198].mxu0  ;;  %v4619_v61 = vadd.f32 %v2156_v4, %v4587_v36  ;;  %v1998_v8 = vmax.bf16 %v3527_v1, %v1966_v50  ;;  %v2528_v4 = vmax.bf16 %v3527_v1, %v2464_v45 }
 0x47b   :  { %v1997_v54 = vmax.bf16 %v3527_v1, %v1965_v52  ;;  %v4616_v57 = vadd.f32 %v2158_v53, %v4583_v34  ;;  %v2160_v59 = vpop.f32.mrb[199].mxu0 }
 0x47c   :  { %v4622_v9 = vadd.f32 %v2160_v59, %v4587_v36 }
 0x47d   :  { %v2465_v62 = vpack.c.bf16 %v4616_v57, %v4613_v55  ;;  %2423 = vmatmul.mubr.bf16.gmra.mrb[48].mxu0 %v1997_v54 }
 0x47e   :  { %v2466_v0 = vpack.c.bf16 %v4622_v9, %v4619_v61  ;;  %2432 = vmatprep.mubr.bf16.mxu0 %v3527_v1 }
 0x480   :  { %v2164_v3 = vpop.f32.mrb[200].mxu0 }
 0x481   :  { %v2166_v5 = vpop.f32.mrb[201].mxu0  ;;  %v2165_v10 = vadd.f32 %v2164_v3, %v4583_v34 }
 0x482   :  { %v2168_v7 = vpop.f32.mrb[202].mxu0  ;;  %v2167_v14 = vadd.f32 %v2166_v5, %v4587_v36 }
 0x483   :  { %v2169_v11 = vadd.f32 %v2168_v7, %v4583_v34  ;;  %v3396_v12 = vpop.f32.mrb[188].mxu1  ;;  %v2170_v13 = vpop.f32.mrb[203].mxu0 }
 0x484   :  { %v2171_v15 = vadd.f32 %v2170_v13, %v4587_v36  ;;  %v1922_v16 = vpop.f32.mrb[189].mxu1  ;;  %v1931_v19 = vadd.f32 %v3396_v12, %v4384_v6  ;;  %v2530_v13 = vmax.bf16 %v3527_v1, %v2466_v0 }
 0x485   :  { %v2467_v17 = vpack.c.bf16 %v2169_v11, %v2165_v10  ;;  %v3397_v18 = vpop.f32.mrb[190].mxu1  ;;  %2433 = vmatmul.mubr.bf16.gmra.mrb[52].mxu0 %v1998_v8  ;;  %v1923_v23 = vadd.f32 %v1922_v16, %v4384_v6  ;;  %v2527_v10 = vmax.bf16 %v3527_v1, %v2463_v60 }
 0x486   :  { %v2468_v20 = vpack.c.bf16 %v2171_v15, %v2167_v14  ;;  %v1934_v21 = vadd.f32 %v3397_v18, %v4384_v6  ;;  %v1925_v22 = vpop.f32.mrb[191].mxu1  ;;  %2442 = vmatprep.mubr.bf16.mxu0 %v3527_v1  ;;  %v2529_v18 = vmax.bf16 %v3527_v1, %v2465_v62 }
 0x487   :  { %v1926_v24 = vadd.f32 %v1925_v22, %v4384_v6  ;;  %v2531_v28 = vmax.bf16 %v3527_v1, %v2467_v17 }
 0x488   :  { %v1968_v25 = vpack.c.bf16 %v1934_v21, %v1931_v19  ;;  %v2174_v26 = vpop.f32.mrb[204].mxu0  ;;  %v2532_v27 = vmax.bf16 %v3527_v1, %v2468_v20 }
 0x489   :  { %v1967_v29 = vpack.c.bf16 %v1926_v24, %v1923_v23  ;;  %v2176_v30 = vpop.f32.mrb[205].mxu0  ;;  %v2175_v33 = vadd.f32 %v2174_v26, %v4583_v34 }
 0x48a   :  { %v2178_v31 = vpop.f32.mrb[206].mxu0  ;;  %2768 = vmatprep.mubr.bf16.mxu1 %v2532_v27  ;;  %v2177_v6 = vadd.f32 %v2176_v30, %v4587_v36  ;;  %v2000_v47 = vmax.bf16 %v3527_v1, %v1968_v25 }
 0x48b   :  { %v1999_v32 = vmax.bf16 %v3527_v1, %v1967_v29  ;;  %v2179_v35 = vadd.f32 %v2178_v31, %v4583_v34  ;;  %v2180_v37 = vpop.f32.mrb[207].mxu0  ;;  %2769 = vmatmul.mubr.bf16.vlgmr.msra.gmra.mrb[192].mxu1 %v2531_v28 }
 0x48c   :  { %v2181_v38 = vadd.f32 %v2180_v37, %v4587_v36 }
 0x48d   :  { %v2469_v63 = vpack.c.bf16 %v2179_v35, %v2175_v33  ;;  %2443 = vmatmul.mubr.bf16.gmra.mrb[56].mxu0 %v1999_v32 }
 0x48e   :  { %v2470_v41 = vpack.c.bf16 %v2181_v38, %v2177_v6  ;;  %2452 = vmatprep.mubr.bf16.mxu0 %v3527_v1 }
 0x48f   :  { %v2533_v44 = vmax.bf16 %v3527_v1, %v2469_v63 }
 0x490   :  { %v2184_v2 = vpop.f32.mrb[208].mxu0  ;;  %v2534_v56 = vmax.bf16 %v3527_v1, %v2470_v41 }
 0x491   :  { %v2186_v43 = vpop.f32.mrb[209].mxu0  ;;  %v2185_v48 = vadd.f32 %v2184_v2, %v4583_v34 }
 0x492   :  { %v2188_v46 = vpop.f32.mrb[210].mxu0  ;;  %2776 = vmatprep.mubr.bf16.mxu1 %v2534_v56  ;;  %v2187_v51 = vadd.f32 %v2186_v43, %v4587_v36 }
 0x493   :  { %v2189_v49 = vadd.f32 %v2188_v46, %v4583_v34  ;;  %v2190_v50 = vpop.f32.mrb[211].mxu0  ;;  %2777 = vmatmul.mubr.bf16.gmra.mrb[196].mxu1 %v2533_v44 }
 0x494   :  { %v2191_v52 = vadd.f32 %v2190_v50, %v4587_v36 }
 0x495   :  { %v2471_v53 = vpack.c.bf16 %v2189_v49, %v2185_v48  ;;  %2453 = vmatmul.mubr.bf16.gmra.mrb[60].mxu0 %v2000_v47 }
 0x496   :  { %v2472_v54 = vpack.c.bf16 %v2191_v52, %v2187_v51  ;;  %2752 = vmatprep.mubr.bf16.mxu0 %v2528_v4 }
 0x497   :  { %v2535_v7 = vmax.bf16 %v3527_v1, %v2471_v53 }
 0x498   :  { %v2194_v59 = vpop.f32.mrb[212].mxu0  ;;  %v2536_v3 = vmax.bf16 %v3527_v1, %v2472_v54 }
 0x499   :  { %v2196_v5 = vpop.f32.mrb[213].mxu0  ;;  %v2195_v58 = vadd.f32 %v2194_v59, %v4583_v34 }
 0x49a   :  { %v2198_v8 = vpop.f32.mrb[214].mxu0  ;;  %2784 = vmatprep.mubr.bf16.mxu1 %v2536_v3  ;;  %v2197_v11 = vadd.f32 %v2196_v5, %v4587_v36 }
 0x49b   :  { %v2199_v42 = vadd.f32 %v2198_v8, %v4583_v34  ;;  %v2200_v45 = vpop.f32.mrb[215].mxu0  ;;  %2785 = vmatmul.mubr.bf16.gmra.mrb[200].mxu1 %v2535_v7 }
 0x49c   :  { %v2201_v12 = vadd.f32 %v2200_v45, %v4587_v36 }
 0x49d   :  { %v2473_v14 = vpack.c.bf16 %v2199_v42, %v2195_v58  ;;  %2753 = vmatmul.mubr.bf16.vlgmr.msra.gmra.mrb[64].mxu0 %v2527_v10 }
 0x49e   :  { %v2474_v39 = vpack.c.bf16 %v2201_v12, %v2197_v11  ;;  %2760 = vmatprep.mubr.bf16.mxu0 %v2530_v13 }
 0x49f   :  { %v2537_v16 = vmax.bf16 %v3527_v1, %v2473_v14 }
 0x4a0   :  { %v2204_v40 = vpop.f32.mrb[216].mxu0  ;;  %v2538_v60 = vmax.bf16 %v3527_v1, %v2474_v39 }
 0x4a1   :  { %v2206_v15 = vpop.f32.mrb[217].mxu0  ;;  %v2205_v61 = vadd.f32 %v2204_v40, %v4583_v34 }
 0x4a2   :  { %v2208_v17 = vpop.f32.mrb[218].mxu0  ;;  %2792 = vmatprep.mubr.bf16.mxu1 %v2538_v60  ;;  %v2207_v19 = vadd.f32 %v2206_v15, %v4587_v36 }
 0x4a3   :  { %v2209_v9 = vadd.f32 %v2208_v17, %v4583_v34  ;;  %v2210_v0 = vpop.f32.mrb[219].mxu0  ;;  %2793 = vmatmul.mubr.bf16.gmra.mrb[204].mxu1 %v2537_v16 }
 0x4a4   :  { %v2211_v20 = vadd.f32 %v2210_v0, %v4587_v36 }
 0x4a5   :  { %v2475_v21 = vpack.c.bf16 %v2209_v9, %v2205_v61  ;;  %2761 = vmatmul.mubr.bf16.gmra.mrb[68].mxu0 %v2529_v18 }
 0x4a6   :  { %v2476_v22 = vpack.c.bf16 %v2211_v20, %v2207_v19 }
 0x4a7   :  { %v2539_v55 = vmax.bf16 %v3527_v1, %v2475_v21 }
 0x4a8   :  { %v2214_v23 = vpop.f32.mrb[220].mxu0  ;;  %v2540_v24 = vmax.bf16 %v3527_v1, %v2476_v22 }
 0x4a9   :  { %v2216_v25 = vpop.f32.mrb[221].mxu0  ;;  %v2215_v62 = vadd.f32 %v2214_v23, %v4583_v34 }
 0x4aa   :  { %v2218_v57 = vpop.f32.mrb[222].mxu0  ;;  %2800 = vmatprep.mubr.bf16.mxu1 %v2540_v24  ;;  %v2217_v28 = vadd.f32 %v2216_v25, %v4587_v36 }
 0x4ab   :  { %v2219_v26 = vadd.f32 %v2218_v57, %v4583_v34  ;;  %v2220_v27 = vpop.f32.mrb[223].mxu0  ;;  %2801 = vmatmul.mubr.bf16.gmra.mrb[208].mxu1 %v2539_v55 }
 0x4ac   :  { %v2221_v29 = vadd.f32 %v2220_v27, %v4587_v36 }
 0x4ad   :  { %v2477_v30 = vpack.c.bf16 %v2219_v26, %v2215_v62 }
 0x4ae   :  { %v2478_v31 = vpack.c.bf16 %v2221_v29, %v2217_v28 }
 0x4af   :  { %v2541_v37 = vmax.bf16 %v3527_v1, %v2477_v30 }
 0x4b0   :  { %v2224_v32 = vpop.f32.mrb[224].mxu0  ;;  %v2542_v33 = vmax.bf16 %v3527_v1, %v2478_v31 }
 0x4b1   :  { %v2226_v35 = vpop.f32.mrb[225].mxu0  ;;  %v2225_v38 = vadd.f32 %v2224_v32, %v4583_v34 }
 0x4b2   :  { %v2228_v6 = vpop.f32.mrb[226].mxu0  ;;  %2808 = vmatprep.mubr.bf16.mxu1 %v2542_v33  ;;  %v2227_v2 = vadd.f32 %v2226_v35, %v4587_v36 }
 0x4b3   :  { %v2229_v63 = vadd.f32 %v2228_v6, %v4583_v34  ;;  %v2230_v41 = vpop.f32.mrb[227].mxu0  ;;  %2809 = vmatmul.mubr.bf16.gmra.mrb[212].mxu1 %v2541_v37 }
 0x4b4   :  { %v2231_v56 = vadd.f32 %v2230_v41, %v4587_v36 }
 0x4b5   :  { %v2479_v43 = vpack.c.bf16 %v2229_v63, %v2225_v38 }
 0x4b6   :  { %v2480_v44 = vpack.c.bf16 %v2231_v56, %v2227_v2 }
 0x4b7   :  { %v2543_v49 = vmax.bf16 %v3527_v1, %v2479_v43 }
 0x4b8   :  { %v2234_v46 = vpop.f32.mrb[228].mxu0  ;;  %v2544_v47 = vmax.bf16 %v3527_v1, %v2480_v44 }
 0x4b9   :  { %v2236_v48 = vpop.f32.mrb[229].mxu0  ;;  %v2235_v51 = vadd.f32 %v2234_v46, %v4583_v34 }
 0x4ba   :  { %v2238_v50 = vpop.f32.mrb[230].mxu0  ;;  %2816 = vmatprep.mubr.bf16.mxu1 %v2544_v47  ;;  %v2237_v53 = vadd.f32 %v2236_v48, %v4587_v36 }
 0x4bb   :  { %v2239_v52 = vadd.f32 %v2238_v50, %v4583_v34  ;;  %v2240_v4 = vpop.f32.mrb[231].mxu0  ;;  %2817 = vmatmul.mubr.bf16.gmra.mrb[216].mxu1 %v2543_v49 }
 0x4bc   :  { %v2241_v54 = vadd.f32 %v2240_v4, %v4587_v36 }
 0x4bd   :  { %v2481_v59 = vpack.c.bf16 %v2239_v52, %v2235_v51 }
 0x4be   :  { %v2482_v3 = vpack.c.bf16 %v2241_v54, %v2237_v53 }
 0x4bf   :  { %v2545_v10 = vmax.bf16 %v3527_v1, %v2481_v59 }
 0x4c0   :  { %v2244_v5 = vpop.f32.mrb[232].mxu0  ;;  %v2546_v7 = vmax.bf16 %v3527_v1, %v2482_v3 }
 0x4c1   :  { %v2246_v8 = vpop.f32.mrb[233].mxu0  ;;  %v2245_v42 = vadd.f32 %v2244_v5, %v4583_v34 }
 0x4c2   :  { %v2248_v58 = vpop.f32.mrb[234].mxu0  ;;  %2824 = vmatprep.mubr.bf16.mxu1 %v2546_v7  ;;  %v2247_v12 = vadd.f32 %v2246_v8, %v4587_v36 }
 0x4c3   :  { %v2249_v45 = vadd.f32 %v2248_v58, %v4583_v34  ;;  %v2250_v11 = vpop.f32.mrb[235].mxu0  ;;  %2825 = vmatmul.mubr.bf16.gmra.mrb[220].mxu1 %v2545_v10 }
 0x4c4   :  { %v2251_v13 = vadd.f32 %v2250_v11, %v4587_v36 }
 0x4c5   :  { %v2483_v14 = vpack.c.bf16 %v2249_v45, %v2245_v42 }
 0x4c6   :  { %v2484_v39 = vpack.c.bf16 %v2251_v13, %v2247_v12 }
 0x4c7   :  { %v2547_v16 = vmax.bf16 %v3527_v1, %v2483_v14 }
 0x4c8   :  { %v2254_v40 = vpop.f32.mrb[236].mxu0  ;;  %v2548_v60 = vmax.bf16 %v3527_v1, %v2484_v39 }
 0x4c9   :  { %v2256_v15 = vpop.f32.mrb[237].mxu0  ;;  %v2255_v18 = vadd.f32 %v2254_v40, %v4583_v34 }
 0x4ca   :  { %v2258_v17 = vpop.f32.mrb[238].mxu0  ;;  %2832 = vmatprep.mubr.bf16.mxu1 %v2548_v60  ;;  %v2257_v0 = vadd.f32 %v2256_v15, %v4587_v36 }
 0x4cb   :  { %v2259_v61 = vadd.f32 %v2258_v17, %v4583_v34  ;;  %v2260_v9 = vpop.f32.mrb[239].mxu0  ;;  %2833 = vmatmul.mubr.bf16.gmra.mrb[224].mxu1 %v2547_v16 }
 0x4cc   :  { %v2261_v19 = vadd.f32 %v2260_v9, %v4587_v36 }
 0x4cd   :  { %v2485_v20 = vpack.c.bf16 %v2259_v61, %v2255_v18 }
 0x4ce   :  { %v2486_v21 = vpack.c.bf16 %v2261_v19, %v2257_v0 }
 0x4cf   :  { %v2549_v25 = vmax.bf16 %v3527_v1, %v2485_v20 }
 0x4d0   :  { %v2264_v22 = vpop.f32.mrb[240].mxu0  ;;  %v2550_v23 = vmax.bf16 %v3527_v1, %v2486_v21 }
 0x4d1   :  { %v2266_v24 = vpop.f32.mrb[241].mxu0  ;;  %v2265_v57 = vadd.f32 %v2264_v22, %v4583_v34 }
 0x4d2   :  { %v2268_v55 = vpop.f32.mrb[242].mxu0  ;;  %2840 = vmatprep.mubr.bf16.mxu1 %v2550_v23  ;;  %v2267_v27 = vadd.f32 %v2266_v24, %v4587_v36 }
 0x4d3   :  { %v2269_v62 = vadd.f32 %v2268_v55, %v4583_v34  ;;  %v2270_v26 = vpop.f32.mrb[243].mxu0  ;;  %2841 = vmatmul.mubr.bf16.gmra.mrb[228].mxu1 %v2549_v25 }
 0x4d4   :  { %v2271_v28 = vadd.f32 %v2270_v26, %v4587_v36 }
 0x4d5   :  { %v2487_v29 = vpack.c.bf16 %v2269_v62, %v2265_v57 }
 0x4d6   :  { %v2488_v30 = vpack.c.bf16 %v2271_v28, %v2267_v27 }
 0x4d7   :  { %v2551_v35 = vmax.bf16 %v3527_v1, %v2487_v29 }
 0x4d8   :  { %v2274_v31 = vpop.f32.mrb[244].mxu0  ;;  %v2552_v32 = vmax.bf16 %v3527_v1, %v2488_v30 }
 0x4d9   :  { %v2276_v33 = vpop.f32.mrb[245].mxu0  ;;  %v2275_v6 = vadd.f32 %v2274_v31, %v4583_v34 }
 0x4da   :  { %v2278_v37 = vpop.f32.mrb[246].mxu0  ;;  %2848 = vmatprep.mubr.bf16.mxu1 %v2552_v32  ;;  %v2277_v41 = vadd.f32 %v2276_v33, %v4587_v36 }
 0x4db   :  { %v2279_v38 = vadd.f32 %v2278_v37, %v4583_v34  ;;  %v2280_v63 = vpop.f32.mrb[247].mxu0  ;;  %2849 = vmatmul.mubr.bf16.gmra.mrb[232].mxu1 %v2551_v35 }
 0x4dc   :  { %v2281_v2 = vadd.f32 %v2280_v63, %v4587_v36 }
 0x4dd   :  { %v2489_v56 = vpack.c.bf16 %v2279_v38, %v2275_v6 }
 0x4de   :  { %v2490_v43 = vpack.c.bf16 %v2281_v2, %v2277_v41 }
 0x4df   :  { %v2553_v48 = vmax.bf16 %v3527_v1, %v2489_v56 }
 0x4e0   :  { %v2284_v44 = vpop.f32.mrb[248].mxu0  ;;  %v2554_v46 = vmax.bf16 %v3527_v1, %v2490_v43 }
 0x4e1   :  { %v2286_v47 = vpop.f32.mrb[249].mxu0  ;;  %v2285_v50 = vadd.f32 %v2284_v44, %v4583_v34 }
 0x4e2   :  { %v2288_v49 = vpop.f32.mrb[250].mxu0  ;;  %2856 = vmatprep.mubr.bf16.mxu1 %v2554_v46  ;;  %v2287_v4 = vadd.f32 %v2286_v47, %v4587_v36 }
 0x4e3   :  { %v2289_v51 = vadd.f32 %v2288_v49, %v4583_v34  ;;  %v2290_v52 = vpop.f32.mrb[251].mxu0  ;;  %2857 = vmatmul.mubr.bf16.gmra.mrb[236].mxu1 %v2553_v48 }
 0x4e4   :  { %v2291_v53 = vadd.f32 %v2290_v52, %v4587_v36 }
 0x4e5   :  { %v2491_v54 = vpack.c.bf16 %v2289_v51, %v2285_v50 }
 0x4e6   :  { %v2492_v59 = vpack.c.bf16 %v2291_v53, %v2287_v4 }
 0x4e7   :  { %v2555_v8 = vmax.bf16 %v3527_v1, %v2491_v54 }
 0x4e8   :  { %v2294_v3 = vpop.f32.mrb[252].mxu0  ;;  %v2556_v5 = vmax.bf16 %v3527_v1, %v2492_v59 }
 0x4e9   :  { %v2296_v7 = vpop.f32.mrb[253].mxu0  ;;  %v2295_v58 = vadd.f32 %v2294_v3, %v4583_v34 }
 0x4ea   :  { %v2298_v10 = vpop.f32.mrb[254].mxu0  ;;  %2864 = vmatprep.mubr.bf16.mxu1 %v2556_v5  ;;  %v2297_v11 = vadd.f32 %v2296_v7, %v4587_v36 }
 0x4eb   :  { %v2299_v42 = vadd.f32 %v2298_v10, %v4583_v34  ;;  %v2300_v45 = vpop.f32.mrb[255].mxu0  ;;  %2865 = vmatmul.mubr.bf16.gmra.mrb[240].mxu1 %v2555_v8 }
 0x4ec   :  { %v2301_v12 = vadd.f32 %v2300_v45, %v4587_v36 }
 0x4ed   :  { %v2493_v13 = vpack.c.bf16 %v2299_v42, %v2295_v58 }
 0x4ee   :  { %v2494_v14 = vpack.c.bf16 %v2301_v12, %v2297_v11 }
 0x4ef   :  { %v2557_v15 = vmax.bf16 %v3527_v1, %v2493_v13 }
 0x4f0   :  { %v2304_v39 = vpop.f32.mrb[0].mxu0  ;;  %v2558_v40 = vmax.bf16 %v3527_v1, %v2494_v14 }
 0x4f1   :  { %v2306_v60 = vpop.f32.mrb[1].mxu0  ;;  %v2305_v17 = vadd.f32 %v2304_v39, %v4583_v34 }
 0x4f2   :  { %v2308_v16 = vpop.f32.mrb[2].mxu0  ;;  %2872 = vmatprep.mubr.bf16.mxu1 %v2558_v40  ;;  %v2307_v9 = vadd.f32 %v2306_v60, %v4587_v36 }
 0x4f3   :  { %v2309_v18 = vadd.f32 %v2308_v16, %v4583_v34  ;;  %v2310_v61 = vpop.f32.mrb[3].mxu0  ;;  %2873 = vmatmul.mubr.bf16.gmra.mrb[244].mxu1 %v2557_v15 }
 0x4f4   :  { %v2311_v0 = vadd.f32 %v2310_v61, %v4587_v36 }
 0x4f5   :  { %v2495_v19 = vpack.c.bf16 %v2309_v18, %v2305_v17 }
 0x4f6   :  { %v2496_v20 = vpack.c.bf16 %v2311_v0, %v2307_v9 }
 0x4f7   :  { %v2559_v24 = vmax.bf16 %v3527_v1, %v2495_v19 }
 0x4f8   :  { %v2314_v21 = vpop.f32.mrb[4].mxu0  ;;  %v2560_v22 = vmax.bf16 %v3527_v1, %v2496_v20 }
 0x4f9   :  { %v2316_v23 = vpop.f32.mrb[5].mxu0  ;;  %v2315_v55 = vadd.f32 %v2314_v21, %v4583_v34 }
 0x4fa   :  { %v2318_v25 = vpop.f32.mrb[6].mxu0  ;;  %2880 = vmatprep.mubr.bf16.mxu1 %v2560_v22  ;;  %v2317_v26 = vadd.f32 %v2316_v23, %v4587_v36 }
 0x4fb   :  { %v2319_v57 = vadd.f32 %v2318_v25, %v4583_v34  ;;  %v2320_v62 = vpop.f32.mrb[7].mxu0  ;;  %2881 = vmatmul.mubr.bf16.gmra.mrb[248].mxu1 %v2559_v24 }
 0x4fc   :  { %v2321_v27 = vadd.f32 %v2320_v62, %v4587_v36 }
 0x4fd   :  { %v2497_v28 = vpack.c.bf16 %v2319_v57, %v2315_v55 }
 0x4fe   :  { %v2498_v29 = vpack.c.bf16 %v2321_v27, %v2317_v26 }
 0x4ff   :  { %v2561_v33 = vmax.bf16 %v3527_v1, %v2497_v28 }
 0x500   :  { %v2324_v30 = vpop.f32.mrb[8].mxu0  ;;  %v2562_v31 = vmax.bf16 %v3527_v1, %v2498_v29 }
 0x501   :  { %v2326_v32 = vpop.f32.mrb[9].mxu0  ;;  %v2325_v37 = vadd.f32 %v2324_v30, %v4583_v34 }
 0x502   :  { %v2328_v35 = vpop.f32.mrb[10].mxu0  ;;  %2888 = vmatprep.mubr.bf16.mxu1 %v2562_v31  ;;  %v2327_v63 = vadd.f32 %v2326_v32, %v4587_v36 }
 0x503   :  { %v2329_v6 = vadd.f32 %v2328_v35, %v4583_v34  ;;  %v2330_v38 = vpop.f32.mrb[11].mxu0  ;;  %2889 = vmatmul.mubr.bf16.gmra.mrb[252].mxu1 %v2561_v33 }
 0x504   :  { %v2331_v41 = vadd.f32 %v2330_v38, %v4587_v36 }
 0x505   :  { %v2499_v2 = vpack.c.bf16 %v2329_v6, %v2325_v37 }
 0x506   :  { %v2500_v56 = vpack.c.bf16 %v2331_v41, %v2327_v63 }
 0x507   :  { %v2563_v46 = vmax.bf16 %v3527_v1, %v2499_v2 }
 0x508   :  { %v2334_v43 = vpop.f32.mrb[12].mxu0  ;;  %v2564_v44 = vmax.bf16 %v3527_v1, %v2500_v56 }
 0x509   :  { %v2336_v47 = vpop.f32.mrb[13].mxu0  ;;  %v2335_v49 = vadd.f32 %v2334_v43, %v4583_v34 }
 0x50a   :  { %v2338_v48 = vpop.f32.mrb[14].mxu0  ;;  %2896 = vmatprep.mubr.bf16.mxu1 %v2564_v44  ;;  %v2337_v52 = vadd.f32 %v2336_v47, %v4587_v36 }
 0x50b   :  { %v2339_v50 = vadd.f32 %v2338_v48, %v4583_v34  ;;  %v2340_v51 = vpop.f32.mrb[15].mxu0  ;;  %2897 = vmatmul.mubr.bf16.gmra.mrb[0].mxu1 %v2563_v46 }
 0x50c   :  { %v2341_v4 = vadd.f32 %v2340_v51, %v4587_v36 }
 0x50d   :  { %v2501_v53 = vpack.c.bf16 %v2339_v50, %v2335_v49 }
 0x50e   :  { %v2502_v54 = vpack.c.bf16 %v2341_v4, %v2337_v52 }
 0x50f   :  { %v2565_v5 = vmax.bf16 %v3527_v1, %v2501_v53 }
 0x510   :  { %v2344_v59 = vpop.f32.mrb[16].mxu0  ;;  %v2566_v3 = vmax.bf16 %v3527_v1, %v2502_v54 }
 0x511   :  { %v2346_v7 = vpop.f32.mrb[17].mxu0  ;;  %v2345_v10 = vadd.f32 %v2344_v59, %v4583_v34 }
 0x512   :  { %v2348_v8 = vpop.f32.mrb[18].mxu0  ;;  %2904 = vmatprep.mubr.bf16.mxu1 %v2566_v3  ;;  %v2347_v45 = vadd.f32 %v2346_v7, %v4587_v36 }
 0x513   :  { %v2349_v58 = vadd.f32 %v2348_v8, %v4583_v34  ;;  %v2350_v42 = vpop.f32.mrb[19].mxu0  ;;  %2905 = vmatmul.mubr.bf16.gmra.mrb[4].mxu1 %v2565_v5 }
 0x514   :  { %v2351_v11 = vadd.f32 %v2350_v42, %v4587_v36 }
 0x515   :  { %v2503_v12 = vpack.c.bf16 %v2349_v58, %v2345_v10 }
 0x516   :  { %v2504_v13 = vpack.c.bf16 %v2351_v11, %v2347_v45 }
 0x517   :  { %v2567_v40 = vmax.bf16 %v3527_v1, %v2503_v12 }
 0x518   :  { %v2354_v14 = vpop.f32.mrb[20].mxu0  ;;  %v2568_v39 = vmax.bf16 %v3527_v1, %v2504_v13 }
 0x519   :  { %v2356_v60 = vpop.f32.mrb[21].mxu0  ;;  %v2355_v16 = vadd.f32 %v2354_v14, %v4583_v34 }
 0x51a   :  { %v2358_v15 = vpop.f32.mrb[22].mxu0  ;;  %2912 = vmatprep.mubr.bf16.mxu1 %v2568_v39  ;;  %v2357_v61 = vadd.f32 %v2356_v60, %v4587_v36 }
 0x51b   :  { %v2359_v17 = vadd.f32 %v2358_v15, %v4583_v34  ;;  %v2360_v18 = vpop.f32.mrb[23].mxu0  ;;  %2913 = vmatmul.mubr.bf16.gmra.mrb[8].mxu1 %v2567_v40 }
 0x51c   :  { %v2361_v9 = vadd.f32 %v2360_v18, %v4587_v36 }
 0x51d   :  { %v2505_v0 = vpack.c.bf16 %v2359_v17, %v2355_v16 }
 0x51e   :  { %v2506_v19 = vpack.c.bf16 %v2361_v9, %v2357_v61 }
 0x51f   :  { %v2569_v22 = vmax.bf16 %v3527_v1, %v2505_v0 }
 0x520   :  { %v2364_v20 = vpop.f32.mrb[24].mxu0  ;;  %v2570_v21 = vmax.bf16 %v3527_v1, %v2506_v19 }
 0x521   :  { %v2366_v23 = vpop.f32.mrb[25].mxu0  ;;  %v2365_v25 = vadd.f32 %v2364_v20, %v4583_v34 }
 0x522   :  { %v2368_v24 = vpop.f32.mrb[26].mxu0  ;;  %2920 = vmatprep.mubr.bf16.mxu1 %v2570_v21  ;;  %v2367_v62 = vadd.f32 %v2366_v23, %v4587_v36 }
 0x523   :  { %v2369_v55 = vadd.f32 %v2368_v24, %v4583_v34  ;;  %v2370_v57 = vpop.f32.mrb[27].mxu0  ;;  %2921 = vmatmul.mubr.bf16.gmra.mrb[12].mxu1 %v2569_v22 }
 0x524   :  { %v2371_v26 = vadd.f32 %v2370_v57, %v4587_v36 }
 0x525   :  { %v2507_v27 = vpack.c.bf16 %v2369_v55, %v2365_v25 }
 0x526   :  { %v2508_v28 = vpack.c.bf16 %v2371_v26, %v2367_v62 }
 0x527   :  { %v2571_v31 = vmax.bf16 %v3527_v1, %v2507_v27 }
 0x528   :  { %v2374_v29 = vpop.f32.mrb[28].mxu0  ;;  %v2572_v30 = vmax.bf16 %v3527_v1, %v2508_v28 }
 0x529   :  { %v2376_v32 = vpop.f32.mrb[29].mxu0  ;;  %v2375_v35 = vadd.f32 %v2374_v29, %v4583_v34 }
 0x52a   :  { %v2378_v33 = vpop.f32.mrb[30].mxu0  ;;  %2928 = vmatprep.mubr.bf16.mxu1 %v2572_v30  ;;  %v2377_v38 = vadd.f32 %v2376_v32, %v4587_v36 }
 0x52b   :  { %v2379_v37 = vadd.f32 %v2378_v33, %v4583_v34  ;;  %v2380_v6 = vpop.f32.mrb[31].mxu0  ;;  %2929 = vmatmul.mubr.bf16.gmra.mrb[16].mxu1 %v2571_v31 }
 0x52c   :  { %v2381_v63 = vadd.f32 %v2380_v6, %v4587_v36 }
 0x52d   :  { %v2509_v41 = vpack.c.bf16 %v2379_v37, %v2375_v35 }
 0x52e   :  { %v2510_v2 = vpack.c.bf16 %v2381_v63, %v2377_v38 }
 0x52f   :  { %v2573_v44 = vmax.bf16 %v3527_v1, %v2509_v41 }
 0x530   :  { %v2384_v56 = vpop.f32.mrb[32].mxu0  ;;  %v2574_v43 = vmax.bf16 %v3527_v1, %v2510_v2 }
 0x531   :  { %v2386_v46 = vpop.f32.mrb[33].mxu0  ;;  %v2385_v48 = vadd.f32 %v2384_v56, %v4583_v34 }
 0x532   :  { %v2388_v47 = vpop.f32.mrb[34].mxu0  ;;  %2936 = vmatprep.mubr.bf16.mxu1 %v2574_v43  ;;  %v2387_v51 = vadd.f32 %v2386_v46, %v4587_v36 }
 0x533   :  { %v2389_v49 = vadd.f32 %v2388_v47, %v4583_v34  ;;  %v2390_v50 = vpop.f32.mrb[35].mxu0  ;;  %2937 = vmatmul.mubr.bf16.gmra.mrb[20].mxu1 %v2573_v44 }
 0x534   :  { %v2391_v52 = vadd.f32 %v2390_v50, %v4587_v36 }
 0x535   :  { %v2511_v4 = vpack.c.bf16 %v2389_v49, %v2385_v48 }
 0x536   :  { %v2512_v53 = vpack.c.bf16 %v2391_v52, %v2387_v51  ;;  %v4823_v52 = vld [vmem:[%s5099_s7 + $0x5] ss:$0 sm:$0xff] }
 0x537   :  { %v2575_v3 = vmax.bf16 %v3527_v1, %v2511_v4 }
 0x538   :  { %v2394_v54 = vpop.f32.mrb[36].mxu0  ;;  %v2576_v59 = vmax.bf16 %v3527_v1, %v2512_v53 }
 0x539   :  { %v2396_v5 = vpop.f32.mrb[37].mxu0  ;;  %v2395_v8 = vadd.f32 %v2394_v54, %v4583_v34 }
 0x53a   :  { %v2398_v7 = vpop.f32.mrb[38].mxu0  ;;  %2944 = vmatprep.mubr.bf16.mxu1 %v2576_v59  ;;  %v2397_v42 = vadd.f32 %v2396_v5, %v4587_v36 }
 0x53b   :  { %v2399_v10 = vadd.f32 %v2398_v7, %v4583_v34  ;;  %v2400_v58 = vpop.f32.mrb[39].mxu0  ;;  %2945 = vmatmul.mubr.bf16.gmra.mrb[24].mxu1 %v2575_v3 }
 0x53c   :  { %v2401_v45 = vadd.f32 %v2400_v58, %v4587_v36 }
 0x53d   :  { %v2513_v11 = vpack.c.bf16 %v2399_v10, %v2395_v8 }
 0x53e   :  { %v2514_v12 = vpack.c.bf16 %v2401_v45, %v2397_v42 }
 0x53f   :  { %v2577_v39 = vmax.bf16 %v3527_v1, %v2513_v11 }
 0x540   :  { %v2404_v13 = vpop.f32.mrb[40].mxu0  ;;  %v2578_v14 = vmax.bf16 %v3527_v1, %v2514_v12 }
 0x541   :  { %v2406_v40 = vpop.f32.mrb[41].mxu0  ;;  %v2405_v15 = vadd.f32 %v2404_v13, %v4583_v34 }
 0x542   :  { %v2408_v60 = vpop.f32.mrb[42].mxu0  ;;  %2952 = vmatprep.mubr.bf16.mxu1 %v2578_v14  ;;  %v2407_v18 = vadd.f32 %v2406_v40, %v4587_v36 }
 0x543   :  { %v2409_v16 = vadd.f32 %v2408_v60, %v4583_v34  ;;  %v2410_v17 = vpop.f32.mrb[43].mxu0  ;;  %2953 = vmatmul.mubr.bf16.gmra.mrb[28].mxu1 %v2577_v39 }
 0x544   :  { %v2411_v61 = vadd.f32 %v2410_v17, %v4587_v36 }
 0x545   :  { %v2515_v9 = vpack.c.bf16 %v2409_v16, %v2405_v15 }
 0x546   :  { %v2516_v0 = vpack.c.bf16 %v2411_v61, %v2407_v18 }
 0x547   :  { %v2579_v21 = vmax.bf16 %v3527_v1, %v2515_v9 }
 0x548   :  { %v2414_v19 = vpop.f32.mrb[44].mxu0  ;;  %v2580_v20 = vmax.bf16 %v3527_v1, %v2516_v0 }
 0x549   :  { %v2416_v22 = vpop.f32.mrb[45].mxu0  ;;  %v2415_v24 = vadd.f32 %v2414_v19, %v4583_v34 }
 0x54a   :  { %v2418_v23 = vpop.f32.mrb[46].mxu0  ;;  %2960 = vmatprep.mubr.bf16.mxu1 %v2580_v20  ;;  %v2417_v57 = vadd.f32 %v2416_v22, %v4587_v36 }
 0x54b   :  { %v2419_v25 = vadd.f32 %v2418_v23, %v4583_v34  ;;  %v2420_v55 = vpop.f32.mrb[47].mxu0  ;;  %2961 = vmatmul.mubr.bf16.gmra.mrb[32].mxu1 %v2579_v21 }
 0x54c   :  { %v2421_v62 = vadd.f32 %v2420_v55, %v4587_v36 }
 0x54d   :  { %v2517_v26 = vpack.c.bf16 %v2419_v25, %v2415_v24 }
 0x54e   :  { %v2518_v27 = vpack.c.bf16 %v2421_v62, %v2417_v57 }
 0x54f   :  { %v2581_v30 = vmax.bf16 %v3527_v1, %v2517_v26 }
 0x550   :  { %v2424_v28 = vpop.f32.mrb[48].mxu0  ;;  %v2582_v29 = vmax.bf16 %v3527_v1, %v2518_v27 }
 0x551   :  { %v2426_v31 = vpop.f32.mrb[49].mxu0  ;;  %v2425_v33 = vadd.f32 %v2424_v28, %v4583_v34 }
 0x552   :  { %v2428_v32 = vpop.f32.mrb[50].mxu0  ;;  %2968 = vmatprep.mubr.bf16.mxu1 %v2582_v29  ;;  %v2427_v6 = vadd.f32 %v2426_v31, %v4587_v36 }
 0x553   :  { %v2429_v35 = vadd.f32 %v2428_v32, %v4583_v34  ;;  %v2430_v37 = vpop.f32.mrb[51].mxu0  ;;  %2969 = vmatmul.mubr.bf16.gmra.mrb[36].mxu1 %v2581_v30 }
 0x554   :  { %v2431_v38 = vadd.f32 %v2430_v37, %v4587_v36 }
 0x555   :  { %v2519_v63 = vpack.c.bf16 %v2429_v35, %v2425_v33 }
 0x556   :  { %v2520_v41 = vpack.c.bf16 %v2431_v38, %v2427_v6 }
 0x557   :  { %v2583_v43 = vmax.bf16 %v3527_v1, %v2519_v63 }
 0x558   :  { %v2434_v2 = vpop.f32.mrb[52].mxu0  ;;  %v2584_v56 = vmax.bf16 %v3527_v1, %v2520_v41 }
 0x559   :  { %v2436_v44 = vpop.f32.mrb[53].mxu0  ;;  %v2435_v47 = vadd.f32 %v2434_v2, %v4583_v34 }
 0x55a   :  { %v2438_v46 = vpop.f32.mrb[54].mxu0  ;;  %2976 = vmatprep.mubr.bf16.mxu1 %v2584_v56  ;;  %v2437_v50 = vadd.f32 %v2436_v44, %v4587_v36 }
 0x55b   :  { %v2439_v48 = vadd.f32 %v2438_v46, %v4583_v34  ;;  %v2440_v49 = vpop.f32.mrb[55].mxu0  ;;  %2977 = vmatmul.mubr.bf16.gmra.mrb[40].mxu1 %v2583_v43 }
 0x55c   :  { %v2441_v51 = vadd.f32 %v2440_v49, %v4587_v36 }
 0x55d   :  { %v2521_v4 = vpack.c.bf16 %v2439_v48, %v2435_v47 }
 0x55e   :  { %v2522_v53 = vpack.c.bf16 %v2441_v51, %v2437_v50  ;;  %v2770_v54 = vpop.f32.mrb[192].mxu1 }
 0x55f   :  { %v2771_v59 = vadd.f32 %v2770_v54, %v4823_v52  ;;  %v2772_v3 = vpop.f32.mrb[193].mxu1  ;;  %v2585_v10 = vmax.bf16 %v3527_v1, %v2521_v4 }
 0x560   :  { %v2444_v5 = vpop.f32.mrb[56].mxu0  ;;  %v2773_v7 = vpop.f32.mrb[194].mxu1  ;;  %v2586_v8 = vmax.bf16 %v3527_v1, %v2522_v53 }
 0x561   :  { %3013 = vst [vmem:[%s5103_s8 + $0x20] sm:$0xff] %v2771_v59  ;;  %v2774_v58 = vadd.f32 %v2773_v7, %v4823_v52  ;;  %v2446_v42 = vpop.f32.mrb[57].mxu0  ;;  %v2775_v45 = vpop.f32.mrb[195].mxu1  ;;  %v2445_v12 = vadd.f32 %v2444_v5, %v4583_v34 }
 0x562   :  { %v2448_v11 = vpop.f32.mrb[58].mxu0  ;;  %2984 = vmatprep.mubr.bf16.mxu1 %v2586_v8  ;;  %v2447_v39 = vadd.f32 %v2446_v42, %v4587_v36 }
 0x563   :  { %3014 = vst [vmem:[%s5103_s8 + $0x28] sm:$0xff] %v2774_v58  ;;  %v2449_v13 = vadd.f32 %v2448_v11, %v4583_v34  ;;  %v2450_v14 = vpop.f32.mrb[59].mxu0  ;;  %2985 = vmatmul.mubr.bf16.gmra.mrb[44].mxu1 %v2585_v10 }
 0x564   :  { %v2451_v40 = vadd.f32 %v2450_v14, %v4587_v36 }
 0x565   :  { %v2523_v60 = vpack.c.bf16 %v2449_v13, %v2445_v12 }
 0x566   :  { %v2524_v15 = vpack.c.bf16 %v2451_v40, %v2447_v39  ;;  %v2778_v16 = vpop.f32.mrb[196].mxu1 }
 0x567   :  { %v2779_v17 = vadd.f32 %v2778_v16, %v4823_v52  ;;  %v2780_v18 = vpop.f32.mrb[197].mxu1  ;;  %v2587_v19 = vmax.bf16 %v3527_v1, %v2523_v60 }
 0x568   :  { %v2454_v61 = vpop.f32.mrb[60].mxu0  ;;  %v2781_v9 = vpop.f32.mrb[198].mxu1  ;;  %v2588_v0 = vmax.bf16 %v3527_v1, %v2524_v15 }
 0x569   :  { %3015 = vst [vmem:[%s5103_s8 + $0x30] sm:$0xff] %v2779_v17  ;;  %v2782_v20 = vadd.f32 %v2781_v9, %v4823_v52  ;;  %v2456_v21 = vpop.f32.mrb[61].mxu0  ;;  %v2783_v22 = vpop.f32.mrb[199].mxu1  ;;  %v2455_v24 = vadd.f32 %v2454_v61, %v4583_v34 }
 0x56a   :  { %v2458_v23 = vpop.f32.mrb[62].mxu0  ;;  %2992 = vmatprep.mubr.bf16.mxu1 %v2588_v0  ;;  %v2457_v57 = vadd.f32 %v2456_v21, %v4587_v36 }
 0x56b   :  { %3016 = vst [vmem:[%s5103_s8 + $0x38] sm:$0xff] %v2782_v20  ;;  %v2459_v25 = vadd.f32 %v2458_v23, %v4583_v34  ;;  %v2460_v55 = vpop.f32.mrb[63].mxu0  ;;  %2993 = vmatmul.mubr.bf16.gmra.mrb[48].mxu1 %v2587_v19 }
 0x56c   :  { %v2461_v62 = vadd.f32 %v2460_v55, %v4587_v36 }
 0x56d   :  { %v2525_v26 = vpack.c.bf16 %v2459_v25, %v2455_v24 }
 0x56e   :  { %v2526_v27 = vpack.c.bf16 %v2461_v62, %v2457_v57  ;;  %v2786_v28 = vpop.f32.mrb[200].mxu1 }
 0x56f   :  { %v2787_v29 = vadd.f32 %v2786_v28, %v4823_v52  ;;  %v2788_v30 = vpop.f32.mrb[201].mxu1  ;;  %v2589_v35 = vmax.bf16 %v3527_v1, %v2525_v26 }
 0x570   :  { %v2754_v31 = vpop.f32.mrb[64].mxu0  ;;  %v2789_v32 = vpop.f32.mrb[202].mxu1  ;;  %v2590_v33 = vmax.bf16 %v3527_v1, %v2526_v27 }
 0x571   :  { %3017 = vst [vmem:[%s5103_s8 + $0x40] sm:$0xff] %v2787_v29  ;;  %v2755_v34 = vadd.f32 %v2754_v31, %v4823_v52  ;;  %v2790_v36 = vadd.f32 %v2789_v32, %v4823_v52  ;;  %v2756_v37 = vpop.f32.mrb[65].mxu0  ;;  %v2791_v6 = vpop.f32.mrb[203].mxu1 }
 0x572   :  { %v2757_v38 = vpop.f32.mrb[66].mxu0  ;;  %3000 = vmatprep.mubr.bf16.mxu1 %v2590_v33 }
 0x573   :  { %3009 = vst [vmem:[%s5103_s8] sm:$0xff] %v2755_v34  ;;  %3018 = vst [vmem:[%s5103_s8 + $0x48] sm:$0xff] %v2790_v36  ;;  %v2758_v1 = vadd.f32 %v2757_v38, %v4823_v52  ;;  %v2759_v63 = vpop.f32.mrb[67].mxu0  ;;  %3001 = vmatmul.mubr.bf16.gmra.mrb[52].mxu1 %v2589_v35 }
 0x575   :  { %3010 = vst [vmem:[%s5103_s8 + $0x8] sm:$0xff] %v2758_v1 }
 0x576   :  { %v2794_v41 = vpop.f32.mrb[204].mxu1 }
 0x577   :  { %v2795_v2 = vadd.f32 %v2794_v41, %v4823_v52  ;;  %v2796_v56 = vpop.f32.mrb[205].mxu1 }
 0x578   :  { %v2762_v43 = vpop.f32.mrb[68].mxu0  ;;  %v2797_v44 = vpop.f32.mrb[206].mxu1 }
 0x579   :  { %3019 = vst [vmem:[%s5103_s8 + $0x50] sm:$0xff] %v2795_v2  ;;  %v2763_v46 = vadd.f32 %v2762_v43, %v4823_v52  ;;  %v2798_v47 = vadd.f32 %v2797_v44, %v4823_v52  ;;  %v2764_v48 = vpop.f32.mrb[69].mxu0  ;;  %v2799_v49 = vpop.f32.mrb[207].mxu1 }
 0x57a   :  { %v2765_v50 = vpop.f32.mrb[70].mxu0 }
 0x57b   :  { %3011 = vst [vmem:[%s5103_s8 + $0x10] sm:$0xff] %v2763_v46  ;;  %3020 = vst [vmem:[%s5103_s8 + $0x58] sm:$0xff] %v2798_v47  ;;  %v2766_v51 = vadd.f32 %v2765_v50, %v4823_v52  ;;  %v2767_v4 = vpop.f32.mrb[71].mxu0 }
 0x57d   :  { %3012 = vst [vmem:[%s5103_s8 + $0x18] sm:$0xff] %v2766_v51 }
 0x57e   :  { %v2802_v53 = vpop.f32.mrb[208].mxu1 }
 0x57f   :  { %v2803_v54 = vadd.f32 %v2802_v53, %v4823_v52  ;;  %v2804_v59 = vpop.f32.mrb[209].mxu1 }
 0x580   :  { %v2805_v3 = vpop.f32.mrb[210].mxu1 }
 0x581   :  { %3021 = vst [vmem:[%s5103_s8 + $0x60] sm:$0xff] %v2803_v54  ;;  %v2806_v5 = vadd.f32 %v2805_v3, %v4823_v52  ;;  %v2807_v7 = vpop.f32.mrb[211].mxu1 }
 0x583   :  { %3022 = vst [vmem:[%s5103_s8 + $0x68] sm:$0xff] %v2806_v5 }
 0x586   :  { %v2810_v8 = vpop.f32.mrb[212].mxu1 }
 0x587   :  { %v2811_v10 = vadd.f32 %v2810_v8, %v4823_v52  ;;  %v2812_v58 = vpop.f32.mrb[213].mxu1 }
 0x588   :  { %v2813_v42 = vpop.f32.mrb[214].mxu1 }
 0x589   :  { %3023 = vst [vmem:[%s5103_s8 + $0x70] sm:$0xff] %v2811_v10  ;;  %v2814_v45 = vadd.f32 %v2813_v42, %v4823_v52  ;;  %v2815_v11 = vpop.f32.mrb[215].mxu1 }
 0x58b   :  { %3024 = vst [vmem:[%s5103_s8 + $0x78] sm:$0xff] %v2814_v45 }
 0x58e   :  { %v2818_v12 = vpop.f32.mrb[216].mxu1 }
 0x58f   :  { %v2819_v13 = vadd.f32 %v2818_v12, %v4823_v52  ;;  %v2820_v14 = vpop.f32.mrb[217].mxu1 }
 0x590   :  { %v2821_v39 = vpop.f32.mrb[218].mxu1 }
 0x591   :  { %3025 = vst [vmem:[%s5103_s8 + $0x80] sm:$0xff] %v2819_v13  ;;  %v2822_v40 = vadd.f32 %v2821_v39, %v4823_v52  ;;  %v2823_v60 = vpop.f32.mrb[219].mxu1 }
 0x593   :  { %3026 = vst [vmem:[%s5103_s8 + $0x88] sm:$0xff] %v2822_v40 }
 0x596   :  { %v2826_v15 = vpop.f32.mrb[220].mxu1 }
 0x597   :  { %v2827_v16 = vadd.f32 %v2826_v15, %v4823_v52  ;;  %v2828_v17 = vpop.f32.mrb[221].mxu1 }
 0x598   :  { %v2829_v18 = vpop.f32.mrb[222].mxu1 }
 0x599   :  { %3027 = vst [vmem:[%s5103_s8 + $0x90] sm:$0xff] %v2827_v16  ;;  %v2830_v61 = vadd.f32 %v2829_v18, %v4823_v52  ;;  %v2831_v9 = vpop.f32.mrb[223].mxu1 }
 0x59b   :  { %3028 = vst [vmem:[%s5103_s8 + $0x98] sm:$0xff] %v2830_v61 }
 0x59e   :  { %v2834_v0 = vpop.f32.mrb[224].mxu1 }
 0x59f   :  { %v2835_v19 = vadd.f32 %v2834_v0, %v4823_v52  ;;  %v2836_v20 = vpop.f32.mrb[225].mxu1 }
 0x5a0   :  { %v2837_v21 = vpop.f32.mrb[226].mxu1 }
 0x5a1   :  { %3029 = vst [vmem:[%s5103_s8 + $0xa0] sm:$0xff] %v2835_v19  ;;  %v2838_v22 = vadd.f32 %v2837_v21, %v4823_v52  ;;  %v2839_v23 = vpop.f32.mrb[227].mxu1 }
 0x5a3   :  { %3030 = vst [vmem:[%s5103_s8 + $0xa8] sm:$0xff] %v2838_v22 }
 0x5a6   :  { %v2842_v24 = vpop.f32.mrb[228].mxu1 }
 0x5a7   :  { %v2843_v25 = vadd.f32 %v2842_v24, %v4823_v52  ;;  %v2844_v55 = vpop.f32.mrb[229].mxu1 }
 0x5a8   :  { %v2845_v57 = vpop.f32.mrb[230].mxu1 }
 0x5a9   :  { %3031 = vst [vmem:[%s5103_s8 + $0xb0] sm:$0xff] %v2843_v25  ;;  %v2846_v62 = vadd.f32 %v2845_v57, %v4823_v52  ;;  %v2847_v26 = vpop.f32.mrb[231].mxu1 }
 0x5ab   :  { %3032 = vst [vmem:[%s5103_s8 + $0xb8] sm:$0xff] %v2846_v62 }
 0x5ae   :  { %v2850_v27 = vpop.f32.mrb[232].mxu1 }
 0x5af   :  { %v2851_v28 = vadd.f32 %v2850_v27, %v4823_v52  ;;  %v2852_v29 = vpop.f32.mrb[233].mxu1 }
 0x5b0   :  { %v2853_v30 = vpop.f32.mrb[234].mxu1 }
 0x5b1   :  { %3033 = vst [vmem:[%s5103_s8 + $0xc0] sm:$0xff] %v2851_v28  ;;  %v2854_v31 = vadd.f32 %v2853_v30, %v4823_v52  ;;  %v2855_v32 = vpop.f32.mrb[235].mxu1 }
 0x5b3   :  { %3034 = vst [vmem:[%s5103_s8 + $0xc8] sm:$0xff] %v2854_v31 }
 0x5b6   :  { %v2858_v33 = vpop.f32.mrb[236].mxu1 }
 0x5b7   :  { %v2859_v35 = vadd.f32 %v2858_v33, %v4823_v52  ;;  %v2860_v34 = vpop.f32.mrb[237].mxu1 }
 0x5b8   :  { %v2861_v36 = vpop.f32.mrb[238].mxu1 }
 0x5b9   :  { %3035 = vst [vmem:[%s5103_s8 + $0xd0] sm:$0xff] %v2859_v35  ;;  %v2862_v37 = vadd.f32 %v2861_v36, %v4823_v52  ;;  %v2863_v6 = vpop.f32.mrb[239].mxu1 }
 0x5bb   :  { %3036 = vst [vmem:[%s5103_s8 + $0xd8] sm:$0xff] %v2862_v37 }
 0x5be   :  { %v2866_v38 = vpop.f32.mrb[240].mxu1 }
 0x5bf   :  { %v2867_v1 = vadd.f32 %v2866_v38, %v4823_v52  ;;  %v2868_v63 = vpop.f32.mrb[241].mxu1 }
 0x5c0   :  { %v2869_v41 = vpop.f32.mrb[242].mxu1 }
 0x5c1   :  { %3037 = vst [vmem:[%s5103_s8 + $0xe0] sm:$0xff] %v2867_v1  ;;  %v2870_v2 = vadd.f32 %v2869_v41, %v4823_v52  ;;  %v2871_v56 = vpop.f32.mrb[243].mxu1 }
 0x5c3   :  { %3038 = vst [vmem:[%s5103_s8 + $0xe8] sm:$0xff] %v2870_v2 }
 0x5c6   :  { %v2874_v43 = vpop.f32.mrb[244].mxu1 }
 0x5c7   :  { %v2875_v44 = vadd.f32 %v2874_v43, %v4823_v52  ;;  %v2876_v46 = vpop.f32.mrb[245].mxu1 }
 0x5c8   :  { %v2877_v47 = vpop.f32.mrb[246].mxu1 }
 0x5c9   :  { %3039 = vst [vmem:[%s5103_s8 + $0xf0] sm:$0xff] %v2875_v44  ;;  %v2878_v48 = vadd.f32 %v2877_v47, %v4823_v52  ;;  %v2879_v49 = vpop.f32.mrb[247].mxu1 }
 0x5cb   :  { %3040 = vst [vmem:[%s5103_s8 + $0xf8] sm:$0xff] %v2878_v48 }
 0x5ce   :  { %v2882_v50 = vpop.f32.mrb[248].mxu1 }
 0x5cf   :  { %v2883_v51 = vadd.f32 %v2882_v50, %v4823_v52  ;;  %v2884_v4 = vpop.f32.mrb[249].mxu1 }
 0x5d0   :  { %v2885_v53 = vpop.f32.mrb[250].mxu1 }
 0x5d1   :  { %3041 = vst [vmem:[%s5103_s8 + $0x100] sm:$0xff] %v2883_v51  ;;  %v2886_v54 = vadd.f32 %v2885_v53, %v4823_v52  ;;  %v2887_v59 = vpop.f32.mrb[251].mxu1 }
 0x5d3   :  { %3042 = vst [vmem:[%s5103_s8 + $0x108] sm:$0xff] %v2886_v54 }
 0x5d6   :  { %v2890_v3 = vpop.f32.mrb[252].mxu1 }
 0x5d7   :  { %v2891_v5 = vadd.f32 %v2890_v3, %v4823_v52  ;;  %v2892_v7 = vpop.f32.mrb[253].mxu1 }
 0x5d8   :  { %v2893_v8 = vpop.f32.mrb[254].mxu1 }
 0x5d9   :  { %3043 = vst [vmem:[%s5103_s8 + $0x110] sm:$0xff] %v2891_v5  ;;  %v2894_v10 = vadd.f32 %v2893_v8, %v4823_v52  ;;  %v2895_v58 = vpop.f32.mrb[255].mxu1 }
 0x5db   :  { %3044 = vst [vmem:[%s5103_s8 + $0x118] sm:$0xff] %v2894_v10 }
 0x5de   :  { %v2898_v42 = vpop.f32.mrb[0].mxu1 }
 0x5df   :  { %v2899_v45 = vadd.f32 %v2898_v42, %v4823_v52  ;;  %v2900_v11 = vpop.f32.mrb[1].mxu1 }
 0x5e0   :  { %v2901_v12 = vpop.f32.mrb[2].mxu1 }
 0x5e1   :  { %3045 = vst [vmem:[%s5103_s8 + $0x120] sm:$0xff] %v2899_v45  ;;  %v2902_v13 = vadd.f32 %v2901_v12, %v4823_v52  ;;  %v2903_v14 = vpop.f32.mrb[3].mxu1 }
 0x5e3   :  { %3046 = vst [vmem:[%s5103_s8 + $0x128] sm:$0xff] %v2902_v13 }
 0x5e6   :  { %v2906_v39 = vpop.f32.mrb[4].mxu1 }
 0x5e7   :  { %v2907_v40 = vadd.f32 %v2906_v39, %v4823_v52  ;;  %v2908_v60 = vpop.f32.mrb[5].mxu1 }
 0x5e8   :  { %v2909_v15 = vpop.f32.mrb[6].mxu1 }
 0x5e9   :  { %3047 = vst [vmem:[%s5103_s8 + $0x130] sm:$0xff] %v2907_v40  ;;  %v2910_v16 = vadd.f32 %v2909_v15, %v4823_v52  ;;  %v2911_v17 = vpop.f32.mrb[7].mxu1 }
 0x5eb   :  { %3048 = vst [vmem:[%s5103_s8 + $0x138] sm:$0xff] %v2910_v16 }
 0x5ee   :  { %v2914_v18 = vpop.f32.mrb[8].mxu1 }
 0x5ef   :  { %v2915_v61 = vadd.f32 %v2914_v18, %v4823_v52  ;;  %v2916_v9 = vpop.f32.mrb[9].mxu1 }
 0x5f0   :  { %v2917_v0 = vpop.f32.mrb[10].mxu1 }
 0x5f1   :  { %3049 = vst [vmem:[%s5103_s8 + $0x140] sm:$0xff] %v2915_v61  ;;  %v2918_v19 = vadd.f32 %v2917_v0, %v4823_v52  ;;  %v2919_v20 = vpop.f32.mrb[11].mxu1 }
 0x5f3   :  { %3050 = vst [vmem:[%s5103_s8 + $0x148] sm:$0xff] %v2918_v19 }
 0x5f6   :  { %v2922_v21 = vpop.f32.mrb[12].mxu1 }
 0x5f7   :  { %v2923_v22 = vadd.f32 %v2922_v21, %v4823_v52  ;;  %v2924_v23 = vpop.f32.mrb[13].mxu1 }
 0x5f8   :  { %v2925_v24 = vpop.f32.mrb[14].mxu1 }
 0x5f9   :  { %3051 = vst [vmem:[%s5103_s8 + $0x150] sm:$0xff] %v2923_v22  ;;  %v2926_v25 = vadd.f32 %v2925_v24, %v4823_v52  ;;  %v2927_v55 = vpop.f32.mrb[15].mxu1 }
 0x5fb   :  { %3052 = vst [vmem:[%s5103_s8 + $0x158] sm:$0xff] %v2926_v25 }
 0x5fe   :  { %v2930_v57 = vpop.f32.mrb[16].mxu1 }
 0x5ff   :  { %v2931_v62 = vadd.f32 %v2930_v57, %v4823_v52  ;;  %v2932_v26 = vpop.f32.mrb[17].mxu1 }
 0x600   :  { %v2933_v27 = vpop.f32.mrb[18].mxu1 }
 0x601   :  { %3053 = vst [vmem:[%s5103_s8 + $0x160] sm:$0xff] %v2931_v62  ;;  %v2934_v28 = vadd.f32 %v2933_v27, %v4823_v52  ;;  %v2935_v29 = vpop.f32.mrb[19].mxu1 }
 0x603   :  { %3054 = vst [vmem:[%s5103_s8 + $0x168] sm:$0xff] %v2934_v28 }
 0x606   :  { %v2938_v30 = vpop.f32.mrb[20].mxu1 }
 0x607   :  { %v2939_v31 = vadd.f32 %v2938_v30, %v4823_v52  ;;  %v2940_v32 = vpop.f32.mrb[21].mxu1 }
 0x608   :  { %v2941_v33 = vpop.f32.mrb[22].mxu1 }
 0x609   :  { %3055 = vst [vmem:[%s5103_s8 + $0x170] sm:$0xff] %v2939_v31  ;;  %v2942_v35 = vadd.f32 %v2941_v33, %v4823_v52  ;;  %v2943_v34 = vpop.f32.mrb[23].mxu1 }
 0x60b   :  { %3056 = vst [vmem:[%s5103_s8 + $0x178] sm:$0xff] %v2942_v35 }
 0x60e   :  { %v2946_v36 = vpop.f32.mrb[24].mxu1 }
 0x60f   :  { %v2947_v37 = vadd.f32 %v2946_v36, %v4823_v52  ;;  %v2948_v6 = vpop.f32.mrb[25].mxu1 }
 0x610   :  { %v2949_v38 = vpop.f32.mrb[26].mxu1 }
 0x611   :  { %3057 = vst [vmem:[%s5103_s8 + $0x180] sm:$0xff] %v2947_v37  ;;  %v2950_v1 = vadd.f32 %v2949_v38, %v4823_v52  ;;  %v2951_v63 = vpop.f32.mrb[27].mxu1 }
 0x613   :  { %3058 = vst [vmem:[%s5103_s8 + $0x188] sm:$0xff] %v2950_v1 }
 0x616   :  { %v2954_v41 = vpop.f32.mrb[28].mxu1 }
 0x617   :  { %v2955_v2 = vadd.f32 %v2954_v41, %v4823_v52  ;;  %v2956_v56 = vpop.f32.mrb[29].mxu1 }
 0x618   :  { %v2957_v43 = vpop.f32.mrb[30].mxu1 }
 0x619   :  { %3059 = vst [vmem:[%s5103_s8 + $0x190] sm:$0xff] %v2955_v2  ;;  %v2958_v44 = vadd.f32 %v2957_v43, %v4823_v52  ;;  %v2959_v46 = vpop.f32.mrb[31].mxu1 }
 0x61b   :  { %3060 = vst [vmem:[%s5103_s8 + $0x198] sm:$0xff] %v2958_v44 }
 0x61e   :  { %v2962_v47 = vpop.f32.mrb[32].mxu1 }
 0x61f   :  { %v2963_v48 = vadd.f32 %v2962_v47, %v4823_v52  ;;  %v2964_v49 = vpop.f32.mrb[33].mxu1 }
 0x620   :  { %v2965_v50 = vpop.f32.mrb[34].mxu1 }
 0x621   :  { %3061 = vst [vmem:[%s5103_s8 + $0x1a0] sm:$0xff] %v2963_v48  ;;  %v2966_v51 = vadd.f32 %v2965_v50, %v4823_v52  ;;  %v2967_v4 = vpop.f32.mrb[35].mxu1 }
 0x623   :  { %3062 = vst [vmem:[%s5103_s8 + $0x1a8] sm:$0xff] %v2966_v51 }
 0x626   :  { %v2970_v53 = vpop.f32.mrb[36].mxu1 }
 0x627   :  { %v2971_v54 = vadd.f32 %v2970_v53, %v4823_v52  ;;  %v2972_v59 = vpop.f32.mrb[37].mxu1 }
 0x628   :  { %v2973_v3 = vpop.f32.mrb[38].mxu1 }
 0x629   :  { %3063 = vst [vmem:[%s5103_s8 + $0x1b0] sm:$0xff] %v2971_v54  ;;  %v2974_v5 = vadd.f32 %v2973_v3, %v4823_v52  ;;  %v2975_v7 = vpop.f32.mrb[39].mxu1 }
 0x62b   :  { %3064 = vst [vmem:[%s5103_s8 + $0x1b8] sm:$0xff] %v2974_v5 }
 0x62e   :  { %v2978_v8 = vpop.f32.mrb[40].mxu1 }
 0x62f   :  { %v2979_v10 = vadd.f32 %v2978_v8, %v4823_v52  ;;  %v2980_v58 = vpop.f32.mrb[41].mxu1 }
 0x630   :  { %v2981_v42 = vpop.f32.mrb[42].mxu1 }
 0x631   :  { %3065 = vst [vmem:[%s5103_s8 + $0x1c0] sm:$0xff] %v2979_v10  ;;  %v2982_v45 = vadd.f32 %v2981_v42, %v4823_v52  ;;  %v2983_v11 = vpop.f32.mrb[43].mxu1 }
 0x633   :  { %3066 = vst [vmem:[%s5103_s8 + $0x1c8] sm:$0xff] %v2982_v45 }
 0x636   :  { %v2986_v12 = vpop.f32.mrb[44].mxu1 }
 0x637   :  { %v2987_v13 = vadd.f32 %v2986_v12, %v4823_v52  ;;  %v2988_v14 = vpop.f32.mrb[45].mxu1 }
 0x638   :  { %v2989_v39 = vpop.f32.mrb[46].mxu1 }
 0x639   :  { %3067 = vst [vmem:[%s5103_s8 + $0x1d0] sm:$0xff] %v2987_v13  ;;  %v2990_v40 = vadd.f32 %v2989_v39, %v4823_v52  ;;  %v2991_v60 = vpop.f32.mrb[47].mxu1 }
 0x63b   :  { %3068 = vst [vmem:[%s5103_s8 + $0x1d8] sm:$0xff] %v2990_v40 }
 0x63e   :  { %v2994_v15 = vpop.f32.mrb[48].mxu1 }
 0x63f   :  { %v2995_v16 = vadd.f32 %v2994_v15, %v4823_v52  ;;  %v2996_v17 = vpop.f32.mrb[49].mxu1 }
 0x640   :  { %v2997_v18 = vpop.f32.mrb[50].mxu1 }
 0x641   :  { %3069 = vst [vmem:[%s5103_s8 + $0x1e0] sm:$0xff] %v2995_v16  ;;  %v2998_v61 = vadd.f32 %v2997_v18, %v4823_v52  ;;  %v2999_v9 = vpop.f32.mrb[51].mxu1 }
 0x643   :  { %3070 = vst [vmem:[%s5103_s8 + $0x1e8] sm:$0xff] %v2998_v61 }
 0x646   :  { %v3002_v0 = vpop.f32.mrb[52].mxu1 }
 0x647   :  { %v3003_v19 = vadd.f32 %v3002_v0, %v4823_v52  ;;  %v3004_v20 = vpop.f32.mrb[53].mxu1 }
 0x648   :  { %v3005_v21 = vpop.f32.mrb[54].mxu1 }
 0x649   :  { %3071 = vst [vmem:[%s5103_s8 + $0x1f0] sm:$0xff] %v3003_v19  ;;  %v3006_v22 = vadd.f32 %v3005_v21, %v4823_v52  ;;  %v3007_v23 = vpop.f32.mrb[55].mxu1 }
 0x64b   :  { %3072 = vst [vmem:[%s5103_s8 + $0x1f8] sm:$0xff] %v3006_v22 }

</bundles_post_ra>
